<compile_context>
chip_gen: v7x
topology: tpu7x:2x2x1
jax: 0.10.0
libtpu: 0.0.40
codegen_flags: <defaults>
</compile_context>

<pallas_src>
import jax
import jax.numpy as jnp
from jax.experimental import pallas as pl
from jax.experimental.pallas import tpu as pltpu


# --------------------------- architecture constants ---------------------------

L_IN = 15910                       # minimal length giving the 1280-dim flatten
K1, S1 = 13, 7
K2, S2 = 11, 7
K3, S3 = 9, 5
C0, C1, C2, C3 = 2, 20, 40, 20
N_CLS = 3

L1 = (L_IN - K1) // S1 + 1         # 2272
L2 = (L1 - K2) // S2 + 1           # 324
L3 = (L2 - K3) // S3 + 1           # 64   (20*64 = 1280 -> Linear(1280,3))

T1, T2, T3 = S1 * S2 * S3, S2 * S3, S3       # input phase-split stride per layer: 245,35,5
NC3 = L3                                     # output columns of layer 3 (natural order)
NC2 = NC3 + 1                                # 65  columns of layer-2 output / layer-3 input
NC1 = NC2 + 1                                # 66  columns of layer-1 output / layer-2 input
NC0 = NC1 + 1                                # 67  columns of the phase-split input

R0, OVF1 = T1 * C0, (K1 - S1) * C0           # 490, 12
R1, OVF2 = T2 * C1, (K2 - S2) * C1           # 700, 80
R2, OVF3 = T3 * C2, (K3 - S3) * C2           # 200, 160


# ------------------------------ fused kernel ---------------------------------

def _fused_kernel(x_ref, w1m_ref, w1o_ref, b1_ref, w2m_ref, w2o_ref, b2_ref,
                  w3m_ref, w3o_ref, b3_ref, wc_ref, bc_ref, o_ref):
    # x_ref: (490, 67) bf16, phase-split input at stride 245, rows = (phase t, channel c).
    a0 = x_ref[...]

    # conv1: split-245 input -> split-35 output (700, 66), rows = (t, out-channel).
    h1 = jnp.dot(w1m_ref[...], a0[:, 0:NC1], preferred_element_type=jnp.float32)
    h1 = h1 + jnp.dot(w1o_ref[...], a0[0:OVF1, 1:NC1 + 1],
                      preferred_element_type=jnp.float32)
    a1 = jnp.maximum(h1 + b1_ref[...], 0.0).astype(jnp.bfloat16)          # (700, 66)

    # conv2: split-35 input -> split-5 output (200, 65).
    h2 = jnp.dot(w2m_ref[...], a1[:, 0:NC2], preferred_element_type=jnp.float32)
    h2 = h2 + jnp.dot(w2o_ref[...], a1[0:OVF2, 1:NC2 + 1],
                      preferred_element_type=jnp.float32)
    a2 = jnp.maximum(h2 + b2_ref[...], 0.0).astype(jnp.bfloat16)          # (200, 65)

    # conv3: split-5 input -> natural-order output (20, 64).
    h3 = jnp.dot(w3m_ref[...], a2[:, 0:NC3], preferred_element_type=jnp.float32)
    h3 = h3 + jnp.dot(w3o_ref[...], a2[0:OVF3, 1:NC3 + 1],
                      preferred_element_type=jnp.float32)
    a3 = jnp.maximum(h3 + b3_ref[...], 0.0)                               # (20, 64) f32

    # classifier: logits[n] = sum_{o,j} wc[n,o,j] * a3[o,j] + bc[n]   (PyTorch flatten order)
    prod = wc_ref[...] * a3[None, :, :]                                   # (3, 20, 64) f32
    logits = jnp.sum(jnp.sum(prod, axis=-1), axis=-1, keepdims=True) + bc_ref[...]
    o_ref[...] = logits                                                   # (3, 1)


# ------------------------- weight / input preparation -------------------------

def _expand_conv_weight(w, stride, t_out):
    """w (Cout, Cin, K) -> banded matrix (t_out*Cout, (t_out*stride + K - stride)*Cin).

    Row (t*Cout + o), column (u*Cin + c) holds w[o, c, u - t*stride] when that tap exists,
    else 0.  Against the phase-split patch P[u*Cin + c, m] = a[c, m*T_in + u] it yields
    Y[t*Cout + o, m] = conv(a)[o, m*t_out + t], i.e. the output already phase-split at
    stride t_out with (phase, channel) row order."""
    c_out, c_in, k = w.shape
    u_dim = t_out * stride + (k - stride)
    ku = jnp.arange(k)[:, None, None]
    tu = jnp.arange(t_out)[None, :, None]
    uu = jnp.arange(u_dim)[None, None, :]
    onehot = (uu == tu * stride + ku).astype(jnp.float32)                 # (K, t_out, U)
    wexp = jnp.einsum("ock,ktu->touc", w.astype(jnp.float32), onehot)
    return wexp.reshape(t_out * c_out, u_dim * c_in).astype(jnp.bfloat16)


def prepare_params(params):
    """One-time, off-the-hot-path expansion of the PyTorch-style params."""
    w1e = _expand_conv_weight(params["w1"], stride=S1, t_out=T2)   # (700, 502)
    w2e = _expand_conv_weight(params["w2"], stride=S2, t_out=T3)   # (200, 780)
    w3e = _expand_conv_weight(params["w3"], stride=S3, t_out=1)    # (20, 360)
    return {
        "w1m": w1e[:, :R0], "w1o": w1e[:, R0:],
        "b1": jnp.tile(params["b1"], T2).reshape(T2 * C1, 1).astype(jnp.float32),
        "w2m": w2e[:, :R1], "w2o": w2e[:, R1:],
        "b2": jnp.tile(params["b2"], T3).reshape(T3 * C2, 1).astype(jnp.float32),
        "w3m": w3e[:, :R2], "w3o": w3e[:, R2:],
        "b3": params["b3"].reshape(C3, 1).astype(jnp.float32),
        "wc": params["wc"].reshape(N_CLS, C3, L3).astype(jnp.float32),
        "bc": params["bc"].reshape(N_CLS, 1).astype(jnp.float32),
    }


def _phase_split_input(x):
    """x (B, 2, L) -> (B, 490, 67) bf16 with out[b, t*2 + c, m] = x[b, c, m*245 + t]."""
    b, c, l = x.shape
    need = NC0 * T1
    x = x.astype(jnp.bfloat16)
    x = jnp.pad(x, ((0, 0), (0, 0), (0, need - l))) if need > l else x[:, :, :need]
    return x.reshape(b, c, NC0, T1).transpose(0, 3, 1, 2).reshape(b, T1 * c, NC0)


# --------------------------------- forward -----------------------------------

def _const_spec(a):
    return pl.BlockSpec(a.shape, lambda i, _nd=a.ndim: (0,) * _nd)


@jax.jit
def my_dsp_net(prep, x):
    b = x.shape[0]
    xs = _phase_split_input(x)                                   # (B, 490, 67) bf16
    out = pl.pallas_call(
        _fused_kernel,
        out_shape=jax.ShapeDtypeStruct((b, N_CLS, 1), jnp.float32),
        grid=(b,),
        in_specs=[
            pl.BlockSpec((None,) + xs.shape[1:], lambda i: (i, 0, 0)),
            _const_spec(prep["w1m"]), _const_spec(prep["w1o"]), _const_spec(prep["b1"]),
            _const_spec(prep["w2m"]), _const_spec(prep["w2o"]), _const_spec(prep["b2"]),
            _const_spec(prep["w3m"]), _const_spec(prep["w3o"]), _const_spec(prep["b3"]),
            _const_spec(prep["wc"]), _const_spec(prep["bc"]),
        ],
        out_specs=pl.BlockSpec((None, N_CLS, 1), lambda i: (i, 0, 0)),
        compiler_params=pltpu.CompilerParams(dimension_semantics=("parallel",)),
    )(xs, prep["w1m"], prep["w1o"], prep["b1"], prep["w2m"], prep["w2o"], prep["b2"],
      prep["w3m"], prep["w3o"], prep["b3"], prep["wc"], prep["bc"])
    return out[:, :, 0]


# ------------------------------ reference & test ------------------------------

def init_params(key):
    """Deterministic synthetic params, PyTorch-default-style uniform(-1/sqrt(fan_in), +)."""
    ks = jax.random.split(key, 8)

    def u(k, shape, fan_in):
        bound = 1.0 / float(fan_in) ** 0.5
        return jax.random.uniform(k, shape, jnp.float32, -bound, bound)

    return {
        "w1": u(ks[0], (C1, C0, K1), C0 * K1),   "b1": u(ks[1], (C1,), C0 * K1),
        "w2": u(ks[2], (C2, C1, K2), C1 * K2),   "b2": u(ks[3], (C2,), C1 * K2),
        "w3": u(ks[4], (C3, C2, K3), C2 * K3),   "b3": u(ks[5], (C3,), C2 * K3),
        "wc": u(ks[6], (N_CLS, C3 * L3), C3 * L3), "bc": u(ks[7], (N_CLS,), C3 * L3),
    }


def reference_forward(params, x):
    """Pure-JAX f32 reference of the PyTorch module (inference mode)."""
    h = x
    for w, bb, s in ((params["w1"], params["b1"], S1),
                     (params["w2"], params["b2"], S2),
                     (params["w3"], params["b3"], S3)):
        h = jax.lax.conv_general_dilated(h, w, window_strides=(s,), padding="VALID",
                                         dimension_numbers=("NCH", "OIH", "NCH"))
        h = jax.nn.relu(h + bb[None, :, None])
    h = h.reshape(h.shape[0], -1)
    return h @ params["wc"].T + params["bc"]


if __name__ == "__main__":
    key = jax.random.PRNGKey(0)
    pkey, xkey = jax.random.split(key)
    params = init_params(pkey)
    prep = prepare_params(params)          # one-time weight expansion (off the hot path)

    # L_in = 15910 is the minimal signal length that yields the 1280-dim flatten required
    # by nn.Linear(1280, 3): 15910 -> 2272 -> 324 -> 64, and 20 * 64 = 1280.
    x = jax.random.normal(xkey, (2, C0, L_IN), dtype=jnp.float32)

    out = my_dsp_net(prep, x)
    jax.block_until_ready(out)
    assert out.shape == (2, N_CLS)

    # Parity check vs. the f32 reference (kernel uses bf16 MXU operands -> loose tolerance).
    ref = reference_forward(params, x)
    err = float(jnp.max(jnp.abs(out - ref)))
    scale = float(jnp.max(jnp.abs(ref)))
    assert err <= 0.2 * scale + 5e-3, f"kernel/reference mismatch: err={err}, scale={scale}"

    print("KERNEL_OK")
</pallas_src>

<mosaic_0001>
module attributes {stable_mosaic.version = 11 : i64} {
  func.func @_fused_kernel(%arg0: i32, %arg1: memref<1x490x67xbf16, #tpu.memory_space<vmem>>, %arg2: memref<700x490xbf16, #tpu.memory_space<vmem>>, %arg3: memref<700x12xbf16, #tpu.memory_space<vmem>>, %arg4: memref<700x1xf32, #tpu.memory_space<vmem>>, %arg5: memref<200x700xbf16, #tpu.memory_space<vmem>>, %arg6: memref<200x80xbf16, #tpu.memory_space<vmem>>, %arg7: memref<200x1xf32, #tpu.memory_space<vmem>>, %arg8: memref<20x200xbf16, #tpu.memory_space<vmem>>, %arg9: memref<20x160xbf16, #tpu.memory_space<vmem>>, %arg10: memref<20x1xf32, #tpu.memory_space<vmem>>, %arg11: memref<3x20x64xf32, #tpu.memory_space<vmem>>, %arg12: memref<3x1xf32, #tpu.memory_space<vmem>>, %arg13: memref<1x3x1xf32, #tpu.memory_space<vmem>>) attributes {dimension_semantics = [#tpu.dimension_semantics<parallel>], iteration_bounds = array<i64: 2>, scalar_prefetch = 0 : i64, scratch_operands = 0 : i64, tpu.core_type = #tpu.core_type<tc>, window_params = [{transform_indices = @transform_0, window_bounds = array<i64: 1, 490, 67>}, {pipeline_mode = #tpu.pipeline_mode<synchronous>, transform_indices = @transform_1, window_bounds = array<i64: 700, 490>}, {pipeline_mode = #tpu.pipeline_mode<synchronous>, transform_indices = @transform_2, window_bounds = array<i64: 700, 12>}, {pipeline_mode = #tpu.pipeline_mode<synchronous>, transform_indices = @transform_3, window_bounds = array<i64: 700, 1>}, {pipeline_mode = #tpu.pipeline_mode<synchronous>, transform_indices = @transform_4, window_bounds = array<i64: 200, 700>}, {pipeline_mode = #tpu.pipeline_mode<synchronous>, transform_indices = @transform_5, window_bounds = array<i64: 200, 80>}, {pipeline_mode = #tpu.pipeline_mode<synchronous>, transform_indices = @transform_6, window_bounds = array<i64: 200, 1>}, {pipeline_mode = #tpu.pipeline_mode<synchronous>, transform_indices = @transform_7, window_bounds = array<i64: 20, 200>}, {pipeline_mode = #tpu.pipeline_mode<synchronous>, transform_indices = @transform_8, window_bounds = array<i64: 20, 160>}, {pipeline_mode = #tpu.pipeline_mode<synchronous>, transform_indices = @transform_9, window_bounds = array<i64: 20, 1>}, {pipeline_mode = #tpu.pipeline_mode<synchronous>, transform_indices = @transform_10, window_bounds = array<i64: 3, 20, 64>}, {pipeline_mode = #tpu.pipeline_mode<synchronous>, transform_indices = @transform_11, window_bounds = array<i64: 3, 1>}, {transform_indices = @transform_12, window_bounds = array<i64: 1, 3, 1>}]} {
    %c0 = arith.constant 0 : index
    %c0_0 = arith.constant 0 : index
    %c0_1 = arith.constant 0 : index
    %0 = vector.load %arg1[%c0, %c0_0, %c0_1] : memref<1x490x67xbf16, #tpu.memory_space<vmem>>, vector<1x490x67xbf16>
    %1 = vector.shape_cast %0 : vector<1x490x67xbf16> to vector<490x67xbf16>
    %c0_2 = arith.constant 0 : index
    %c0_3 = arith.constant 0 : index
    %2 = vector.load %arg2[%c0_2, %c0_3] : memref<700x490xbf16, #tpu.memory_space<vmem>>, vector<700x490xbf16>
    %3 = vector.extract_strided_slice %1 {offsets = [0, 0], sizes = [490, 66], strides = [1, 1]} : vector<490x67xbf16> to vector<490x66xbf16>
    %cst = arith.constant dense<0.000000e+00> : vector<700x66xf32>
    %4 = tpu.matmul %2, %3, %cst {dimension_numbers = #tpu.dot_dimension_numbers<[1], [0], [0], [1], [0, 0, 1, 1], [], []>} : vector<700x490xbf16>, vector<490x66xbf16>, vector<700x66xf32> -> vector<700x66xf32>
    %c0_4 = arith.constant 0 : index
    %c0_5 = arith.constant 0 : index
    %5 = vector.load %arg3[%c0_4, %c0_5] : memref<700x12xbf16, #tpu.memory_space<vmem>>, vector<700x12xbf16>
    %6 = vector.extract_strided_slice %1 {offsets = [0, 1], sizes = [12, 66], strides = [1, 1]} : vector<490x67xbf16> to vector<12x66xbf16>
    %cst_6 = arith.constant dense<0.000000e+00> : vector<700x66xf32>
    %7 = tpu.matmul %5, %6, %cst_6 {dimension_numbers = #tpu.dot_dimension_numbers<[1], [0], [0], [1], [0, 0, 1, 1], [], []>} : vector<700x12xbf16>, vector<12x66xbf16>, vector<700x66xf32> -> vector<700x66xf32>
    %8 = arith.addf %4, %7 : vector<700x66xf32>
    %c0_7 = arith.constant 0 : index
    %c0_8 = arith.constant 0 : index
    %9 = vector.load %arg4[%c0_7, %c0_8] : memref<700x1xf32, #tpu.memory_space<vmem>>, vector<700x1xf32>
    %10 = vector.broadcast %9 : vector<700x1xf32> to vector<700x66xf32>
    %11 = arith.addf %8, %10 : vector<700x66xf32>
    %cst_9 = arith.constant 0.000000e+00 : f32
    %12 = vector.broadcast %cst_9 : f32 to vector<700x66xf32>
    %13 = arith.maximumf %11, %12 : vector<700x66xf32>
    %14 = arith.truncf %13 : vector<700x66xf32> to vector<700x66xbf16>
    %c0_10 = arith.constant 0 : index
    %c0_11 = arith.constant 0 : index
    %15 = vector.load %arg5[%c0_10, %c0_11] : memref<200x700xbf16, #tpu.memory_space<vmem>>, vector<200x700xbf16>
    %16 = vector.extract_strided_slice %14 {offsets = [0, 0], sizes = [700, 65], strides = [1, 1]} : vector<700x66xbf16> to vector<700x65xbf16>
    %cst_12 = arith.constant dense<0.000000e+00> : vector<200x65xf32>
    %17 = tpu.matmul %15, %16, %cst_12 {dimension_numbers = #tpu.dot_dimension_numbers<[1], [0], [0], [1], [0, 0, 1, 1], [], []>} : vector<200x700xbf16>, vector<700x65xbf16>, vector<200x65xf32> -> vector<200x65xf32>
    %c0_13 = arith.constant 0 : index
    %c0_14 = arith.constant 0 : index
    %18 = vector.load %arg6[%c0_13, %c0_14] : memref<200x80xbf16, #tpu.memory_space<vmem>>, vector<200x80xbf16>
    %19 = vector.extract_strided_slice %14 {offsets = [0, 1], sizes = [80, 65], strides = [1, 1]} : vector<700x66xbf16> to vector<80x65xbf16>
    %cst_15 = arith.constant dense<0.000000e+00> : vector<200x65xf32>
    %20 = tpu.matmul %18, %19, %cst_15 {dimension_numbers = #tpu.dot_dimension_numbers<[1], [0], [0], [1], [0, 0, 1, 1], [], []>} : vector<200x80xbf16>, vector<80x65xbf16>, vector<200x65xf32> -> vector<200x65xf32>
    %21 = arith.addf %17, %20 : vector<200x65xf32>
    %c0_16 = arith.constant 0 : index
    %c0_17 = arith.constant 0 : index
    %22 = vector.load %arg7[%c0_16, %c0_17] : memref<200x1xf32, #tpu.memory_space<vmem>>, vector<200x1xf32>
    %23 = vector.broadcast %22 : vector<200x1xf32> to vector<200x65xf32>
    %24 = arith.addf %21, %23 : vector<200x65xf32>
    %cst_18 = arith.constant 0.000000e+00 : f32
    %25 = vector.broadcast %cst_18 : f32 to vector<200x65xf32>
    %26 = arith.maximumf %24, %25 : vector<200x65xf32>
    %27 = arith.truncf %26 : vector<200x65xf32> to vector<200x65xbf16>
    %c0_19 = arith.constant 0 : index
    %c0_20 = arith.constant 0 : index
    %28 = vector.load %arg8[%c0_19, %c0_20] : memref<20x200xbf16, #tpu.memory_space<vmem>>, vector<20x200xbf16>
    %29 = vector.extract_strided_slice %27 {offsets = [0, 0], sizes = [200, 64], strides = [1, 1]} : vector<200x65xbf16> to vector<200x64xbf16>
    %cst_21 = arith.constant dense<0.000000e+00> : vector<20x64xf32>
    %30 = tpu.matmul %28, %29, %cst_21 {dimension_numbers = #tpu.dot_dimension_numbers<[1], [0], [0], [1], [0, 0, 1, 1], [], []>} : vector<20x200xbf16>, vector<200x64xbf16>, vector<20x64xf32> -> vector<20x64xf32>
    %c0_22 = arith.constant 0 : index
    %c0_23 = arith.constant 0 : index
    %31 = vector.load %arg9[%c0_22, %c0_23] : memref<20x160xbf16, #tpu.memory_space<vmem>>, vector<20x160xbf16>
    %32 = vector.extract_strided_slice %27 {offsets = [0, 1], sizes = [160, 64], strides = [1, 1]} : vector<200x65xbf16> to vector<160x64xbf16>
    %cst_24 = arith.constant dense<0.000000e+00> : vector<20x64xf32>
    %33 = tpu.matmul %31, %32, %cst_24 {dimension_numbers = #tpu.dot_dimension_numbers<[1], [0], [0], [1], [0, 0, 1, 1], [], []>} : vector<20x160xbf16>, vector<160x64xbf16>, vector<20x64xf32> -> vector<20x64xf32>
    %34 = arith.addf %30, %33 : vector<20x64xf32>
    %c0_25 = arith.constant 0 : index
    %c0_26 = arith.constant 0 : index
    %35 = vector.load %arg10[%c0_25, %c0_26] : memref<20x1xf32, #tpu.memory_space<vmem>>, vector<20x1xf32>
    %36 = vector.broadcast %35 : vector<20x1xf32> to vector<20x64xf32>
    %37 = arith.addf %34, %36 : vector<20x64xf32>
    %cst_27 = arith.constant 0.000000e+00 : f32
    %38 = vector.broadcast %cst_27 : f32 to vector<20x64xf32>
    %39 = arith.maximumf %37, %38 : vector<20x64xf32>
    %c0_28 = arith.constant 0 : index
    %c0_29 = arith.constant 0 : index
    %c0_30 = arith.constant 0 : index
    %40 = vector.load %arg11[%c0_28, %c0_29, %c0_30] : memref<3x20x64xf32, #tpu.memory_space<vmem>>, vector<3x20x64xf32>
    %41 = vector.shape_cast %39 : vector<20x64xf32> to vector<1x20x64xf32>
    %42 = vector.broadcast %41 : vector<1x20x64xf32> to vector<3x20x64xf32>
    %43 = arith.mulf %40, %42 : vector<3x20x64xf32>
    %cst_31 = arith.constant dense<0.000000e+00> : vector<3x20xf32>
    %44 = vector.multi_reduction <add>, %43, %cst_31 [2] : vector<3x20x64xf32> to vector<3x20xf32>
    %cst_32 = arith.constant dense<0.000000e+00> : vector<3xf32>
    %45 = vector.multi_reduction <add>, %44, %cst_32 [1] : vector<3x20xf32> to vector<3xf32>
    %46 = vector.shape_cast %45 : vector<3xf32> to vector<3x1xf32>
    %c0_33 = arith.constant 0 : index
    %c0_34 = arith.constant 0 : index
    %47 = vector.load %arg12[%c0_33, %c0_34] : memref<3x1xf32, #tpu.memory_space<vmem>>, vector<3x1xf32>
    %48 = arith.addf %46, %47 : vector<3x1xf32>
    %c0_35 = arith.constant 0 : index
    %c0_36 = arith.constant 0 : index
    %c0_37 = arith.constant 0 : index
    %49 = vector.load %arg13[%c0_35, %c0_36, %c0_37] : memref<1x3x1xf32, #tpu.memory_space<vmem>>, vector<1x3x1xf32>
    %50 = vector.shape_cast %49 : vector<1x3x1xf32> to vector<3x1xf32>
    %51 = vector.shape_cast %48 : vector<3x1xf32> to vector<1x3x1xf32>
    tpu.vector_store %arg13[%c0_35, %c0_36, %c0_37], %51 {strides = array<i32>} : memref<1x3x1xf32, #tpu.memory_space<vmem>>, vector<1x3x1xf32>,
    return
  }
  func.func @transform_0(%arg0: i32) -> (i32, i32, i32) {
    %c0_i32 = arith.constant 0 : i32
    %c0_i32_0 = arith.constant 0 : i32
    %c0_i32_1 = arith.constant 0 : i32
    return %arg0, %c0_i32, %c0_i32_0 : i32, i32, i32
  }
  func.func @transform_1(%arg0: i32) -> (i32, i32) {
    %c0_i32 = arith.constant 0 : i32
    %c0_i32_0 = arith.constant 0 : i32
    %c0_i32_1 = arith.constant 0 : i32
    return %c0_i32, %c0_i32_0 : i32, i32
  }
  func.func @transform_2(%arg0: i32) -> (i32, i32) {
    %c0_i32 = arith.constant 0 : i32
    %c0_i32_0 = arith.constant 0 : i32
    %c0_i32_1 = arith.constant 0 : i32
    return %c0_i32, %c0_i32_0 : i32, i32
  }
  func.func @transform_3(%arg0: i32) -> (i32, i32) {
    %c0_i32 = arith.constant 0 : i32
    %c0_i32_0 = arith.constant 0 : i32
    %c0_i32_1 = arith.constant 0 : i32
    return %c0_i32, %c0_i32_0 : i32, i32
  }
  func.func @transform_4(%arg0: i32) -> (i32, i32) {
    %c0_i32 = arith.constant 0 : i32
    %c0_i32_0 = arith.constant 0 : i32
    %c0_i32_1 = arith.constant 0 : i32
    return %c0_i32, %c0_i32_0 : i32, i32
  }
  func.func @transform_5(%arg0: i32) -> (i32, i32) {
    %c0_i32 = arith.constant 0 : i32
    %c0_i32_0 = arith.constant 0 : i32
    %c0_i32_1 = arith.constant 0 : i32
    return %c0_i32, %c0_i32_0 : i32, i32
  }
  func.func @transform_6(%arg0: i32) -> (i32, i32) {
    %c0_i32 = arith.constant 0 : i32
    %c0_i32_0 = arith.constant 0 : i32
    %c0_i32_1 = arith.constant 0 : i32
    return %c0_i32, %c0_i32_0 : i32, i32
  }
  func.func @transform_7(%arg0: i32) -> (i32, i32) {
    %c0_i32 = arith.constant 0 : i32
    %c0_i32_0 = arith.constant 0 : i32
    %c0_i32_1 = arith.constant 0 : i32
    return %c0_i32, %c0_i32_0 : i32, i32
  }
  func.func @transform_8(%arg0: i32) -> (i32, i32) {
    %c0_i32 = arith.constant 0 : i32
    %c0_i32_0 = arith.constant 0 : i32
    %c0_i32_1 = arith.constant 0 : i32
    return %c0_i32, %c0_i32_0 : i32, i32
  }
  func.func @transform_9(%arg0: i32) -> (i32, i32) {
    %c0_i32 = arith.constant 0 : i32
    %c0_i32_0 = arith.constant 0 : i32
    %c0_i32_1 = arith.constant 0 : i32
    return %c0_i32, %c0_i32_0 : i32, i32
  }
  func.func @transform_10(%arg0: i32) -> (i32, i32, i32) {
    %c0_i32 = arith.constant 0 : i32
    %c0_i32_0 = arith.constant 0 : i32
    %c0_i32_1 = arith.constant 0 : i32
    %c0_i32_2 = arith.constant 0 : i32
    return %c0_i32, %c0_i32_0, %c0_i32_1 : i32, i32, i32
  }
  func.func @transform_11(%arg0: i32) -> (i32, i32) {
    %c0_i32 = arith.constant 0 : i32
    %c0_i32_0 = arith.constant 0 : i32
    %c0_i32_1 = arith.constant 0 : i32
    return %c0_i32, %c0_i32_0 : i32, i32
  }
  func.func @transform_12(%arg0: i32) -> (i32, i32, i32) {
    %c0_i32 = arith.constant 0 : i32
    %c0_i32_0 = arith.constant 0 : i32
    %c0_i32_1 = arith.constant 0 : i32
    return %arg0, %c0_i32, %c0_i32_0 : i32, i32, i32
  }
}

</mosaic_0001>

<bundles_post_ra>
// kernel: my_dsp_net.1
= control target key start
LH: loop header
LB: loop body
LE: loop exit
PB: predicated region body
PF: predicated region fallthrough
CT: control target
= control target key end

     0   :  { %s7383_s21 = smov 0   ;;  %s9968_s0 = inlined_call_operand.vmem [shape: bf16[2,490,67], index: 0, kind: input, shape index: {}]   ;;  %s9969_s1 = inlined_call_operand.vmem [shape: bf16[700,490], index: 1, kind: input, shape index: {}]   ;;  %s9970_s2 = inlined_call_operand.vmem [shape: bf16[700,12], index: 2, kind: input, shape index: {}]   ;;  %s9971_s3 = inlined_call_operand.vmem [shape: f32[700,1], index: 3, kind: input, shape index: {}]   ;;  %s9972_s4 = inlined_call_operand.vmem [shape: bf16[200,700], index: 4, kind: input, shape index: {}]   ;;  %s9973_s5 = inlined_call_operand.vmem [shape: bf16[200,80], index: 5, kind: input, shape index: {}]   ;;  %s9974_s6 = inlined_call_operand.vmem [shape: f32[200,1], index: 6, kind: input, shape index: {}]   ;;  %s9975_s7 = inlined_call_operand.vmem [shape: bf16[20,200], index: 7, kind: input, shape index: {}]   ;;  %s9976_s8 = inlined_call_operand.vmem [shape: bf16[20,160], index: 8, kind: input, shape index: {}]   ;;  %s9977_s9 = inlined_call_operand.vmem [shape: f32[20,1], index: 9, kind: input, shape index: {}]   ;;  %s9978_s10 = inlined_call_operand.vmem [shape: f32[3,20,64], index: 10, kind: input, shape index: {}]   ;;  %s9979_s11 = inlined_call_operand.vmem [shape: f32[3,1], index: 11, kind: input, shape index: {}]   ;;  %s9980_s12 = inlined_call_operand.vmem [shape: f32[2,3,1], index: 12, kind: output, shape index: {}]  }
   0x1 LB: > { %s5934_s22 = sadd.s32 4294967295, %s7312_s21   ;;  %p5938_p0 = scmp.ge.s32.totalorder %s7312_s21, 1  ;;  %s7312_s21 = sphi %s7383_s21, %s22_s21  }
   0x2   : > { %p362_p1 = scmp.lt.s32.totalorder %s7312_s21, 3 }
   0x4   : > { %p363_p2 = pnand %p5938_p0, %p362_p1 }
   0x6   : > { %366 = sbr.rel (%p363_p2) target bundleno = 1888 (0x760), region = 68 }
   0xd   : > { %p403_p3 = scmp.lt.s32.totalorder %s5934_s22, 1  ;;  %v9981_v0 = vmov 0   ;;  %v6848_v1 = vld [vmem:[%s9969_s1 + $0x4] ss:$16 sps:$4 sm:$0xff]   ;;  %s7315_s29 = smov 127   ;;  %vm966_vm0 = vcmask 97280  }
   0xe   : > { %2641 = vmatprep.subr.bf16.mxu1 %v9981_v0  ;;  %6829 = vset.pattern.permute.xlu1 %v9981_v0  ;;  %v6867_v8 = vld [vmem:[%s9970_s2] sm:$0xff]   ;;  %vm1099_vm1 = vcmask 1045504   ;;  %v6870_v33 = vld [vmem:[%s9970_s2 + $0x8] sm:$0xff]   ;;  %v6872_v36 = vld [vmem:[%s9970_s2 + $0x10] sm:$0xff]   ;;  %vm2637_vm2 = vcmask 1044480   ;;  %vm2504_vm3 = vcmask 867328  }
   0xf   : > { %s10116_s22 = smov (!%p403_p3, %s5934_s22), 1  ;;  %6828 = vset.pattern.permute.xlu0 %v9981_v0  ;;  %2673 = vmatprep.mubr.bf16.mxu1 %v6848_v1  ;;  %v6846_v19 = vld [vmem:[%s9969_s1] ss:$16 sps:$4 sm:$0xff]   ;;  %v6849_v20 = vld [vmem:[%s9969_s1 + $0x24] ss:$16 sps:$4 sm:$0xff]   ;;  %v6875_v41 = vld [vmem:[%s9970_s2 + $0x18] sm:$0xff]  }
  0x10   : > { %s6815_s25 = smul.u32 248, %s10116_s22  ;;  %6664 = vmatprep.mubr.msk.bf16.mxu0 %vm966_vm0, %v6867_v8  ;;  %v6851_v21 = vld [vmem:[%s9969_s1 + $0x20] ss:$16 sps:$4 sm:$0xff]   ;;  %v6852_v22 = vld [vmem:[%s9969_s1 + $0x44] ss:$16 sps:$4 sm:$0xff]   ;;  %v6880_v47 = vld [vmem:[%s9970_s2 + $0x28] sm:$0xff]  }
  0x11   : > { %v6854_v23 = vld [vmem:[%s9969_s1 + $0x40] ss:$16 sps:$4 sm:$0xff]   ;;  %v6855_v24 = vld [vmem:[%s9969_s1 + $0x64] ss:$16 sps:$4 sm:$0xff]   ;;  %v6885_v53 = vld [vmem:[%s9970_s2 + $0x38] sm:$0xff]   ;;  %vm7317_vm4 = vmmov 0  }
  0x12   : > { %s7403_s28 = scalar_lea.vmem %s9968_s0, %s6815_s25  ;;  %v6857_v25 = vld [vmem:[%s9969_s1 + $0x60] ss:$16 sps:$4 sm:$0xff]   ;;  %v6858_v26 = vld [vmem:[%s9969_s1 + $0x84] ss:$16 sps:$4 sm:$0xff]   ;;  %v6890_v59 = vld [vmem:[%s9970_s2 + $0x48] sm:$0xff]   ;;  %vm4342_vm5 = vcmask 654336  }
  0x13   : > { %v6830_v2 = vld [vmem:[%s7403_s28] sm:$0xff]   ;;  %v6831_v3 = vld [vmem:[%s7403_s28 + $0x8] sm:$0xff]   ;;  %v6832_v4 = vld [vmem:[%s7403_s28 + $0x10] sm:$0xff]   ;;  %vm4886_vm6 = vcmask 490496   ;;  %vm5611_vm7 = vcmask 261120   ;;  %vm5681_vm8 = vcmask 588800  }
  0x14   : > { %964 = vrot.lane.b32.xlu0 %v6830_v2, %s7315_s29  ;;  %2642 = vmatpush1.bf16.msra.mxu1 %v6830_v2  ;;  %v6833_v5 = vld [vmem:[%s7403_s28 + $0x18] sm:$0xff]   ;;  %v6834_v6 = vld [vmem:[%s7403_s28 + $0x20] sm:$0xff]   ;;  %v6835_v7 = vld [vmem:[%s7403_s28 + $0x28] sm:$0xff]   ;;  %vm5688_vm9 = vcmask 1043456   ;;  %vm5782_vm10 = vcmask 523264   ;;  %vm5789_vm11 = vcmask 519168  }
  0x15   : > { %2643 = vmatprep.subr.bf16.mxu1 %v9981_v0  ;;  %v6836_v9 = vld [vmem:[%s7403_s28 + $0x30] sm:$0xff]   ;;  %v6837_v10 = vld [vmem:[%s7403_s28 + $0x38] sm:$0xff]   ;;  %v6838_v11 = vld [vmem:[%s7403_s28 + $0x40] sm:$0xff]   ;;  %vm5831_vm12 = vcmask 130112   ;;  %vm5838_vm13 = vcmask 195712   ;;  %vm5868_vm14 = vcmask 1041409  }
  0x16   : > { %v6839_v12 = vld [vmem:[%s7403_s28 + $0x48] sm:$0xff]   ;;  %v6840_v13 = vld [vmem:[%s7403_s28 + $0x50] sm:$0xff]   ;;  %v6841_v14 = vld [vmem:[%s7403_s28 + $0x58] sm:$0xff]   ;;  %vm5870_vm15 = vcmask 1042434   ;;  %s5940_s23 = sshll.u32 %s10116_s22, 2 }
  0x17   : > { %v6842_v15 = vld [vmem:[%s7403_s28 + $0x60] sm:$0xff]   ;;  %v6843_v16 = vld [vmem:[%s7403_s28 + $0x68] sm:$0xff]   ;;  %v6844_v17 = vld [vmem:[%s7403_s28 + $0x70] sm:$0xff]   ;;  %s411_s27 = scalar_lea.vmem %s9980_s12, %s5940_s23 }
  0x18   : > { %2644 = vmatpush1.bf16.msra.mxu1 %v6831_v3  ;;  %v6845_v18 = vld [vmem:[%s7403_s28 + $0x78] sm:$0xff]   ;;  %v6860_v27 = vld [vmem:[%s9969_s1 + $0x80] ss:$16 sps:$4 sm:$0xff]   ;;  %v6861_v28 = vld [vmem:[%s9969_s1 + $0xa4] ss:$16 sps:$4 sm:$0xff]  }
  0x19   : > { %2645 = vmatprep.subr.bf16.mxu1 %v9981_v0  ;;  %v6863_v29 = vld [vmem:[%s9969_s1 + $0xa0] ss:$16 sps:$4 sm:$0xff]   ;;  %v6864_v30 = vld [vmem:[%s9969_s1 + $0xc4] ss:$16 sps:$4 sm:$0xff]   ;;  %v6948_v40 = vld [vmem:[%s7403_s28 + $0x88] sm:$0xff]  }
  0x1a   : > { %v6866_v31 = vld [vmem:[%s9969_s1 + $0xc0] ss:$16 sps:$4 sm:$0xff]   ;;  %v6868_v32 = vld [vmem:[%s9969_s1 + $0xe4] ss:$16 sps:$4 sm:$0xff]   ;;  %v6955_v46 = vld [vmem:[%s7403_s28 + $0x98] sm:$0xff]  }
  0x1b   : > { %v6871_v34 = vld [vmem:[%s9969_s1 + $0xe0] ss:$16 sps:$4 sm:$0xff]   ;;  %v6873_v37 = vld [vmem:[%s9969_s1 + $0x104] ss:$16 sps:$4 sm:$0xff]   ;;  %v6962_v52 = vld [vmem:[%s7403_s28 + $0xa8] sm:$0xff]  }
  0x1c   : > { %2646 = vmatpush1.bf16.msra.mxu1 %v6832_v4  ;;  %v6942_v39 = vld [vmem:[%s7403_s28 + $0x80] sm:$0xff]   ;;  %v6949_v45 = vld [vmem:[%s7403_s28 + $0x90] sm:$0xff]   ;;  %v6969_v58 = vld [vmem:[%s7403_s28 + $0xb8] sm:$0xff]  }
  0x1d   : > { %2647 = vmatprep.subr.bf16.mxu1 %v9981_v0  ;;  %v6876_v42 = vld [vmem:[%s9969_s1 + $0x100] ss:$16 sps:$4 sm:$0xff]   ;;  %v6878_v44 = vld [vmem:[%s9969_s1 + $0x124] ss:$16 sps:$4 sm:$0xff]   ;;  %v6976_v1 = vld [vmem:[%s7403_s28 + $0xc8] sm:$0xff]  }
  0x1e   : > { %v6877_v43 = vld [vmem:[%s9970_s2 + $0x20] sm:$0xff]   ;;  %v6882_v49 = vld [vmem:[%s9970_s2 + $0x30] sm:$0xff]   ;;  %v6895_v2 = vld [vmem:[%s9970_s2 + $0x58] sm:$0xff]  }
  0x1f   : > { %v6881_v48 = vld [vmem:[%s9969_s1 + $0x120] ss:$16 sps:$4 sm:$0xff]   ;;  %v6883_v50 = vld [vmem:[%s9969_s1 + $0x144] ss:$16 sps:$4 sm:$0xff]  }
  0x20   : > { %2648 = vmatpush1.bf16.msra.mxu1 %v6833_v5  ;;  %v6956_v51 = vld [vmem:[%s7403_s28 + $0xa0] sm:$0xff]   ;;  %v6963_v57 = vld [vmem:[%s7403_s28 + $0xb0] sm:$0xff]  }
  0x21   : > { %2649 = vmatprep.subr.bf16.mxu1 %v9981_v0  ;;  %v6886_v54 = vld [vmem:[%s9969_s1 + $0x140] ss:$16 sps:$4 sm:$0xff]   ;;  %v6888_v56 = vld [vmem:[%s9969_s1 + $0x164] ss:$16 sps:$4 sm:$0xff]  }
  0x22   : > { %v6887_v55 = vld [vmem:[%s9970_s2 + $0x40] sm:$0xff]   ;;  %v6892_v61 = vld [vmem:[%s9970_s2 + $0x50] sm:$0xff]  }
  0x23   : > { %v6891_v60 = vld [vmem:[%s9969_s1 + $0x160] ss:$16 sps:$4 sm:$0xff]   ;;  %v6893_v62 = vld [vmem:[%s9969_s1 + $0x184] ss:$16 sps:$4 sm:$0xff]  }
  0x24   : > { %2650 = vmatpush1.bf16.msra.mxu1 %v6834_v6  ;;  %v6970_v63 = vld [vmem:[%s7403_s28 + $0xc0] sm:$0xff]   ;;  %v6977_v6 = vld [vmem:[%s7403_s28 + $0xd0] sm:$0xff]  }
  0x25   : > { %2651 = vmatprep.subr.bf16.mxu1 %v9981_v0  ;;  %v6896_v3 = vld [vmem:[%s9969_s1 + $0x180] ss:$16 sps:$4 sm:$0xff]   ;;  %v6898_v5 = vld [vmem:[%s9969_s1 + $0x1a4] ss:$16 sps:$4 sm:$0xff]  }
  0x26   : > { %v6897_v4 = vld [vmem:[%s9970_s2 + $0x60] sm:$0xff]  }
  0x27   : > { %v6901_v8 = vld [vmem:[%s9969_s1 + $0x1a0] ss:$16 sps:$4 sm:$0xff]  }
  0x28   : > { %2652 = vmatpush1.bf16.msra.mxu1 %v6835_v7  ;;  %v6900_v7 = vld [vmem:[%s9970_s2 + $0x68] sm:$0xff]  }
  0x29   : > { %2653 = vmatprep.subr.bf16.mxu1 %v9981_v0 }
  0x2c   : > { %2654 = vmatpush1.bf16.msra.mxu1 %v6836_v9  ;;  %v6983_v9 = vld [vmem:[%s7403_s28 + $0xd8] sm:$0xff]  }
  0x2d   : > { %2655 = vmatprep.subr.bf16.mxu1 %v9981_v0 }
  0x30   : > { %2656 = vmatpush1.bf16.msra.mxu1 %v6837_v10  ;;  %v6902_v10 = vld [vmem:[%s9970_s2 + $0x70] sm:$0xff]  }
  0x31   : > { %2657 = vmatprep.subr.bf16.mxu1 %v9981_v0 }
  0x34   : > { %2658 = vmatpush1.bf16.msra.mxu1 %v6838_v11  ;;  %v6903_v11 = vld [vmem:[%s9969_s1 + $0x1c4] ss:$16 sps:$4 sm:$0xff]  }
  0x35   : > { %2659 = vmatprep.subr.bf16.mxu1 %v9981_v0 }
  0x38   : > { %2660 = vmatpush1.bf16.msra.mxu1 %v6839_v12  ;;  %v6984_v12 = vld [vmem:[%s7403_s28 + $0xe0] sm:$0xff]  }
  0x39   : > { %2661 = vmatprep.subr.bf16.mxu1 %v9981_v0 }
  0x3c   : > { %2662 = vmatpush1.bf16.msra.mxu1 %v6840_v13  ;;  %v6990_v13 = vld [vmem:[%s7403_s28 + $0xe8] sm:$0xff]  }
  0x3d   : > { %2663 = vmatprep.subr.bf16.mxu1 %v9981_v0 }
  0x40   : > { %2664 = vmatpush1.bf16.msra.mxu1 %v6841_v14  ;;  %v6991_v14 = vld [vmem:[%s7403_s28 + $0xf0] sm:$0x1f]  }
  0x41   : > { %2665 = vmatprep.subr.bf16.mxu1 %v9981_v0 }
  0x44   : > { %2666 = vmatpush1.bf16.msra.mxu1 %v6842_v15  ;;  %v6905_v15 = vld [vmem:[%s9970_s2 + $0x78] sm:$0xff]  }
  0x45   : > { %2667 = vmatprep.subr.bf16.mxu1 %v9981_v0 }
  0x48   : > { %2668 = vmatpush1.bf16.msra.mxu1 %v6843_v16  ;;  %v6906_v16 = vld [vmem:[%s9969_s1 + $0x1c0] ss:$16 sps:$4 sm:$0xff]  }
  0x49   : > { %2669 = vmatprep.subr.bf16.mxu1 %v9981_v0 }
  0x4c   : > { %2670 = vmatpush1.bf16.msra.mxu1 %v6844_v17  ;;  %v6907_v17 = vld [vmem:[%s9970_s2 + $0x80] sm:$0xff]  }
  0x4d   : > { %2671 = vmatprep.subr.bf16.mxu1 %v9981_v0 }
  0x50   : > { %2672 = vmatpush1.bf16.msra.mxu1 %v6845_v18  ;;  %v6908_v18 = vld [vmem:[%s9969_s1 + $0x1e4] ss:$16 sps:$4 sm:$0xff]  }
  0x53   : > { %2674 = vmatmul.mubr.bf16.vlgmr.msra.gmra.mrb[0].mxu1 %v6846_v19  ;;  %v2639_v19 = vsel %vm2637_vm2, %v6991_v14, 0  ;;  %v6979_v14 = vld [vmem:[%s9969_s1 + $0x364] ss:$16 sps:$4 sm:$0xff]  }
  0x54   : > { %2681 = vmatprep.mubr.bf16.mxu1 %v6849_v20  ;;  %v6910_v20 = vld [vmem:[%s9970_s2 + $0x88] sm:$0xff]  }
  0x5b   : > { %2682 = vmatmul.mubr.bf16.gmra.mrb[4].mxu1 %v6851_v21  ;;  %v6911_v21 = vld [vmem:[%s9969_s1 + $0x1e0] ss:$16 sps:$4 sm:$0xff]  }
  0x5c   : > { %2689 = vmatprep.mubr.bf16.mxu1 %v6852_v22  ;;  %v6912_v22 = vld [vmem:[%s9970_s2 + $0x90] sm:$0xff]  }
  0x63   : > { %2690 = vmatmul.mubr.bf16.gmra.mrb[8].mxu1 %v6854_v23  ;;  %v6913_v23 = vld [vmem:[%s9969_s1 + $0x204] ss:$16 sps:$4 sm:$0xff]  }
  0x64   : > { %2697 = vmatprep.mubr.bf16.mxu1 %v6855_v24  ;;  %v6915_v24 = vld [vmem:[%s9970_s2 + $0x98] sm:$0xff]  }
  0x6b   : > { %2698 = vmatmul.mubr.bf16.gmra.mrb[12].mxu1 %v6857_v25  ;;  %v6916_v25 = vld [vmem:[%s9969_s1 + $0x200] ss:$16 sps:$4 sm:$0xff]  }
  0x6c   : > { %2705 = vmatprep.mubr.bf16.mxu1 %v6858_v26  ;;  %v6917_v26 = vld [vmem:[%s9970_s2 + $0xa0] sm:$0xff]  }
  0x73   : > { %2706 = vmatmul.mubr.bf16.gmra.mrb[16].mxu1 %v6860_v27  ;;  %v6918_v27 = vld [vmem:[%s9969_s1 + $0x224] ss:$16 sps:$4 sm:$0xff]  }
  0x74   : > { %2713 = vmatprep.mubr.bf16.mxu1 %v6861_v28  ;;  %v6920_v28 = vld [vmem:[%s9970_s2 + $0xa8] sm:$0xff]  }
  0x7b   : > { %2714 = vmatmul.mubr.bf16.gmra.mrb[20].mxu1 %v6863_v29  ;;  %v6921_v29 = vld [vmem:[%s9969_s1 + $0x220] ss:$16 sps:$4 sm:$0xff]  }
  0x7c   : > { %2721 = vmatprep.mubr.bf16.mxu1 %v6864_v30  ;;  %v6922_v30 = vld [vmem:[%s9970_s2 + $0xb0] sm:$0xff]  }
  0x83   : > { %2722 = vmatmul.mubr.bf16.gmra.mrb[24].mxu1 %v6866_v31  ;;  %v6923_v31 = vld [vmem:[%s9969_s1 + $0x244] ss:$16 sps:$4 sm:$0xff]  }
  0x84   : > { %2729 = vmatprep.mubr.bf16.mxu1 %v6868_v32  ;;  %v6925_v32 = vld [vmem:[%s9970_s2 + $0xb8] sm:$0xff]  }
  0x86   : > { %v965_v35 = vpop.permute.xlu0 %964 }
  0x87   : > { %6814 = vmatprep.subr.msk.bf16.mxu0 %vm1099_vm1, %v965_v35  ;;  %v1101_v38 = vsel %vm1099_vm1, %v965_v35, 0  ;;  %v6928_v35 = vld [vmem:[%s9969_s1 + $0x264] ss:$16 sps:$4 sm:$0xff]  }
  0x88   : > { %6663 = vmatpush3.bf16.msra.mxu0 %v1101_v38  ;;  %v6932_v38 = vld [vmem:[%s9970_s2 + $0xd0] sm:$0xff]  }
  0x89   : > { %3026 = vmatprep.subr.bf16.mxu0 %v9981_v0 }
  0x8b   : > { %6665 = vmatmul.mubr.msk.bf16.vlgmr.msra.gmra.mrb[0].mxu0 %vm966_vm0, %v6870_v33  ;;  %2730 = vmatmul.mubr.bf16.gmra.mrb[28].mxu1 %v6871_v34  ;;  %v6926_v33 = vld [vmem:[%s9969_s1 + $0x240] ss:$16 sps:$4 sm:$0xff]  }
  0x8c   : > { %6668 = vmatprep.mubr.msk.bf16.mxu0 %vm966_vm0, %v6872_v36  ;;  %2737 = vmatprep.mubr.bf16.mxu1 %v6873_v37  ;;  %v6927_v34 = vld [vmem:[%s9970_s2 + $0xc0] sm:$0xff]   ;;  %v6930_v36 = vld [vmem:[%s9970_s2 + $0xc8] sm:$0xff]  }
  0x8d   : > { %3027 = vmatpush1.bf16.msra.mxu0 %v6942_v39  ;;  %v6931_v37 = vld [vmem:[%s9969_s1 + $0x260] ss:$16 sps:$4 sm:$0xff]   ;;  %v6933_v39 = vld [vmem:[%s9969_s1 + $0x284] ss:$16 sps:$4 sm:$0xff]  }
  0x8e   : > { %3028 = vmatprep.subr.bf16.mxu0 %v9981_v0 }
  0x91   : > { %3029 = vmatpush1.bf16.msra.mxu0 %v6948_v40  ;;  %v6935_v40 = vld [vmem:[%s9970_s2 + $0xd8] sm:$0xff]  }
  0x92   : > { %3030 = vmatprep.subr.bf16.mxu0 %v9981_v0 }
  0x93   : > { %6669 = vmatmul.mubr.msk.bf16.gmra.mrb[4].mxu0 %vm966_vm0, %v6875_v41  ;;  %2738 = vmatmul.mubr.bf16.gmra.mrb[32].mxu1 %v6876_v42  ;;  %v6936_v41 = vld [vmem:[%s9969_s1 + $0x280] ss:$16 sps:$4 sm:$0xff]  }
  0x94   : > { %6672 = vmatprep.mubr.msk.bf16.mxu0 %vm966_vm0, %v6877_v43  ;;  %2745 = vmatprep.mubr.bf16.mxu1 %v6878_v44  ;;  %v6937_v42 = vld [vmem:[%s9970_s2 + $0xe0] sm:$0xff]   ;;  %v6940_v44 = vld [vmem:[%s9970_s2 + $0xe8] sm:$0xff]  }
  0x95   : > { %3031 = vmatpush1.bf16.msra.mxu0 %v6949_v45  ;;  %v6938_v43 = vld [vmem:[%s9969_s1 + $0x2a4] ss:$16 sps:$4 sm:$0xff]   ;;  %v6941_v45 = vld [vmem:[%s9969_s1 + $0x2a0] ss:$16 sps:$4 sm:$0xff]  }
  0x96   : > { %3032 = vmatprep.subr.bf16.mxu0 %v9981_v0 }
  0x99   : > { %3033 = vmatpush1.bf16.msra.mxu0 %v6955_v46  ;;  %v6943_v46 = vld [vmem:[%s9970_s2 + $0xf0] sm:$0xff]  }
  0x9a   : > { %3034 = vmatprep.subr.bf16.mxu0 %v9981_v0 }
  0x9b   : > { %6673 = vmatmul.mubr.msk.bf16.gmra.mrb[8].mxu0 %vm966_vm0, %v6880_v47  ;;  %2746 = vmatmul.mubr.bf16.gmra.mrb[36].mxu1 %v6881_v48  ;;  %v6944_v47 = vld [vmem:[%s9969_s1 + $0x2c4] ss:$16 sps:$4 sm:$0xff]   ;;  %v3412_v48 = vld [vmem:[%s9971_s3 + $0x8] sm:$0xff] }
  0x9c   : > { %6676 = vmatprep.mubr.msk.bf16.mxu0 %vm966_vm0, %v6882_v49  ;;  %2753 = vmatprep.mubr.bf16.mxu1 %v6883_v50  ;;  %v6946_v49 = vld [vmem:[%s9970_s2 + $0xf8] sm:$0xff]   ;;  %v6947_v50 = vld [vmem:[%s9969_s1 + $0x2c0] ss:$16 sps:$4 sm:$0xff]  }
  0x9d   : > { %3035 = vmatpush1.bf16.msra.mxu0 %v6956_v51  ;;  %3506 = vperm.xlu1 %6829, %v3412_v48   ;;  %v6950_v51 = vld [vmem:[%s9970_s2 + $0x100] sm:$0xff]  }
  0x9e   : > { %3036 = vmatprep.subr.bf16.mxu0 %v9981_v0  ;;  %v7008_v48 = vld [vmem:[%s9969_s1 + $0x3e0] ss:$16 sps:$4 sm:$0xff]  }
  0xa1   : > { %3037 = vmatpush1.bf16.msra.mxu0 %v6962_v52  ;;  %v6951_v52 = vld [vmem:[%s9969_s1 + $0x2e4] ss:$16 sps:$4 sm:$0xff]  }
  0xa2   : > { %3038 = vmatprep.subr.bf16.mxu0 %v9981_v0 }
  0xa3   : > { %6677 = vmatmul.mubr.msk.bf16.gmra.mrb[12].mxu0 %vm966_vm0, %v6885_v53  ;;  %2754 = vmatmul.mubr.bf16.gmra.mrb[40].mxu1 %v6886_v54  ;;  %v3413_v53 = vld [vmem:[%s9971_s3 + $0x10] sm:$0xff]  ;;  %v3414_v54 = vld [vmem:[%s9971_s3 + $0x18] sm:$0xff] }
  0xa4   : > { %6680 = vmatprep.mubr.msk.bf16.mxu0 %vm966_vm0, %v6887_v55  ;;  %2761 = vmatprep.mubr.bf16.mxu1 %v6888_v56  ;;  %v3411_v55 = vld [vmem:[%s9971_s3] sm:$0xff]  ;;  %v6953_v56 = vld [vmem:[%s9970_s2 + $0x108] sm:$0xff]  }
  0xa5   : > { %3039 = vmatpush1.bf16.msra.mxu0 %v6963_v57  ;;  %3511 = vperm.xlu1 %6829, %v3413_v53   ;;  %v6954_v57 = vld [vmem:[%s9969_s1 + $0x2e0] ss:$16 sps:$4 sm:$0xff]  }
  0xa6   : > { %3040 = vmatprep.subr.bf16.mxu0 %v9981_v0  ;;  %3501 = vperm.xlu0 %6828, %v3411_v55  }
  0xa9   : > { %3041 = vmatpush1.bf16.msra.mxu0 %v6969_v58  ;;  %v6957_v58 = vld [vmem:[%s9970_s2 + $0x110] sm:$0xff]   ;;  %3516 = vperm.xlu1 %6829, %v3414_v54  }
  0xaa   : > { %3042 = vmatprep.subr.bf16.mxu0 %v9981_v0 }
  0xab   : > { %6681 = vmatmul.mubr.msk.bf16.gmra.mrb[16].mxu0 %vm966_vm0, %v6890_v59  ;;  %2762 = vmatmul.mubr.bf16.gmra.mrb[44].mxu1 %v6891_v60  ;;  %v6958_v59 = vld [vmem:[%s9969_s1 + $0x304] ss:$16 sps:$4 sm:$0xff]   ;;  %v3416_v60 = vld [vmem:[%s9971_s3 + $0x28] sm:$0xff] }
  0xac   : > { %6684 = vmatprep.mubr.msk.bf16.mxu0 %vm966_vm0, %v6892_v61  ;;  %2769 = vmatprep.mubr.bf16.mxu1 %v6893_v62  ;;  %v3415_v61 = vld [vmem:[%s9971_s3 + $0x20] sm:$0xff]  ;;  %v3418_v62 = vld [vmem:[%s9971_s3 + $0x38] sm:$0xff] }
  0xad   : > { %3043 = vmatpush1.bf16.msra.mxu0 %v6970_v63  ;;  %3526 = vperm.xlu1 %6829, %v3416_v60   ;;  %v3417_v63 = vld [vmem:[%s9971_s3 + $0x30] sm:$0xff]  ;;  %v7018_v60 = vld [vmem:[%s9969_s1 + $0x8c] ss:$16 sps:$4 sm:$0xff]  }
  0xae   : > { %3044 = vmatprep.subr.bf16.mxu0 %v9981_v0  ;;  %3521 = vperm.xlu0 %6828, %v3415_v61  }
  0xb1   : > { %3045 = vmatpush1.bf16.msra.mxu0 %v6976_v1  ;;  %v6960_v1 = vld [vmem:[%s9970_s2 + $0x118] sm:$0xff]   ;;  %3536 = vperm.xlu1 %6829, %v3418_v62  }
  0xb2   : > { %3046 = vmatprep.subr.bf16.mxu0 %v9981_v0  ;;  %3531 = vperm.xlu0 %6828, %v3417_v63  }
  0xb3   : > { %6685 = vmatmul.mubr.msk.bf16.gmra.mrb[20].mxu0 %vm966_vm0, %v6895_v2  ;;  %2770 = vmatmul.mubr.bf16.gmra.mrb[48].mxu1 %v6896_v3  ;;  %v6961_v2 = vld [vmem:[%s9969_s1 + $0x300] ss:$16 sps:$4 sm:$0xff]  }
  0xb4   : > { %6688 = vmatprep.mubr.msk.bf16.mxu0 %vm966_vm0, %v6897_v4  ;;  %2777 = vmatprep.mubr.bf16.mxu1 %v6898_v5  ;;  %v6964_v3 = vld [vmem:[%s9970_s2 + $0x120] sm:$0xff]   ;;  %v3420_v5 = vld [vmem:[%s9971_s3 + $0x48] sm:$0xff] }
  0xb5   : > { %3047 = vmatpush1.bf16.msra.mxu0 %v6977_v6  ;;  %v6965_v4 = vld [vmem:[%s9969_s1 + $0x324] ss:$16 sps:$4 sm:$0xff]   ;;  %3546 = vperm.xlu1 %6829, %v3420_v5   ;;  %v7024_v5 = vld [vmem:[%s9969_s1 + $0xac] ss:$16 sps:$4 sm:$0xff]  }
  0xb6   : > { %3048 = vmatprep.subr.bf16.mxu0 %v9981_v0  ;;  %v3419_v6 = vld [vmem:[%s9971_s3 + $0x40] sm:$0xff] }
  0xb7   : > { %3541 = vperm.xlu0 %6828, %v3419_v6  }
  0xb9   : > { %3049 = vmatpush1.bf16.msra.mxu0 %v6983_v9  ;;  %v6971_v9 = vld [vmem:[%s9970_s2 + $0x130] sm:$0xff]  }
  0xba   : > { %3050 = vmatprep.subr.bf16.mxu0 %v9981_v0 }
  0xbb   : > { %6689 = vmatmul.mubr.msk.bf16.gmra.mrb[24].mxu0 %vm966_vm0, %v6900_v7  ;;  %2778 = vmatmul.mubr.bf16.gmra.mrb[52].mxu1 %v6901_v8  ;;  %v6967_v7 = vld [vmem:[%s9970_s2 + $0x128] sm:$0xff]   ;;  %v6968_v8 = vld [vmem:[%s9969_s1 + $0x320] ss:$16 sps:$4 sm:$0xff]  }
  0xbc   : > { %6692 = vmatprep.mubr.msk.bf16.mxu0 %vm966_vm0, %v6902_v10  ;;  %2785 = vmatprep.mubr.bf16.mxu1 %v6903_v11  ;;  %v6972_v10 = vld [vmem:[%s9969_s1 + $0x344] ss:$16 sps:$4 sm:$0xff]   ;;  %v6974_v11 = vld [vmem:[%s9970_s2 + $0x138] sm:$0xff]  }
  0xbd   : > { %3051 = vmatpush1.bf16.msra.mxu0 %v6984_v12  ;;  %v6975_v12 = vld [vmem:[%s9969_s1 + $0x340] ss:$16 sps:$4 sm:$0xff]  }
  0xbe   : > { %3052 = vmatprep.subr.bf16.mxu0 %v9981_v0 }
  0xc1   : > { %3053 = vmatpush1.bf16.msra.mxu0 %v6990_v13  ;;  %v6978_v13 = vld [vmem:[%s9970_s2 + $0x140] sm:$0xff]  }
  0xc2   : > { %3054 = vmatprep.subr.bf16.mxu0 %v9981_v0 }
  0xc3   : > { %6693 = vmatmul.mubr.msk.bf16.gmra.mrb[28].mxu0 %vm966_vm0, %v6905_v15  ;;  %2786 = vmatmul.mubr.bf16.gmra.mrb[56].mxu1 %v6906_v16  ;;  %v6981_v16 = vld [vmem:[%s9970_s2 + $0x148] sm:$0xff]  }
  0xc4   : > { %6696 = vmatprep.mubr.msk.bf16.mxu0 %vm966_vm0, %v6907_v17  ;;  %2793 = vmatprep.mubr.bf16.mxu1 %v6908_v18  ;;  %v6982_v17 = vld [vmem:[%s9969_s1 + $0x360] ss:$16 sps:$4 sm:$0xff]  }
  0xc5   : > { %3055 = vmatpush1.bf16.msra.mxu0 %v2639_v19  ;;  %v6985_v19 = vld [vmem:[%s9970_s2 + $0x150] sm:$0xff]  }
  0xcb   : > { %6697 = vmatmul.mubr.msk.bf16.gmra.mrb[32].mxu0 %vm966_vm0, %v6910_v20  ;;  %2794 = vmatmul.mubr.bf16.gmra.mrb[60].mxu1 %v6911_v21  ;;  %v6986_v20 = vld [vmem:[%s9969_s1 + $0x384] ss:$16 sps:$4 sm:$0xff]  }
  0xcc   : > { %6700 = vmatprep.mubr.msk.bf16.mxu0 %vm966_vm0, %v6912_v22  ;;  %2801 = vmatprep.mubr.bf16.mxu1 %v6913_v23 }
  0xd3   : > { %6701 = vmatmul.mubr.msk.bf16.gmra.mrb[36].mxu0 %vm966_vm0, %v6915_v24  ;;  %2802 = vmatmul.mubr.bf16.gmra.mrb[64].mxu1 %v6916_v25  ;;  %v6988_v24 = vld [vmem:[%s9970_s2 + $0x158] sm:$0x3f]   ;;  %v6989_v25 = vld [vmem:[%s9969_s1 + $0x380] ss:$16 sps:$4 sm:$0xff]  }
  0xd4   : > { %6704 = vmatprep.mubr.msk.bf16.mxu0 %vm966_vm0, %v6917_v26  ;;  %2809 = vmatprep.mubr.bf16.mxu1 %v6918_v27  ;;  %v6992_v27 = vld [vmem:[%s9969_s1 + $0x3a4] ss:$16 sps:$4 sm:$0xff]  }
  0xdb   : > { %6705 = vmatmul.mubr.msk.bf16.gmra.mrb[40].mxu0 %vm966_vm0, %v6920_v28  ;;  %2810 = vmatmul.mubr.bf16.gmra.mrb[68].mxu1 %v6921_v29  ;;  %v6996_v28 = vld [vmem:[%s9969_s1 + $0xc] ss:$16 sps:$4 sm:$0xff]  }
  0xdc   : > { %6708 = vmatprep.mubr.msk.bf16.mxu0 %vm966_vm0, %v6922_v30  ;;  %2817 = vmatprep.mubr.bf16.mxu1 %v6923_v31 }
  0xe3   : > { %6709 = vmatmul.mubr.msk.bf16.gmra.mrb[44].mxu0 %vm966_vm0, %v6925_v32  ;;  %2818 = vmatmul.mubr.bf16.gmra.mrb[72].mxu1 %v6926_v33  ;;  %v6994_v32 = vld [vmem:[%s9969_s1 + $0x8] ss:$16 sps:$4 sm:$0xff]   ;;  %v6997_v33 = vld [vmem:[%s9969_s1 + $0x3a0] ss:$16 sps:$4 sm:$0xff]  }
  0xe4   : > { %6712 = vmatprep.mubr.msk.bf16.mxu0 %vm966_vm0, %v6927_v34  ;;  %2825 = vmatprep.mubr.bf16.mxu1 %v6928_v35  ;;  %v6998_v35 = vld [vmem:[%s9969_s1 + $0x3c4] ss:$16 sps:$4 sm:$0xff]  }
  0xeb   : > { %6713 = vmatmul.mubr.msk.bf16.gmra.mrb[48].mxu0 %vm966_vm0, %v6930_v36  ;;  %2826 = vmatmul.mubr.bf16.gmra.mrb[76].mxu1 %v6931_v37  ;;  %v7000_v36 = vld [vmem:[%s9969_s1 + $0x2c] ss:$16 sps:$4 sm:$0xff]  }
  0xec   : > { %6716 = vmatprep.mubr.msk.bf16.mxu0 %vm966_vm0, %v6932_v38  ;;  %2833 = vmatprep.mubr.bf16.mxu1 %v6933_v39 }
  0xf3   : > { %6717 = vmatmul.mubr.msk.bf16.gmra.mrb[52].mxu0 %vm966_vm0, %v6935_v40  ;;  %2834 = vmatmul.mubr.bf16.gmra.mrb[80].mxu1 %v6936_v41  ;;  %v7002_v40 = vld [vmem:[%s9969_s1 + $0x3c0] ss:$16 sps:$4 sm:$0xff]   ;;  %v7003_v41 = vld [vmem:[%s9969_s1 + $0x28] ss:$16 sps:$4 sm:$0xff]  }
  0xf4   : > { %6720 = vmatprep.mubr.msk.bf16.mxu0 %vm966_vm0, %v6937_v42  ;;  %2841 = vmatprep.mubr.bf16.mxu1 %v6938_v43  ;;  %v7004_v43 = vld [vmem:[%s9969_s1 + $0x3e4] ss:$16 sps:$4 sm:$0xff]  }
  0xfb   : > { %6721 = vmatmul.mubr.msk.bf16.gmra.mrb[56].mxu0 %vm966_vm0, %v6940_v44  ;;  %2842 = vmatmul.mubr.bf16.gmra.mrb[84].mxu1 %v6941_v45  ;;  %v7006_v44 = vld [vmem:[%s9969_s1 + $0x4c] ss:$16 sps:$4 sm:$0xff]  }
  0xfc   : > { %6724 = vmatprep.mubr.msk.bf16.mxu0 %vm966_vm0, %v6943_v46  ;;  %2849 = vmatprep.mubr.bf16.mxu1 %v6944_v47 }
 0x103   : > { %6725 = vmatmul.mubr.msk.bf16.gmra.mrb[60].mxu0 %vm966_vm0, %v6946_v49  ;;  %2850 = vmatmul.mubr.bf16.gmra.mrb[88].mxu1 %v6947_v50  ;;  %v7009_v49 = vld [vmem:[%s9969_s1 + $0x48] ss:$16 sps:$4 sm:$0xff]  }
 0x104   : > { %6728 = vmatprep.mubr.msk.bf16.mxu0 %vm966_vm0, %v6950_v51  ;;  %2857 = vmatprep.mubr.bf16.mxu1 %v6951_v52  ;;  %v7010_v51 = vld [vmem:[%s9969_s1 + $0x404] ss:$16 sps:$4 sm:$0xff]   ;;  %v7012_v52 = vld [vmem:[%s9969_s1 + $0x6c] ss:$16 sps:$4 sm:$0xff]  }
 0x10b   : > { %6729 = vmatmul.mubr.msk.bf16.gmra.mrb[64].mxu0 %vm966_vm0, %v6953_v56  ;;  %2858 = vmatmul.mubr.bf16.gmra.mrb[92].mxu1 %v6954_v57  ;;  %v7014_v56 = vld [vmem:[%s9969_s1 + $0x400] ss:$16 sps:$4 sm:$0xff]   ;;  %v7015_v57 = vld [vmem:[%s9969_s1 + $0x68] ss:$16 sps:$4 sm:$0xff]  }
 0x10c   : > { %6732 = vmatprep.mubr.msk.bf16.mxu0 %vm966_vm0, %v6957_v58  ;;  %2865 = vmatprep.mubr.bf16.mxu1 %v6958_v59  ;;  %v7016_v59 = vld [vmem:[%s9969_s1 + $0x424] ss:$16 sps:$4 sm:$0xff]  }
 0x113   : > { %6733 = vmatmul.mubr.msk.bf16.gmra.mrb[68].mxu0 %vm966_vm0, %v6960_v1  ;;  %2866 = vmatmul.mubr.bf16.gmra.mrb[96].mxu1 %v6961_v2  ;;  %v7020_v1 = vld [vmem:[%s9969_s1 + $0x420] ss:$16 sps:$4 sm:$0xff]   ;;  %v7021_v2 = vld [vmem:[%s9969_s1 + $0x88] ss:$16 sps:$4 sm:$0xff]  }
 0x114   : > { %6736 = vmatprep.mubr.msk.bf16.mxu0 %vm966_vm0, %v6964_v3  ;;  %2873 = vmatprep.mubr.bf16.mxu1 %v6965_v4  ;;  %v7022_v4 = vld [vmem:[%s9969_s1 + $0x444] ss:$16 sps:$4 sm:$0xff]  }
 0x11b   : > { %6737 = vmatmul.mubr.msk.bf16.gmra.mrb[72].mxu0 %vm966_vm0, %v6967_v7  ;;  %2874 = vmatmul.mubr.bf16.gmra.mrb[100].mxu1 %v6968_v8 }
 0x11c   : > { %6740 = vmatprep.mubr.msk.bf16.mxu0 %vm966_vm0, %v6971_v9  ;;  %2881 = vmatprep.mubr.bf16.mxu1 %v6972_v10 }
 0x123   : > { %6741 = vmatmul.mubr.msk.bf16.gmra.mrb[76].mxu0 %vm966_vm0, %v6974_v11  ;;  %2882 = vmatmul.mubr.bf16.gmra.mrb[104].mxu1 %v6975_v12  ;;  %v7026_v11 = vld [vmem:[%s9969_s1 + $0x440] ss:$16 sps:$4 sm:$0xff]   ;;  %v7027_v12 = vld [vmem:[%s9969_s1 + $0xa8] ss:$16 sps:$4 sm:$0xff]  }
 0x124   : > { %6744 = vmatprep.mubr.msk.bf16.mxu0 %vm966_vm0, %v6978_v13  ;;  %2889 = vmatprep.mubr.bf16.mxu1 %v6979_v14 }
 0x126   : > { %v7825_v15 = vpop.f32.mrb[0].mxu1 }
 0x127   : > { %v2677_v18 = vpop.f32.mrb[1].mxu1 }
 0x128   : > { %v7839_v21 = vpop.f32.mrb[2].mxu1  ;;  %v7030_v18 = vld [vmem:[%s9969_s1 + $0xcc] ss:$16 sps:$4 sm:$0xff]  }
 0x129   : > { %v2680_v22 = vpop.f32.mrb[3].mxu1 }
 0x12b   : > { %6745 = vmatmul.mubr.msk.bf16.gmra.mrb[80].mxu0 %vm966_vm0, %v6981_v16  ;;  %2890 = vmatmul.mubr.bf16.gmra.mrb[108].mxu1 %v6982_v17  ;;  %v7028_v17 = vld [vmem:[%s9969_s1 + $0x464] ss:$16 sps:$4 sm:$0xff]  }
 0x12c   : > { %6748 = vmatprep.mubr.msk.bf16.mxu0 %vm966_vm0, %v6985_v19  ;;  %2897 = vmatprep.mubr.bf16.mxu1 %v6986_v20 }
 0x12e   : > { %v7843_v23 = vpop.f32.mrb[4].mxu1 }
 0x12f   : > { %v2685_v26 = vpop.f32.mrb[5].mxu1 }
 0x130   : > { %v7857_v29 = vpop.f32.mrb[6].mxu1 }
 0x131   : > { %v2688_v30 = vpop.f32.mrb[7].mxu1 }
 0x133   : > { %6749 = vmatmul.mubr.msk.bf16.gmra.mrb[84].mxu0 %vm966_vm0, %v6988_v24  ;;  %2898 = vmatmul.mubr.bf16.gmra.mrb[112].mxu1 %v6989_v25  ;;  %vm5873_vm0 = vcmask 157696  }
 0x134   : > { %2905 = vmatprep.mubr.bf16.mxu1 %v6992_v27  ;;  %6236 = vmatprep.mubr.msk.bf16.mxu0 %vm2504_vm3, %v6996_v28 }
 0x136   : > { %v7861_v31 = vpop.f32.mrb[8].mxu1 }
 0x137   : > { %v2693_v34 = vpop.f32.mrb[9].mxu1 }
 0x138   : > { %v7875_v37 = vpop.f32.mrb[10].mxu1  ;;  %v7036_v34 = vld [vmem:[%s9969_s1 + $0xec] ss:$16 sps:$4 sm:$0xff]  }
 0x139   : > { %v2696_v38 = vpop.f32.mrb[11].mxu1 }
 0x13b   : > { %2906 = vmatmul.mubr.bf16.gmra.mrb[116].mxu1 %v6997_v33  ;;  %3059 = vmatmul.mubr.bf16.vlgmr.msra.gmra.mrb[88].mxu0 %v6994_v32  ;;  %v7034_v33 = vld [vmem:[%s9969_s1 + $0x484] ss:$16 sps:$4 sm:$0xff]  }
 0x13c   : > { %2913 = vmatprep.mubr.bf16.mxu1 %v6998_v35  ;;  %6237 = vmatprep.mubr.msk.bf16.mxu0 %vm2504_vm3, %v7000_v36 }
 0x13e   : > { %v7878_v39 = vpop.f32.mrb[12].mxu1 }
 0x13f   : > { %v2701_v42 = vpop.f32.mrb[13].mxu1 }
 0x140   : > { %v7892_v45 = vpop.f32.mrb[14].mxu1 }
 0x141   : > { %v2704_v46 = vpop.f32.mrb[15].mxu1 }
 0x143   : > { %2914 = vmatmul.mubr.bf16.gmra.mrb[120].mxu1 %v7002_v40  ;;  %3067 = vmatmul.mubr.bf16.gmra.mrb[92].mxu0 %v7003_v41 }
 0x144   : > { %2921 = vmatprep.mubr.bf16.mxu1 %v7004_v43  ;;  %6238 = vmatprep.mubr.msk.bf16.mxu0 %vm2504_vm3, %v7006_v44 }
 0x146   : > { %v7895_v47 = vpop.f32.mrb[16].mxu1 }
 0x147   : > { %v2709_v50 = vpop.f32.mrb[17].mxu1 }
 0x148   : > { %v7909_v53 = vpop.f32.mrb[18].mxu1  ;;  %v7042_v50 = vld [vmem:[%s9969_s1 + $0x10c] ss:$16 sps:$4 sm:$0xff]  }
 0x149   : > { %v2712_v54 = vpop.f32.mrb[19].mxu1 }
 0x14b   : > { %2922 = vmatmul.mubr.bf16.gmra.mrb[124].mxu1 %v7008_v48  ;;  %3075 = vmatmul.mubr.bf16.gmra.mrb[96].mxu0 %v7009_v49  ;;  %v7040_v49 = vld [vmem:[%s9969_s1 + $0x4a4] ss:$16 sps:$4 sm:$0xff]  }
 0x14c   : > { %2929 = vmatprep.mubr.bf16.mxu1 %v7010_v51  ;;  %6239 = vmatprep.mubr.msk.bf16.mxu0 %vm2504_vm3, %v7012_v52 }
 0x14e   : > { %v7912_v55 = vpop.f32.mrb[20].mxu1 }
 0x14f   : > { %v2717_v58 = vpop.f32.mrb[21].mxu1 }
 0x150   : > { %v7926_v61 = vpop.f32.mrb[22].mxu1 }
 0x151   : > { %v2720_v62 = vpop.f32.mrb[23].mxu1 }
 0x153   : > { %2930 = vmatmul.mubr.bf16.gmra.mrb[128].mxu1 %v7014_v56  ;;  %3083 = vmatmul.mubr.bf16.gmra.mrb[100].mxu0 %v7015_v57 }
 0x154   : > { %2937 = vmatprep.mubr.bf16.mxu1 %v7016_v59  ;;  %6240 = vmatprep.mubr.msk.bf16.mxu0 %vm2504_vm3, %v7018_v60 }
 0x156   : > { %v7929_v63 = vpop.f32.mrb[24].mxu1 }
 0x157   : > { %v2725_v3 = vpop.f32.mrb[25].mxu1 }
 0x158   : > { %v7943_v6 = vpop.f32.mrb[26].mxu1  ;;  %v7048_v3 = vld [vmem:[%s9969_s1 + $0x12c] ss:$16 sps:$4 sm:$0xff]  }
 0x159   : > { %v2728_v7 = vpop.f32.mrb[27].mxu1 }
 0x15b   : > { %2938 = vmatmul.mubr.bf16.gmra.mrb[132].mxu1 %v7020_v1  ;;  %3091 = vmatmul.mubr.bf16.gmra.mrb[104].mxu0 %v7021_v2  ;;  %v7046_v2 = vld [vmem:[%s9969_s1 + $0x4c4] ss:$16 sps:$4 sm:$0xff]  }
 0x15c   : > { %2945 = vmatprep.mubr.bf16.mxu1 %v7022_v4  ;;  %6241 = vmatprep.mubr.msk.bf16.mxu0 %vm2504_vm3, %v7024_v5 }
 0x15e   : > { %v6666_v8 = vpop.f32.mrb[0].mxu0  ;;  %v7946_v9 = vpop.f32.mrb[28].mxu1 }
 0x15f   : > { %v1137_v10 = vpop.f32.mrb[1].mxu0  ;;  %v2733_v13 = vpop.f32.mrb[29].mxu1  ;;  %v7955_v14 = vadd.f32 %v6666_v8, %v7843_v23 }
 0x160   : > { %v6667_v16 = vpop.f32.mrb[2].mxu0  ;;  %v7963_v19 = vpop.f32.mrb[30].mxu1  ;;  %v7966_v20 = vadd.f32 %v7825_v15, %v1137_v10  ;;  %v7032_v15 = vld [vmem:[%s9969_s1 + $0x460] ss:$16 sps:$4 sm:$0xff]  }
 0x161   : > { %v1140_v22 = vpop.f32.mrb[3].mxu0  ;;  %v2736_v24 = vpop.f32.mrb[31].mxu1  ;;  %v7969_v25 = vadd.f32 %v6667_v16, %v7857_v29  ;;  %v7033_v29 = vld [vmem:[%s9969_s1 + $0xc8] ss:$16 sps:$4 sm:$0xff]  }
 0x162   : > { %v7972_v23 = vadd.f32 %v7839_v21, %v1140_v22  ;;  %v7051_v16 = vld [vmem:[%s9969_s1 + $0x128] ss:$16 sps:$4 sm:$0xff]   ;;  %v7052_v22 = vld [vmem:[%s9969_s1 + $0x4e4] ss:$16 sps:$4 sm:$0xff]   ;;  %v7054_v24 = vld [vmem:[%s9969_s1 + $0x14c] ss:$16 sps:$4 sm:$0xff]  }
 0x163   : > { %2946 = vmatmul.mubr.bf16.gmra.mrb[136].mxu1 %v7026_v11  ;;  %3099 = vmatmul.mubr.bf16.gmra.mrb[108].mxu0 %v7027_v12 }
 0x164   : > { %2953 = vmatprep.mubr.bf16.mxu1 %v7028_v17  ;;  %6242 = vmatprep.mubr.msk.bf16.mxu0 %vm2504_vm3, %v7030_v18 }
 0x166   : > { %v6670_v26 = vpop.f32.mrb[4].mxu0  ;;  %v7975_v27 = vpop.f32.mrb[32].mxu1 }
 0x167   : > { %v1153_v28 = vpop.f32.mrb[5].mxu0  ;;  %v2741_v30 = vpop.f32.mrb[33].mxu1  ;;  %v7984_v21 = vadd.f32 %v6670_v26, %v7878_v39 }
 0x168   : > { %v6671_v32 = vpop.f32.mrb[6].mxu0  ;;  %v7992_v35 = vpop.f32.mrb[34].mxu1  ;;  %v7995_v36 = vadd.f32 %v7861_v31, %v1153_v28  ;;  %v7038_v31 = vld [vmem:[%s9969_s1 + $0x480] ss:$16 sps:$4 sm:$0xff]  }
 0x169   : > { %v1156_v38 = vpop.f32.mrb[7].mxu0  ;;  %v2744_v40 = vpop.f32.mrb[35].mxu1  ;;  %v7998_v41 = vadd.f32 %v6671_v32, %v7892_v45  ;;  %v7039_v45 = vld [vmem:[%s9969_s1 + $0xe8] ss:$16 sps:$4 sm:$0xff]  }
 0x16a   : > { %v8001_v39 = vadd.f32 %v7875_v37, %v1156_v38  ;;  %v7057_v40 = vld [vmem:[%s9969_s1 + $0x148] ss:$16 sps:$4 sm:$0xff]  }
 0x16b   : > { %2954 = vmatmul.mubr.bf16.gmra.mrb[140].mxu1 %v7032_v15  ;;  %3107 = vmatmul.mubr.bf16.gmra.mrb[112].mxu0 %v7033_v29 }
 0x16c   : > { %2961 = vmatprep.mubr.bf16.mxu1 %v7034_v33  ;;  %6243 = vmatprep.mubr.msk.bf16.mxu0 %vm2504_vm3, %v7036_v34 }
 0x16e   : > { %v6674_v42 = vpop.f32.mrb[8].mxu0  ;;  %v2747_v43 = vpop.f32.mrb[36].mxu1 }
 0x16f   : > { %v1169_v44 = vpop.f32.mrb[9].mxu0  ;;  %v2749_v46 = vpop.f32.mrb[37].mxu1  ;;  %v8011_v37 = vadd.f32 %v6674_v42, %v7912_v55 }
 0x170   : > { %v6675_v48 = vpop.f32.mrb[10].mxu0  ;;  %v2750_v51 = vpop.f32.mrb[38].mxu1  ;;  %v8020_v52 = vadd.f32 %v7895_v47, %v1169_v44  ;;  %v7044_v47 = vld [vmem:[%s9969_s1 + $0x4a0] ss:$16 sps:$4 sm:$0xff]   ;;  %v7058_v44 = vld [vmem:[%s9969_s1 + $0x504] ss:$16 sps:$4 sm:$0xff]  }
 0x171   : > { %v1172_v54 = vpop.f32.mrb[11].mxu0  ;;  %v2752_v56 = vpop.f32.mrb[39].mxu1  ;;  %v8023_v57 = vadd.f32 %v6675_v48, %v7926_v61  ;;  %v7045_v61 = vld [vmem:[%s9969_s1 + $0x108] ss:$16 sps:$4 sm:$0xff]  }
 0x172   : > { %v8026_v55 = vadd.f32 %v7909_v53, %v1172_v54 }
 0x173   : > { %2962 = vmatmul.mubr.bf16.gmra.mrb[144].mxu1 %v7038_v31  ;;  %3115 = vmatmul.mubr.bf16.gmra.mrb[116].mxu0 %v7039_v45  ;;  %v7060_v31 = vld [vmem:[%s9969_s1 + $0x16c] ss:$16 sps:$4 sm:$0xff]  }
 0x174   : > { %2969 = vmatprep.mubr.bf16.mxu1 %v7040_v49  ;;  %6244 = vmatprep.mubr.msk.bf16.mxu0 %vm2504_vm3, %v7042_v50 }
 0x176   : > { %v6678_v58 = vpop.f32.mrb[12].mxu0  ;;  %v2755_v59 = vpop.f32.mrb[40].mxu1 }
 0x177   : > { %v1185_v60 = vpop.f32.mrb[13].mxu0  ;;  %v2757_v62 = vpop.f32.mrb[41].mxu1  ;;  %v8036_v53 = vadd.f32 %v6678_v58, %v7946_v9 }
 0x178   : > { %v6679_v1 = vpop.f32.mrb[14].mxu0  ;;  %v2758_v4 = vpop.f32.mrb[42].mxu1  ;;  %v8045_v5 = vadd.f32 %v7929_v63, %v1185_v60  ;;  %v7050_v63 = vld [vmem:[%s9969_s1 + $0x4c0] ss:$16 sps:$4 sm:$0xff]   ;;  %v7063_v60 = vld [vmem:[%s9969_s1 + $0x168] ss:$16 sps:$4 sm:$0xff]  }
 0x179   : > { %v1188_v7 = vpop.f32.mrb[15].mxu0  ;;  %v2760_v8 = vpop.f32.mrb[43].mxu1  ;;  %v8048_v10 = vadd.f32 %v6679_v1, %v7963_v19  ;;  %v7064_v1 = vld [vmem:[%s9969_s1 + $0x524] ss:$16 sps:$4 sm:$0xff]  }
 0x17a   : > { %v8051_v9 = vadd.f32 %v7943_v6, %v1188_v7 }
 0x17b   : > { %2970 = vmatmul.mubr.bf16.gmra.mrb[148].mxu1 %v7044_v47  ;;  %3123 = vmatmul.mubr.bf16.gmra.mrb[120].mxu0 %v7045_v61 }
 0x17c   : > { %2977 = vmatprep.mubr.bf16.mxu1 %v7046_v2  ;;  %6245 = vmatprep.mubr.msk.bf16.mxu0 %vm2504_vm3, %v7048_v3  ;;  %v7066_v2 = vld [vmem:[%s9969_s1 + $0x18c] ss:$16 sps:$4 sm:$0xff]  }
 0x17e   : > { %v6682_v11 = vpop.f32.mrb[16].mxu0  ;;  %v2763_v12 = vpop.f32.mrb[44].mxu1 }
 0x17f   : > { %v1201_v13 = vpop.f32.mrb[17].mxu0  ;;  %v2765_v17 = vpop.f32.mrb[45].mxu1  ;;  %v8060_v18 = vadd.f32 %v6682_v11, %v2747_v43 }
 0x180   : > { %v6683_v6 = vpop.f32.mrb[18].mxu0  ;;  %v2766_v19 = vpop.f32.mrb[46].mxu1  ;;  %v8069_v26 = vadd.f32 %v7975_v27, %v1201_v13  ;;  %v7056_v27 = vld [vmem:[%s9969_s1 + $0x4e0] ss:$16 sps:$4 sm:$0xff]  }
 0x181   : > { %v1204_v28 = vpop.f32.mrb[19].mxu0  ;;  %v2768_v15 = vpop.f32.mrb[47].mxu1  ;;  %v8071_v29 = vadd.f32 %v6683_v6, %v2750_v51  ;;  %v7068_v17 = vld [vmem:[%s9969_s1 + $0x520] ss:$16 sps:$4 sm:$0xff]   ;;  %v7069_v6 = vld [vmem:[%s9969_s1 + $0x188] ss:$16 sps:$4 sm:$0xff]  }
 0x182   : > { %v8074_v30 = vadd.f32 %v7992_v35, %v1204_v28  ;;  %v7072_v28 = vld [vmem:[%s9969_s1 + $0x1ac] ss:$16 sps:$4 sm:$0xff]  }
 0x183   : > { %2978 = vmatmul.mubr.bf16.gmra.mrb[152].mxu1 %v7050_v63  ;;  %3131 = vmatmul.mubr.bf16.gmra.mrb[124].mxu0 %v7051_v16 }
 0x184   : > { %2985 = vmatprep.mubr.bf16.mxu1 %v7052_v22  ;;  %6246 = vmatprep.mubr.msk.bf16.mxu0 %vm2504_vm3, %v7054_v24  ;;  %v7070_v24 = vld [vmem:[%s9969_s1 + $0x544] ss:$16 sps:$4 sm:$0xff]  }
 0x186   : > { %v6686_v32 = vpop.f32.mrb[20].mxu0  ;;  %v2771_v33 = vpop.f32.mrb[48].mxu1 }
 0x187   : > { %v1217_v34 = vpop.f32.mrb[21].mxu0  ;;  %v2773_v38 = vpop.f32.mrb[49].mxu1  ;;  %v8083_v42 = vadd.f32 %v6686_v32, %v2763_v12 }
 0x188   : > { %v6687_v35 = vpop.f32.mrb[22].mxu0  ;;  %v2774_v43 = vpop.f32.mrb[50].mxu1  ;;  %v8091_v45 = vadd.f32 %v2755_v59, %v1217_v34  ;;  %v7062_v59 = vld [vmem:[%s9969_s1 + $0x500] ss:$16 sps:$4 sm:$0xff]  }
 0x189   : > { %v1220_v46 = vpop.f32.mrb[23].mxu0  ;;  %v2776_v48 = vpop.f32.mrb[51].mxu1  ;;  %v8093_v49 = vadd.f32 %v6687_v35, %v2766_v19  ;;  %v7075_v35 = vld [vmem:[%s9969_s1 + $0x1a8] ss:$16 sps:$4 sm:$0xff]  }
 0x18a   : > { %v8095_v50 = vadd.f32 %v2758_v4, %v1220_v46 }
 0x18b   : > { %9985 = vst [vmem:[#allocation2_spill] sm:$0xff] %v8093_v49  ;;  %2986 = vmatmul.mubr.bf16.gmra.mrb[156].mxu1 %v7056_v27  ;;  %3139 = vmatmul.mubr.bf16.gmra.mrb[128].mxu0 %v7057_v40  ;;  %v7074_v40 = vld [vmem:[%s9969_s1 + $0x540] ss:$16 sps:$4 sm:$0xff]  }
 0x18c   : > { %2993 = vmatprep.mubr.bf16.mxu1 %v7058_v44  ;;  %6247 = vmatprep.mubr.msk.bf16.mxu0 %vm2504_vm3, %v7060_v31  ;;  %v7076_v31 = vld [vmem:[%s9969_s1 + $0x564] ss:$16 sps:$4 sm:$0x3f]  }
 0x18e   : > { %v6690_v51 = vpop.f32.mrb[24].mxu0  ;;  %v2779_v54 = vpop.f32.mrb[52].mxu1 }
 0x18f   : > { %v1233_v56 = vpop.f32.mrb[25].mxu0  ;;  %v2781_v58 = vpop.f32.mrb[53].mxu1  ;;  %v8104_v47 = vadd.f32 %v6690_v51, %v2779_v54  ;;  %v7078_v54 = vld [vmem:[%s9969_s1 + $0x1cc] ss:$16 sps:$4 sm:$0xff]  }
 0x190   : > { %v6691_v61 = vpop.f32.mrb[26].mxu0  ;;  %v2782_v62 = vpop.f32.mrb[54].mxu1  ;;  %v8112_v3 = vadd.f32 %v2771_v33, %v1233_v56 }
 0x191   : > { %9986 = vst [vmem:[#allocation3_spill] sm:$0xff] %v8104_v47  ;;  %v1236_v4 = vpop.f32.mrb[27].mxu0  ;;  %v2784_v7 = vpop.f32.mrb[55].mxu1  ;;  %v8114_v8 = vadd.f32 %v6691_v61, %v2782_v62  ;;  %v7080_v62 = vld [vmem:[%s9969_s1 + $0x560] ss:$16 sps:$4 sm:$0x3f]  }
 0x192   : > { %9987 = vst [vmem:[#allocation4_spill] sm:$0xff] %v8112_v3  ;;  %v8116_v11 = vadd.f32 %v2774_v43, %v1236_v4  ;;  %v7081_v4 = vld [vmem:[%s9969_s1 + $0x1c8] ss:$16 sps:$4 sm:$0xff]  }
 0x193   : > { %9988 = vst [vmem:[#allocation5_spill] sm:$0xff] %v8114_v8  ;;  %2994 = vmatmul.mubr.bf16.gmra.mrb[160].mxu1 %v7062_v59  ;;  %3147 = vmatmul.mubr.bf16.gmra.mrb[132].mxu0 %v7063_v60 }
 0x194   : > { %9989 = vst [vmem:[#allocation6_spill] sm:$0xff] %v8116_v11  ;;  %3001 = vmatprep.mubr.bf16.mxu1 %v7064_v1  ;;  %6248 = vmatprep.mubr.msk.bf16.mxu0 %vm2504_vm3, %v7066_v2 }
 0x196   : > { %v6694_v12 = vpop.f32.mrb[28].mxu0  ;;  %v2787_v13 = vpop.f32.mrb[56].mxu1 }
 0x197   : > { %v1249_v63 = vpop.f32.mrb[29].mxu0  ;;  %v2789_v16 = vpop.f32.mrb[57].mxu1 }
 0x198   : > { %v6695_v19 = vpop.f32.mrb[30].mxu0  ;;  %v2790_v22 = vpop.f32.mrb[58].mxu1  ;;  %v8131_v15 = vadd.f32 %v2787_v13, %v1249_v63  ;;  %v7082_v63 = vld [vmem:[%s9969_s1 + $0x1ec] ss:$16 sps:$4 sm:$0xff]  }
 0x199   : > { %v1252_v32 = vpop.f32.mrb[31].mxu0  ;;  %v2792_v33 = vpop.f32.mrb[59].mxu1 }
 0x19a   : > { %9990 = vst [vmem:[#allocation7_spill] sm:$0xff] %v8131_v15  ;;  %v8133_v34 = vadd.f32 %v2790_v22, %v1252_v32  ;;  %v7084_v32 = vld [vmem:[%s9969_s1 + $0x1e8] ss:$16 sps:$4 sm:$0xff]  }
 0x19b   : > { %3002 = vmatmul.mubr.bf16.gmra.mrb[164].mxu1 %v7068_v17  ;;  %3155 = vmatmul.mubr.bf16.gmra.mrb[136].mxu0 %v7069_v6 }
 0x19c   : > { %9991 = vst [vmem:[#allocation8_spill] sm:$0xff] %v8133_v34  ;;  %3009 = vmatprep.mubr.bf16.mxu1 %v7070_v24  ;;  %6249 = vmatprep.mubr.msk.bf16.mxu0 %vm2504_vm3, %v7072_v28 }
 0x19e   : > { %v6698_v38 = vpop.f32.mrb[32].mxu0  ;;  %v2795_v27 = vpop.f32.mrb[60].mxu1 }
 0x19f   : > { %v1265_v43 = vpop.f32.mrb[33].mxu0  ;;  %v2797_v44 = vpop.f32.mrb[61].mxu1  ;;  %v8145_v46 = vadd.f32 %v6694_v12, %v2795_v27 }
 0x1a0   : > { %v6699_v48 = vpop.f32.mrb[34].mxu0  ;;  %v2798_v51 = vpop.f32.mrb[62].mxu1 }
 0x1a1   : > { %9992 = vst [vmem:[#allocation9_spill] sm:$0xff] %v8145_v46  ;;  %v1268_v56 = vpop.f32.mrb[35].mxu0  ;;  %v2800_v58 = vpop.f32.mrb[63].mxu1  ;;  %v8150_v59 = vadd.f32 %v6695_v19, %v2798_v51 }
 0x1a3   : > { %9993 = vst [vmem:[#allocation10_spill] sm:$0xff] %v8150_v59  ;;  %3010 = vmatmul.mubr.bf16.gmra.mrb[168].mxu1 %v7074_v40  ;;  %3163 = vmatmul.mubr.bf16.gmra.mrb[140].mxu0 %v7075_v35  ;;  %v7085_v35 = vld [vmem:[%s9969_s1 + $0x20c] ss:$16 sps:$4 sm:$0xff]  }
 0x1a4   : > { %3017 = vmatprep.mubr.bf16.mxu1 %v7076_v31  ;;  %6250 = vmatprep.mubr.msk.bf16.mxu0 %vm2504_vm3, %v7078_v54 }
 0x1a6   : > { %v6702_v60 = vpop.f32.mrb[36].mxu0  ;;  %v2803_v61 = vpop.f32.mrb[64].mxu1 }
 0x1a7   : > { %v1281_v1 = vpop.f32.mrb[37].mxu0  ;;  %v2805_v2 = vpop.f32.mrb[65].mxu1  ;;  %v8159_v7 = vadd.f32 %v2803_v61, %v1265_v43 }
 0x1a8   : > { %v6703_v12 = vpop.f32.mrb[38].mxu0  ;;  %v2806_v13 = vpop.f32.mrb[66].mxu1 }
 0x1a9   : > { %9994 = vst [vmem:[#allocation11_spill] sm:$0xff] %v8159_v7  ;;  %v1284_v16 = vpop.f32.mrb[39].mxu0  ;;  %v2808_v17 = vpop.f32.mrb[67].mxu1  ;;  %v8164_v6 = vadd.f32 %v2806_v13, %v1268_v56 }
 0x1ab   : > { %9995 = vst [vmem:[#allocation12_spill] sm:$0xff] %v8164_v6  ;;  %3018 = vmatmul.mubr.bf16.gmra.mrb[172].mxu1 %v7080_v62  ;;  %3171 = vmatmul.mubr.bf16.gmra.mrb[144].mxu0 %v7081_v4 }
 0x1ac   : > { %6251 = vmatprep.mubr.msk.bf16.mxu0 %vm2504_vm3, %v7082_v63 }
 0x1ae   : > { %v6706_v19 = vpop.f32.mrb[40].mxu0  ;;  %v2811_v22 = vpop.f32.mrb[68].mxu1 }
 0x1af   : > { %v1297_v24 = vpop.f32.mrb[41].mxu0  ;;  %v2813_v28 = vpop.f32.mrb[69].mxu1  ;;  %v8170_v33 = vadd.f32 %v6698_v38, %v2811_v22  ;;  %v7087_v38 = vld [vmem:[%s9969_s1 + $0x208] ss:$16 sps:$4 sm:$0xff]  }
 0x1b0   : > { %v6707_v27 = vpop.f32.mrb[42].mxu0  ;;  %v2814_v40 = vpop.f32.mrb[70].mxu1 }
 0x1b1   : > { %9996 = vst [vmem:[#allocation13_spill] sm:$0xff] %v8170_v33  ;;  %v1300_v43 = vpop.f32.mrb[43].mxu0  ;;  %v2816_v44 = vpop.f32.mrb[71].mxu1  ;;  %v8175_v31 = vadd.f32 %v6699_v48, %v2814_v40  ;;  %v7088_v48 = vld [vmem:[%s9969_s1 + $0x22c] ss:$16 sps:$4 sm:$0xff]  }
 0x1b2   : > { %v7090_v40 = vld [vmem:[%s9969_s1 + $0x228] ss:$16 sps:$4 sm:$0xff]  }
 0x1b3   : > { %9997 = vst [vmem:[#allocation14_spill] sm:$0xff] %v8175_v31  ;;  %3179 = vmatmul.mubr.bf16.gmra.mrb[148].mxu0 %v7084_v32 }
 0x1b4   : > { %6252 = vmatprep.mubr.msk.bf16.mxu0 %vm2504_vm3, %v7085_v35 }
 0x1b6   : > { %v8178_v51 = vpop.f32.mrb[44].mxu0  ;;  %v2819_v54 = vpop.f32.mrb[72].mxu1 }
 0x1b7   : > { %v1313_v56 = vpop.f32.mrb[45].mxu0  ;;  %v2821_v58 = vpop.f32.mrb[73].mxu1  ;;  %v8183_v61 = vadd.f32 %v2819_v54, %v1281_v1 }
 0x1b8   : > { %v8185_v62 = vpop.f32.mrb[46].mxu0  ;;  %v2822_v2 = vpop.f32.mrb[74].mxu1 }
 0x1b9   : > { %9998 = vst [vmem:[#allocation15_spill] sm:$0xff] %v8183_v61  ;;  %v1316_v4 = vpop.f32.mrb[47].mxu0  ;;  %v2824_v13 = vpop.f32.mrb[75].mxu1  ;;  %v8190_v63 = vadd.f32 %v2822_v2, %v1284_v16  ;;  %v7091_v16 = vld [vmem:[%s9969_s1 + $0x24c] ss:$16 sps:$4 sm:$0xff]  }
 0x1ba   : > { %v7099_v61 = vld [vmem:[%s9969_s1 + $0x288] ss:$16 sps:$4 sm:$0xff]  }
 0x1bb   : > { %9999 = vst [vmem:[#allocation16_spill] sm:$0xff] %v8190_v63  ;;  %3187 = vmatmul.mubr.bf16.gmra.mrb[152].mxu0 %v7087_v38 }
 0x1bc   : > { %6253 = vmatprep.mubr.msk.bf16.mxu0 %vm2504_vm3, %v7088_v48 }
 0x1be   : > { %v8193_v17 = vpop.f32.mrb[48].mxu0  ;;  %v2827_v22 = vpop.f32.mrb[76].mxu1 }
 0x1bf   : > { %v8195_v28 = vadd.f32 %v6702_v60, %v2827_v22  ;;  %v8197_v1 = vpop.f32.mrb[49].mxu0  ;;  %v2829_v32 = vpop.f32.mrb[77].mxu1 }
 0x1c0   : > { %v8202_v35 = vpop.f32.mrb[50].mxu0  ;;  %v2830_v44 = vpop.f32.mrb[78].mxu1  ;;  %v7093_v32 = vld [vmem:[%s9969_s1 + $0x248] ss:$16 sps:$4 sm:$0xff]  }
 0x1c1   : > { %10000 = vst [vmem:[#allocation17_spill] sm:$0xff] %v8195_v28  ;;  %v8207_v54 = vadd.f32 %v6703_v12, %v2830_v44  ;;  %v8209_v58 = vpop.f32.mrb[51].mxu0  ;;  %v2832_v60 = vpop.f32.mrb[79].mxu1  ;;  %v7096_v28 = vld [vmem:[%s9969_s1 + $0x268] ss:$16 sps:$4 sm:$0xff]  }
 0x1c3   : > { %10001 = vst [vmem:[#allocation18_spill] sm:$0xff] %v8207_v54  ;;  %3195 = vmatmul.mubr.bf16.gmra.mrb[156].mxu0 %v7090_v40  ;;  %v7094_v40 = vld [vmem:[%s9969_s1 + $0x26c] ss:$16 sps:$4 sm:$0xff]  }
 0x1c4   : > { %6254 = vmatprep.mubr.msk.bf16.mxu0 %vm2504_vm3, %v7091_v16 }
 0x1c6   : > { %v8212_v38 = vpop.f32.mrb[52].mxu0  ;;  %v2835_v2 = vpop.f32.mrb[80].mxu1 }
 0x1c7   : > { %v8214_v48 = vadd.f32 %v2835_v2, %v1297_v24  ;;  %v8216_v13 = vpop.f32.mrb[53].mxu0  ;;  %v2837_v22 = vpop.f32.mrb[81].mxu1 }
 0x1c8   : > { %v8221_v12 = vpop.f32.mrb[54].mxu0  ;;  %v2838_v44 = vpop.f32.mrb[82].mxu1 }
 0x1c9   : > { %10002 = vst [vmem:[#allocation19_spill] sm:$0xff] %v8214_v48  ;;  %v8226_v16 = vadd.f32 %v2838_v44, %v1300_v43  ;;  %v8228_v60 = vpop.f32.mrb[55].mxu0  ;;  %v2840_v24 = vpop.f32.mrb[83].mxu1 }
 0x1cb   : > { %10003 = vst [vmem:[#allocation20_spill] sm:$0xff] %v8226_v16  ;;  %3203 = vmatmul.mubr.bf16.gmra.mrb[160].mxu0 %v7093_v32  ;;  %v7097_v32 = vld [vmem:[%s9969_s1 + $0x28c] ss:$16 sps:$4 sm:$0xff]  }
 0x1cc   : > { %6255 = vmatprep.mubr.msk.bf16.mxu0 %vm2504_vm3, %v7094_v40 }
 0x1ce   : > { %v8231_v2 = vpop.f32.mrb[56].mxu0  ;;  %v2843_v22 = vpop.f32.mrb[84].mxu1 }
 0x1cf   : > { %v8233_v0 = vadd.f32 %v6706_v19, %v2843_v22  ;;  %v8235_v48 = vpop.f32.mrb[57].mxu0  ;;  %v2845_v54 = vpop.f32.mrb[85].mxu1 }
 0x1d0   : > { %v8240_v43 = vpop.f32.mrb[58].mxu0  ;;  %v2846_v44 = vpop.f32.mrb[86].mxu1 }
 0x1d1   : > { %10004 = vst [vmem:[#allocation21_spill] sm:$0xff] %v8233_v0  ;;  %v8245_v40 = vadd.f32 %v6707_v27, %v2846_v44  ;;  %v8247_v24 = vpop.f32.mrb[59].mxu0  ;;  %v2848_v19 = vpop.f32.mrb[87].mxu1 }
 0x1d3   : > { %10005 = vst [vmem:[#allocation22_spill] sm:$0xff] %v8245_v40  ;;  %3211 = vmatmul.mubr.bf16.gmra.mrb[164].mxu0 %v7096_v28  ;;  %v7100_v28 = vld [vmem:[%s9969_s1 + $0x2ac] ss:$16 sps:$4 sm:$0xff]  }
 0x1d4   : > { %6256 = vmatprep.mubr.msk.bf16.mxu0 %vm2504_vm3, %v7097_v32 }
 0x1d6   : > { %v8250_v54 = vpop.f32.mrb[60].mxu0  ;;  %v2851_v22 = vpop.f32.mrb[88].mxu1 }
 0x1d7   : > { %v8252_v0 = vadd.f32 %v2851_v22, %v1313_v56  ;;  %v8254_v16 = vpop.f32.mrb[61].mxu0  ;;  %v2853_v63 = vpop.f32.mrb[89].mxu1 }
 0x1d8   : > { %v8259_v27 = vpop.f32.mrb[62].mxu0  ;;  %v2854_v44 = vpop.f32.mrb[90].mxu1 }
 0x1d9   : > { %10006 = vst [vmem:[#allocation23_spill] sm:$0xff] %v8252_v0  ;;  %v8264_v32 = vadd.f32 %v2854_v44, %v1316_v4  ;;  %v8266_v19 = vpop.f32.mrb[63].mxu0  ;;  %v2856_v56 = vpop.f32.mrb[91].mxu1  ;;  %v7102_v4 = vld [vmem:[%s9969_s1 + $0x2a8] ss:$16 sps:$4 sm:$0xff]  }
 0x1db   : > { %10007 = vst [vmem:[#allocation24_spill] sm:$0xff] %v8264_v32  ;;  %3219 = vmatmul.mubr.bf16.gmra.mrb[168].mxu0 %v7099_v61  ;;  %v7103_v61 = vld [vmem:[%s9969_s1 + $0x2cc] ss:$16 sps:$4 sm:$0xff]  }
 0x1dc   : > { %6257 = vmatprep.mubr.msk.bf16.mxu0 %vm2504_vm3, %v7100_v28 }
 0x1de   : > { %v8269_v63 = vpop.f32.mrb[64].mxu0  ;;  %v2859_v22 = vpop.f32.mrb[92].mxu1 }
 0x1df   : > { %v8272_v0 = vadd.f32 %v8178_v51, %v2859_v22  ;;  %v8274_v40 = vpop.f32.mrb[65].mxu0  ;;  %v2861_v31 = vpop.f32.mrb[93].mxu1 }
 0x1e0   : > { %v8279_v44 = vpop.f32.mrb[66].mxu0  ;;  %v2862_v32 = vpop.f32.mrb[94].mxu1 }
 0x1e1   : > { %10008 = vst [vmem:[#allocation25_spill] sm:$0xff] %v8272_v0  ;;  %v8285_v28 = vadd.f32 %v8185_v62, %v2862_v32  ;;  %v8287_v56 = vpop.f32.mrb[67].mxu0  ;;  %v2864_v51 = vpop.f32.mrb[95].mxu1  ;;  %v7105_v62 = vld [vmem:[%s9969_s1 + $0x2c8] ss:$16 sps:$4 sm:$0xff]  }
 0x1e3   : > { %10009 = vst [vmem:[#allocation26_spill] sm:$0xff] %v8285_v28  ;;  %3227 = vmatmul.mubr.bf16.gmra.mrb[172].mxu0 %v7102_v4  ;;  %v7106_v4 = vld [vmem:[%s9969_s1 + $0x2ec] ss:$16 sps:$4 sm:$0xff]  }
 0x1e4   : > { %6258 = vmatprep.mubr.msk.bf16.mxu0 %vm2504_vm3, %v7103_v61 }
 0x1e6   : > { %v8290_v31 = vpop.f32.mrb[68].mxu0  ;;  %v2867_v22 = vpop.f32.mrb[96].mxu1 }
 0x1e7   : > { %v8293_v0 = vadd.f32 %v2867_v22, %v8197_v1  ;;  %v8295_v33 = vpop.f32.mrb[69].mxu0  ;;  %v2869_v6 = vpop.f32.mrb[97].mxu1 }
 0x1e8   : > { %v8300_v32 = vpop.f32.mrb[70].mxu0  ;;  %v2870_v28 = vpop.f32.mrb[98].mxu1 }
 0x1e9   : > { %10010 = vst [vmem:[#allocation27_spill] sm:$0xff] %v8293_v0  ;;  %v8306_v61 = vadd.f32 %v2870_v28, %v8209_v58  ;;  %v8308_v51 = vpop.f32.mrb[71].mxu0  ;;  %v2872_v1 = vpop.f32.mrb[99].mxu1  ;;  %v7108_v58 = vld [vmem:[%s9969_s1 + $0x2e8] ss:$16 sps:$4 sm:$0xff]  }
 0x1eb   : > { %10011 = vst [vmem:[#allocation28_spill] sm:$0xff] %v8306_v61  ;;  %3235 = vmatmul.mubr.bf16.gmra.mrb[176].mxu0 %v7105_v62  ;;  %v7109_v62 = vld [vmem:[%s9969_s1 + $0x30c] ss:$16 sps:$4 sm:$0xff]  }
 0x1ec   : > { %6259 = vmatprep.mubr.msk.bf16.mxu0 %vm2504_vm3, %v7106_v4 }
 0x1ee   : > { %v8311_v6 = vpop.f32.mrb[72].mxu0  ;;  %v2875_v22 = vpop.f32.mrb[100].mxu1 }
 0x1ef   : > { %v8314_v0 = vadd.f32 %v8193_v17, %v2875_v22  ;;  %v8316_v7 = vpop.f32.mrb[73].mxu0  ;;  %v2877_v59 = vpop.f32.mrb[101].mxu1 }
 0x1f0   : > { %v8321_v28 = vpop.f32.mrb[74].mxu0  ;;  %v2878_v61 = vpop.f32.mrb[102].mxu1 }
 0x1f1   : > { %10012 = vst [vmem:[#allocation29_spill] sm:$0xff] %v8314_v0  ;;  %v8327_v4 = vadd.f32 %v8202_v35, %v2878_v61  ;;  %v8329_v1 = vpop.f32.mrb[75].mxu0  ;;  %v2880_v17 = vpop.f32.mrb[103].mxu1  ;;  %v7111_v35 = vld [vmem:[%s9969_s1 + $0x308] ss:$16 sps:$4 sm:$0xff]  }
 0x1f3   : > { %10013 = vst [vmem:[#allocation30_spill] sm:$0xff] %v8327_v4  ;;  %3243 = vmatmul.mubr.bf16.gmra.mrb[180].mxu0 %v7108_v58  ;;  %v7112_v58 = vld [vmem:[%s9969_s1 + $0x32c] ss:$16 sps:$4 sm:$0xff]  }
 0x1f4   : > { %6260 = vmatprep.mubr.msk.bf16.mxu0 %vm2504_vm3, %v7109_v62 }
 0x1f6   : > { %v8332_v59 = vpop.f32.mrb[76].mxu0  ;;  %v2883_v22 = vpop.f32.mrb[104].mxu1 }
 0x1f7   : > { %v8335_v0 = vadd.f32 %v2883_v22, %v8216_v13  ;;  %v8337_v46 = vpop.f32.mrb[77].mxu0  ;;  %v2885_v34 = vpop.f32.mrb[105].mxu1 }
 0x1f8   : > { %v8342_v61 = vpop.f32.mrb[78].mxu0  ;;  %v2886_v4 = vpop.f32.mrb[106].mxu1 }
 0x1f9   : > { %10014 = vst [vmem:[#allocation31_spill] sm:$0xff] %v8335_v0  ;;  %v8348_v62 = vadd.f32 %v2886_v4, %v8228_v60  ;;  %v8350_v17 = vpop.f32.mrb[79].mxu0  ;;  %v2888_v13 = vpop.f32.mrb[107].mxu1  ;;  %v7114_v60 = vld [vmem:[%s9969_s1 + $0x328] ss:$16 sps:$4 sm:$0xff]  }
 0x1fb   : > { %10015 = vst [vmem:[#allocation32_spill] sm:$0xff] %v8348_v62  ;;  %3251 = vmatmul.mubr.bf16.gmra.mrb[184].mxu0 %v7111_v35  ;;  %v7115_v35 = vld [vmem:[%s9969_s1 + $0x34c] ss:$16 sps:$4 sm:$0xff]  }
 0x1fc   : > { %6261 = vmatprep.mubr.msk.bf16.mxu0 %vm2504_vm3, %v7112_v58 }
 0x1fe   : > { %v8353_v34 = vpop.f32.mrb[80].mxu0  ;;  %v2891_v22 = vpop.f32.mrb[108].mxu1 }
 0x1ff   : > { %10016 = vst [vmem:[#allocation33_spill] sm:$0xff] %v8353_v34  ;;  %v8356_v0 = vadd.f32 %v8212_v38, %v2891_v22  ;;  %v8358_v15 = vpop.f32.mrb[81].mxu0  ;;  %v2893_v8 = vpop.f32.mrb[109].mxu1 }
 0x200   : > { %v8363_v4 = vpop.f32.mrb[82].mxu0  ;;  %v2894_v62 = vpop.f32.mrb[110].mxu1 }
 0x201   : > { %10017 = vst [vmem:[#allocation34_spill] sm:$0xff] %v8356_v0  ;;  %10018 = vst [vmem:[#allocation35_spill] sm:$0xff] %v8363_v4  ;;  %v8369_v58 = vadd.f32 %v8221_v12, %v2894_v62  ;;  %v8371_v13 = vpop.f32.mrb[83].mxu0  ;;  %v2896_v38 = vpop.f32.mrb[111].mxu1  ;;  %v7117_v12 = vld [vmem:[%s9969_s1 + $0x348] ss:$16 sps:$4 sm:$0xff]  }
 0x203   : > { %10019 = vst [vmem:[#allocation36_spill] sm:$0xff] %v8369_v58  ;;  %3259 = vmatmul.mubr.bf16.gmra.mrb[188].mxu0 %v7114_v60  ;;  %v7118_v60 = vld [vmem:[%s9969_s1 + $0x36c] ss:$16 sps:$4 sm:$0xff]  }
 0x204   : > { %6262 = vmatprep.mubr.msk.bf16.mxu0 %vm2504_vm3, %v7115_v35 }
 0x206   : > { %v8374_v8 = vpop.f32.mrb[84].mxu0  ;;  %v2899_v22 = vpop.f32.mrb[112].mxu1 }
 0x207   : > { %10020 = vst [vmem:[#allocation37_spill] sm:$0xff] %v8374_v8  ;;  %v8377_v0 = vadd.f32 %v2899_v22, %v8235_v48  ;;  %v8379_v47 = vpop.f32.mrb[85].mxu0  ;;  %v2901_v11 = vpop.f32.mrb[113].mxu1  ;;  %v9983_v22 = vmov 0.0  }
 0x208   : > { %10022 = vst [vmem:[#allocation39_spill] sm:$0xff] %v8379_v47  ;;  %v8384_v62 = vpop.f32.mrb[86].mxu0  ;;  %v2902_v58 = vpop.f32.mrb[114].mxu1  ;;  %6752 = vmatprep.subr.bf16.mxu1 %v9983_v22 }
 0x209   : > { %10021 = vst [vmem:[#allocation38_spill] sm:$0xff] %v8377_v0  ;;  %10023 = vst [vmem:[#allocation40_spill] sm:$0xff] %v8384_v62  ;;  %v8390_v35 = vadd.f32 %v2902_v58, %v8247_v24  ;;  %v8392_v38 = vpop.f32.mrb[87].mxu0  ;;  %v2904_v48 = vpop.f32.mrb[115].mxu1 }
 0x20a   : > { %10025 = vst [vmem:[#allocation42_spill] sm:$0xff] %v8392_v38  ;;  %v3507_v11 = vpop.permute.xlu1 %3506  ;;  %v3502_v0 = vpop.permute.xlu0 %3501 }
 0x20b   : > { %10024 = vst [vmem:[#allocation41_spill] sm:$0xff] %v8390_v35  ;;  %3267 = vmatmul.mubr.bf16.gmra.mrb[192].mxu0 %v7117_v12  ;;  %v7120_v12 = vld [vmem:[%s9969_s1 + $0x368] ss:$16 sps:$4 sm:$0xff]  }
 0x20c   : > { %6263 = vmatprep.mubr.msk.bf16.mxu0 %vm2504_vm3, %v7118_v60  ;;  %v7121_v60 = vld [vmem:[%s9969_s1 + $0x38c] ss:$16 sps:$4 sm:$0xff]  }
 0x20e   : > { %v3060_v62 = vpop.f32.mrb[88].mxu0  ;;  %v2907_v8 = vpop.f32.mrb[116].mxu1 }
 0x20f   : > { %v3061_v47 = vadd.f32 %v3060_v62, %v7966_v20  ;;  %v8398_v4 = vadd.f32 %v8231_v2, %v2907_v8  ;;  %v2909_v24 = vpop.f32.mrb[117].mxu1  ;;  %v3062_v58 = vpop.f32.mrb[89].mxu0 }
 0x210   : > { %v2910_v48 = vpop.f32.mrb[118].mxu1  ;;  %v3063_v35 = vpop.f32.mrb[90].mxu0 }
 0x211   : > { %10026 = vst [vmem:[#allocation43_spill] sm:$0xff] %v8398_v4  ;;  %v3939_v22 = vadd.f32 %v3502_v0, %v3061_v47  ;;  %v8407_v38 = vadd.f32 %v8240_v43, %v2910_v48  ;;  %v3064_v20 = vadd.f32 %v3063_v35, %v7972_v23  ;;  %v3065_v2 = vpop.f32.mrb[91].mxu0  ;;  %v2912_v8 = vpop.f32.mrb[119].mxu1  ;;  %v7123_v23 = vld [vmem:[%s9969_s1 + $0x388] ss:$16 sps:$4 sm:$0xff]  }
 0x212   : > { %v3512_v24 = vpop.permute.xlu1 %3511 }
 0x213   : > { %v3940_v62 = vadd.f32 %v3507_v11, %v3064_v20  ;;  %3275 = vmatmul.mubr.bf16.gmra.mrb[196].mxu0 %v7120_v12  ;;  %v4027_v58 = vmax.f32 %v3939_v22, 0.0  ;;  %v7124_v22 = vld [vmem:[%s9969_s1 + $0x3ac] ss:$16 sps:$4 sm:$0xff]   ;;  %v3522_v20 = vpop.permute.xlu0 %3521 }
 0x214   : > { %6264 = vmatprep.mubr.msk.bf16.mxu0 %vm2504_vm3, %v7121_v60 }
 0x215   : > { %v4028_v4 = vmax.f32 %v3940_v62, 0.0 }
 0x216   : > { %v2915_v3 = vpop.f32.mrb[120].mxu1  ;;  %v3068_v34 = vpop.f32.mrb[92].mxu0 }
 0x217   : > { %v8412_v49 = vadd.f32 %v2915_v3, %v8254_v16  ;;  %v3069_v0 = vadd.f32 %v3068_v34, %v7955_v14  ;;  %v2917_v47 = vpop.f32.mrb[121].mxu1  ;;  %v3070_v43 = vpop.f32.mrb[93].mxu0  ;;  %v8415_v48 = vpack.c.bf16 %v4028_v4, %v4027_v58 }
 0x218   : > { %v2918_v35 = vpop.f32.mrb[122].mxu1  ;;  %v3071_v11 = vpop.f32.mrb[94].mxu0  ;;  %v7126_v43 = vld [vmem:[%s9969_s1 + $0x3a8] ss:$16 sps:$4 sm:$0xff]  }
 0x219   : > { %v3941_v12 = vadd.f32 %v3512_v24, %v3069_v0  ;;  %v8424_v3 = vadd.f32 %v2918_v35, %v8266_v19  ;;  %v3072_v14 = vadd.f32 %v3071_v11, %v7969_v25  ;;  %4327 = vrot.lane.b32.xlu0 %v8415_v48, %s7315_s29  ;;  %v2920_v16 = vpop.f32.mrb[123].mxu1  ;;  %v3073_v34 = vpop.f32.mrb[95].mxu0  ;;  %v7127_v11 = vld [vmem:[%s9969_s1 + $0x3cc] ss:$16 sps:$4 sm:$0xff]  }
 0x21a   : > { %v3517_v4 = vpop.permute.xlu1 %3516 }
 0x21b   : > { %v3942_v60 = vadd.f32 %v3517_v4, %v3072_v14  ;;  %3283 = vmatmul.mubr.bf16.gmra.mrb[200].mxu0 %v7123_v23  ;;  %v4029_v2 = vmax.f32 %v3941_v12, 0.0  ;;  %v3532_v4 = vpop.permute.xlu0 %3531 }
 0x21c   : > { %6265 = vmatprep.mubr.msk.bf16.mxu0 %vm2504_vm3, %v7124_v22 }
 0x21d   : > { %v4030_v8 = vmax.f32 %v3942_v60, 0.0 }
 0x21e   : > { %v2923_v62 = vpop.f32.mrb[124].mxu1  ;;  %v3076_v24 = vpop.f32.mrb[96].mxu0 }
 0x21f   : > { %v8431_v19 = vadd.f32 %v8250_v54, %v2923_v62  ;;  %v3077_v25 = vadd.f32 %v3076_v24, %v7995_v36  ;;  %v2925_v58 = vpop.f32.mrb[125].mxu1  ;;  %v3078_v0 = vpop.f32.mrb[97].mxu0  ;;  %v8434_v47 = vpack.c.bf16 %v4030_v8, %v4029_v2 }
 0x220   : > { %v2926_v23 = vpop.f32.mrb[126].mxu1  ;;  %v3079_v35 = vpop.f32.mrb[98].mxu0  ;;  %v7129_v58 = vld [vmem:[%s9969_s1 + $0x3c8] ss:$16 sps:$4 sm:$0xff]  }
 0x221   : > { %v3943_v22 = vadd.f32 %v3522_v20, %v3077_v25  ;;  %v8443_v54 = vadd.f32 %v8259_v27, %v2926_v23  ;;  %v3080_v36 = vadd.f32 %v3079_v35, %v8001_v39  ;;  %4329 = vrot.lane.b32.xlu1 %v8434_v47, %s7315_s29  ;;  %v2928_v12 = vpop.f32.mrb[127].mxu1  ;;  %v3081_v14 = vpop.f32.mrb[99].mxu0  ;;  %v7130_v23 = vld [vmem:[%s9969_s1 + $0x3ec] ss:$16 sps:$4 sm:$0xff]  }
 0x222   : > { %v3527_v16 = vpop.permute.xlu1 %3526  ;;  %v3542_v14 = vpop.permute.xlu0 %3541 }
 0x223   : > { %v3944_v34 = vadd.f32 %v3527_v16, %v3080_v36  ;;  %3291 = vmatmul.mubr.bf16.gmra.mrb[204].mxu0 %v7126_v43  ;;  %v4031_v60 = vmax.f32 %v3943_v22, 0.0 }
 0x224   : > { %6266 = vmatprep.mubr.msk.bf16.mxu0 %vm2504_vm3, %v7127_v11 }
 0x225   : > { %v4032_v2 = vmax.f32 %v3944_v34, 0.0 }
 0x226   : > { %v2931_v8 = vpop.f32.mrb[128].mxu1  ;;  %v3084_v20 = vpop.f32.mrb[100].mxu0 }
 0x227   : > { %v8450_v27 = vadd.f32 %v2931_v8, %v8274_v40  ;;  %v3085_v39 = vadd.f32 %v3084_v20, %v7984_v21  ;;  %v2933_v62 = vpop.f32.mrb[129].mxu1  ;;  %v3086_v24 = vpop.f32.mrb[101].mxu0  ;;  %v8453_v25 = vpack.c.bf16 %v4032_v2, %v4031_v60 }
 0x228   : > { %v2934_v0 = vpop.f32.mrb[130].mxu1  ;;  %v3087_v43 = vpop.f32.mrb[102].mxu0  ;;  %v7132_v62 = vld [vmem:[%s9969_s1 + $0x3e8] ss:$16 sps:$4 sm:$0xff]  }
 0x229   : > { %v3945_v35 = vadd.f32 %v3532_v4, %v3085_v39  ;;  %v8462_v40 = vadd.f32 %v2934_v0, %v8287_v56  ;;  %v3088_v21 = vadd.f32 %v3087_v43, %v7998_v41  ;;  %4331 = vrot.lane.b32.xlu0 %v8453_v25, %s7315_s29  ;;  %v2936_v11 = vpop.f32.mrb[131].mxu1  ;;  %v3089_v22 = vpop.f32.mrb[103].mxu0  ;;  %v10027_v56 = vmov 0.0   ;;  %v7133_v0 = vld [vmem:[%s9969_s1 + $0x40c] ss:$16 sps:$4 sm:$0xff]  }
 0x22a   : > { %v3537_v36 = vpop.permute.xlu1 %3536  ;;  %6762 = vmatprep.mubr.msk.bf16.mxu1 %vm7317_vm4, %v10027_v56  ;;  %v3427_v11 = vld [vmem:[%s9971_s3 + $0x80] sm:$0xff] }
 0x22b   : > { %v3946_v12 = vadd.f32 %v3537_v36, %v3088_v21  ;;  %3299 = vmatmul.mubr.bf16.gmra.mrb[208].mxu0 %v7129_v58  ;;  %v4033_v16 = vmax.f32 %v3945_v35, 0.0 }
 0x22c   : > { %6267 = vmatprep.mubr.msk.bf16.mxu0 %vm2504_vm3, %v7130_v23 }
 0x22d   : > { %v4034_v34 = vmax.f32 %v3946_v12, 0.0 }
 0x22e   : > { %v2939_v60 = vpop.f32.mrb[132].mxu1  ;;  %v3092_v4 = vpop.f32.mrb[104].mxu0 }
 0x22f   : > { %v8471_v41 = vadd.f32 %v8269_v63, %v2939_v60  ;;  %v3093_v2 = vadd.f32 %v3092_v4, %v8020_v52  ;;  %v2941_v8 = vpop.f32.mrb[133].mxu1  ;;  %v3094_v20 = vpop.f32.mrb[105].mxu0  ;;  %v8474_v39 = vpack.c.bf16 %v4034_v34, %v4033_v16 }
 0x230   : > { %v2942_v24 = vpop.f32.mrb[134].mxu1  ;;  %v3095_v58 = vpop.f32.mrb[106].mxu0  ;;  %v7135_v8 = vld [vmem:[%s9969_s1 + $0x408] ss:$16 sps:$4 sm:$0xff]  }
 0x231   : > { %v3947_v43 = vadd.f32 %v3542_v14, %v3093_v2  ;;  %v8483_v63 = vadd.f32 %v8279_v44, %v2942_v24  ;;  %v3096_v52 = vadd.f32 %v3095_v58, %v8026_v55  ;;  %4333 = vrot.lane.b32.xlu1 %v8474_v39, %s7315_s29  ;;  %v2944_v23 = vpop.f32.mrb[135].mxu1  ;;  %v3097_v35 = vpop.f32.mrb[107].mxu0  ;;  %v3429_v55 = vld [vmem:[%s9971_s3 + $0x90] sm:$0xff]  ;;  %v7136_v24 = vld [vmem:[%s9969_s1 + $0x42c] ss:$16 sps:$4 sm:$0xff]  }
 0x232   : > { %v3547_v21 = vpop.permute.xlu1 %3546  ;;  %v3433_v23 = vld [vmem:[%s9971_s3 + $0xb0] sm:$0xff]  ;;  %v3430_v35 = vld [vmem:[%s9971_s3 + $0x98] sm:$0xff] }
 0x233   : > { %v3948_v22 = vadd.f32 %v3547_v21, %v3096_v52  ;;  %3307 = vmatmul.mubr.bf16.gmra.mrb[212].mxu0 %v7132_v62  ;;  %v4035_v36 = vmax.f32 %v3947_v43, 0.0  ;;  %v3431_v43 = vld [vmem:[%s9971_s3 + $0xa0] sm:$0xff]  ;;  %v3428_v52 = vld [vmem:[%s9971_s3 + $0x88] sm:$0xff] }
 0x234   : > { %6268 = vmatprep.mubr.msk.bf16.mxu0 %vm2504_vm3, %v7133_v0 }
 0x235   : > { %v4036_v12 = vmax.f32 %v3948_v22, 0.0  ;;  %3581 = vperm.xlu1 %6829, %v3427_v11  }
 0x236   : > { %v2947_v44 = vpop.f32.mrb[136].mxu1  ;;  %v3100_v14 = vpop.f32.mrb[108].mxu0 }
 0x237   : > { %v8496_v16 = vadd.f32 %v2947_v44, %v8295_v33  ;;  %v8499_v34 = vadd.f32 %v3100_v14, %v8011_v37  ;;  %v2949_v60 = vpop.f32.mrb[137].mxu1  ;;  %v3102_v4 = vpop.f32.mrb[109].mxu0  ;;  %v8501_v2 = vpack.c.bf16 %v4036_v12, %v4035_v36  ;;  %v7138_v12 = vld [vmem:[%s9969_s1 + $0x428] ss:$16 sps:$4 sm:$0xff]  }
 0x238   : > { %v2950_v20 = vpop.f32.mrb[138].mxu1  ;;  %v3103_v62 = vpop.f32.mrb[110].mxu0 }
 0x239   : > { %v8510_v33 = vadd.f32 %v2950_v20, %v8308_v51  ;;  %v8513_v37 = vadd.f32 %v3103_v62, %v8023_v57  ;;  %3591 = vperm.xlu1 %6829, %v3429_v55   ;;  %4335 = vrot.lane.b32.xlu0 %v8501_v2, %s7315_s29  ;;  %v2952_v58 = vpop.f32.mrb[139].mxu1  ;;  %v3105_v0 = vpop.f32.mrb[111].mxu0  ;;  %v7139_v55 = vld [vmem:[%s9969_s1 + $0x44c] ss:$16 sps:$4 sm:$0xff]   ;;  %v3437_v62 = vld [vmem:[%s9971_s3 + $0xd0] sm:$0xff] }
 0x23a   : > { %v3432_v20 = vld [vmem:[%s9971_s3 + $0xa8] sm:$0xff] }
 0x23b   : > { %3315 = vmatmul.mubr.bf16.gmra.mrb[216].mxu0 %v7135_v8  ;;  %v3435_v8 = vld [vmem:[%s9971_s3 + $0xc0] sm:$0xff] }
 0x23c   : > { %6269 = vmatprep.mubr.msk.bf16.mxu0 %vm2504_vm3, %v7136_v24  ;;  %v3434_v24 = vld [vmem:[%s9971_s3 + $0xb8] sm:$0xff] }
 0x23d   : > { %3601 = vperm.xlu1 %6829, %v3431_v43   ;;  %3586 = vperm.xlu0 %6828, %v3428_v52  }
 0x23e   : > { %v2955_v57 = vpop.f32.mrb[140].mxu1  ;;  %v3108_v51 = vpop.f32.mrb[112].mxu0 }
 0x23f   : > { %v8531_v21 = vadd.f32 %v8290_v31, %v2955_v57  ;;  %v8534_v11 = vadd.f32 %v3108_v51, %v8045_v5  ;;  %v2957_v22 = vpop.f32.mrb[141].mxu1  ;;  %v3110_v36 = vpop.f32.mrb[113].mxu0  ;;  %v7141_v57 = vld [vmem:[%s9969_s1 + $0x448] ss:$16 sps:$4 sm:$0xff]  }
 0x240   : > { %v2958_v44 = vpop.f32.mrb[142].mxu1  ;;  %v3111_v14 = vpop.f32.mrb[114].mxu0 }
 0x241   : > { %10028 = vst [vmem:[#allocation44_spill] sm:$0xff] %v8531_v21  ;;  %v8543_v60 = vadd.f32 %v8300_v32, %v2958_v44  ;;  %v8546_v31 = vadd.f32 %v3111_v14, %v8051_v9  ;;  %3611 = vperm.xlu1 %6829, %v3433_v23   ;;  %3596 = vperm.xlu0 %6828, %v3430_v35   ;;  %v2960_v5 = vpop.f32.mrb[143].mxu1  ;;  %v3113_v4 = vpop.f32.mrb[115].mxu0  ;;  %v7142_v35 = vld [vmem:[%s9969_s1 + $0x46c] ss:$16 sps:$4 sm:$0xff]   ;;  %v3439_v14 = vld [vmem:[%s9971_s3 + $0xe0] sm:$0xff] }
 0x242   : > { %v3436_v44 = vld [vmem:[%s9971_s3 + $0xc8] sm:$0xff] }
 0x243   : > { %10029 = vst [vmem:[#allocation45_spill] sm:$0xff] %v8543_v60  ;;  %3323 = vmatmul.mubr.bf16.gmra.mrb[220].mxu0 %v7138_v12  ;;  %v3421_v12 = vld [vmem:[%s9971_s3 + $0x50] sm:$0xff] }
 0x244   : > { %6270 = vmatprep.mubr.msk.bf16.mxu0 %vm2504_vm3, %v7139_v55  ;;  %v3438_v55 = vld [vmem:[%s9971_s3 + $0xd8] sm:$0xff] }
 0x245   : > { %3621 = vperm.xlu1 %6829, %v3435_v8   ;;  %3606 = vperm.xlu0 %6828, %v3432_v20  }
 0x246   : > { %v2963_v32 = vpop.f32.mrb[144].mxu1  ;;  %v3116_v9 = vpop.f32.mrb[116].mxu0 }
 0x247   : > { %v8562_v58 = vadd.f32 %v2963_v32, %v8316_v7  ;;  %v8565_v0 = vadd.f32 %v3116_v9, %v8036_v53  ;;  %v2965_v43 = vpop.f32.mrb[145].mxu1  ;;  %v3118_v52 = vpop.f32.mrb[117].mxu0  ;;  %v7144_v32 = vld [vmem:[%s9969_s1 + $0x468] ss:$16 sps:$4 sm:$0xff]  }
 0x248   : > { %v2966_v51 = vpop.f32.mrb[146].mxu1  ;;  %v3119_v23 = vpop.f32.mrb[118].mxu0 }
 0x249   : > { %10030 = vst [vmem:[#allocation46_spill] sm:$0xff] %v8562_v58  ;;  %v8574_v22 = vadd.f32 %v2966_v51, %v8329_v1  ;;  %v8577_v7 = vadd.f32 %v3119_v23, %v8048_v10  ;;  %3631 = vperm.xlu1 %6829, %v3437_v62   ;;  %3616 = vperm.xlu0 %6828, %v3434_v24   ;;  %v2968_v53 = vpop.f32.mrb[147].mxu1  ;;  %v3121_v36 = vpop.f32.mrb[119].mxu0  ;;  %v7145_v24 = vld [vmem:[%s9969_s1 + $0x48c] ss:$16 sps:$4 sm:$0xff]   ;;  %v3441_v23 = vld [vmem:[%s9971_s3 + $0xf0] sm:$0xff] }
 0x24a   : > { %v3422_v51 = vld [vmem:[%s9971_s3 + $0x58] sm:$0xff] }
 0x24b   : > { %10031 = vst [vmem:[#allocation47_spill] sm:$0xff] %v8574_v22  ;;  %3331 = vmatmul.mubr.bf16.gmra.mrb[224].mxu0 %v7141_v57  ;;  %v3423_v57 = vld [vmem:[%s9971_s3 + $0x60] sm:$0xff] }
 0x24c   : > { %6271 = vmatprep.mubr.msk.bf16.mxu0 %vm2504_vm3, %v7142_v35  ;;  %v3440_v35 = vld [vmem:[%s9971_s3 + $0xe8] sm:$0xff] }
 0x24d   : > { %3551 = vperm.xlu1 %6829, %v3421_v12   ;;  %3626 = vperm.xlu0 %6828, %v3436_v44  }
 0x24e   : > { %v2971_v1 = vpop.f32.mrb[148].mxu1  ;;  %v3124_v10 = vpop.f32.mrb[120].mxu0 }
 0x24f   : > { %v8593_v5 = vadd.f32 %v8311_v6, %v2971_v1  ;;  %v8596_v4 = vadd.f32 %v3124_v10, %v8069_v26  ;;  %v2973_v8 = vpop.f32.mrb[149].mxu1  ;;  %v3126_v20 = vpop.f32.mrb[121].mxu0  ;;  %v7147_v1 = vld [vmem:[%s9969_s1 + $0x488] ss:$16 sps:$4 sm:$0xff]  }
 0x250   : > { %v2974_v9 = vpop.f32.mrb[150].mxu1  ;;  %v3127_v62 = vpop.f32.mrb[122].mxu0 }
 0x251   : > { %10032 = vst [vmem:[#allocation48_spill] sm:$0xff] %v8593_v5  ;;  %v8605_v43 = vadd.f32 %v8321_v28, %v2974_v9  ;;  %v8608_v6 = vadd.f32 %v3127_v62, %v8074_v30  ;;  %3641 = vperm.xlu1 %6829, %v3439_v14   ;;  %3636 = vperm.xlu0 %6828, %v3438_v55   ;;  %v2976_v26 = vpop.f32.mrb[151].mxu1  ;;  %v3129_v52 = vpop.f32.mrb[123].mxu0  ;;  %v7148_v55 = vld [vmem:[%s9969_s1 + $0x4ac] ss:$16 sps:$4 sm:$0xff]   ;;  %v3475_v62 = vld [vmem:[%s9971_s3 + $0x200] sm:$0xff] }
 0x252   : > { %v3424_v9 = vld [vmem:[%s9971_s3 + $0x68] sm:$0xff] }
 0x253   : > { %10033 = vst [vmem:[#allocation49_spill] sm:$0xff] %v8605_v43  ;;  %3339 = vmatmul.mubr.bf16.gmra.mrb[228].mxu0 %v7144_v32  ;;  %v3425_v32 = vld [vmem:[%s9971_s3 + $0x70] sm:$0xff]  ;;  %v3471_v43 = vld [vmem:[%s9971_s3 + $0x1e0] sm:$0xff] }
 0x254   : > { %6272 = vmatprep.mubr.msk.bf16.mxu0 %vm2504_vm3, %v7145_v24  ;;  %v3442_v24 = vld [vmem:[%s9971_s3 + $0xf8] sm:$0xff] }
 0x255   : > { %3561 = vperm.xlu1 %6829, %v3423_v57   ;;  %3556 = vperm.xlu0 %6828, %v3422_v51  }
 0x256   : > { %v2979_v28 = vpop.f32.mrb[152].mxu1  ;;  %v3132_v30 = vpop.f32.mrb[124].mxu0 }
 0x257   : > { %v8624_v53 = vadd.f32 %v2979_v28, %v8337_v46  ;;  %v8627_v36 = vadd.f32 %v3132_v30, %v8060_v18  ;;  %v2981_v12 = vpop.f32.mrb[153].mxu1  ;;  %v3134_v44 = vpop.f32.mrb[125].mxu0  ;;  %v7150_v28 = vld [vmem:[%s9969_s1 + $0x4a8] ss:$16 sps:$4 sm:$0xff]  }
 0x258   : > { %v2982_v10 = vpop.f32.mrb[154].mxu1  ;;  %v3135_v14 = vpop.f32.mrb[126].mxu0 }
 0x259   : > { %10034 = vst [vmem:[#allocation50_spill] sm:$0xff] %v8624_v53  ;;  %v8636_v8 = vadd.f32 %v2982_v10, %v8350_v17  ;;  %v8639_v46 = vadd.f32 %v3135_v14, %v8071_v29  ;;  %3651 = vperm.xlu1 %6829, %v3441_v23   ;;  %3646 = vperm.xlu0 %6828, %v3440_v35   ;;  %v2984_v18 = vpop.f32.mrb[155].mxu1  ;;  %v3137_v20 = vpop.f32.mrb[127].mxu0  ;;  %v7151_v35 = vld [vmem:[%s9969_s1 + $0x4cc] ss:$16 sps:$4 sm:$0xff]   ;;  %v3479_v14 = vld [vmem:[%s9971_s3 + $0x220] sm:$0xff] }
 0x25a   : > { %v3426_v10 = vld [vmem:[%s9971_s3 + $0x78] sm:$0xff] }
 0x25b   : > { %10035 = vst [vmem:[#allocation51_spill] sm:$0xff] %v8636_v8  ;;  %3347 = vmatmul.mubr.bf16.gmra.mrb[232].mxu0 %v7147_v1  ;;  %v3477_v1 = vld [vmem:[%s9971_s3 + $0x210] sm:$0xff]  ;;  %v3490_v8 = vld [vmem:[%s9971_s3 + $0x278] sm:$0xff] }
 0x25c   : > { %6273 = vmatprep.mubr.msk.bf16.mxu0 %vm2504_vm3, %v7148_v55  ;;  %v3476_v55 = vld [vmem:[%s9971_s3 + $0x208] sm:$0xff] }
 0x25d   : > { %3571 = vperm.xlu1 %6829, %v3425_v32   ;;  %3566 = vperm.xlu0 %6828, %v3424_v9  }
 0x25e   : > { %v2987_v17 = vpop.f32.mrb[156].mxu1  ;;  %v3140_v29 = vpop.f32.mrb[128].mxu0 }
 0x25f   : > { %v8655_v26 = vadd.f32 %v8332_v59, %v2987_v17  ;;  %v8658_v52 = vadd.f32 %v3140_v29, %v8091_v45  ;;  %v2989_v57 = vpop.f32.mrb[157].mxu1  ;;  %v3142_v51 = vpop.f32.mrb[129].mxu0  ;;  %v7153_v17 = vld [vmem:[%s9969_s1 + $0x4c8] ss:$16 sps:$4 sm:$0xff]  }
 0x260   : > { %v2990_v30 = vpop.f32.mrb[158].mxu1  ;;  %v3143_v23 = vpop.f32.mrb[130].mxu0 }
 0x261   : > { %10036 = vst [vmem:[#allocation52_spill] sm:$0xff] %v8655_v26  ;;  %v8667_v12 = vadd.f32 %v8342_v61, %v2990_v30  ;;  %v8670_v59 = vadd.f32 %v3143_v23, %v8095_v50  ;;  %3821 = vperm.xlu1 %6829, %v3475_v62   ;;  %3656 = vperm.xlu0 %6828, %v3442_v24   ;;  %v2992_v45 = vpop.f32.mrb[159].mxu1  ;;  %v3145_v44 = vpop.f32.mrb[131].mxu0  ;;  %v7154_v24 = vld [vmem:[%s9969_s1 + $0x4ec] ss:$16 sps:$4 sm:$0xff]   ;;  %v3459_v30 = vld [vmem:[%s9971_s3 + $0x180] sm:$0xff] }
 0x262   : > { %v3478_v23 = vld [vmem:[%s9971_s3 + $0x218] sm:$0xff]  ;;  %v3443_v45 = vld [vmem:[%s9971_s3 + $0x100] sm:$0xff]  ;;  %v3480_v44 = vld [vmem:[%s9971_s3 + $0x228] sm:$0xff] }
 0x263   : > { %10037 = vst [vmem:[#allocation53_spill] sm:$0xff] %v8667_v12  ;;  %3355 = vmatmul.mubr.bf16.gmra.mrb[236].mxu0 %v7150_v28  ;;  %v3468_v12 = vld [vmem:[%s9971_s3 + $0x1c8] sm:$0xff] }
 0x264   : > { %6274 = vmatprep.mubr.msk.bf16.mxu0 %vm2504_vm3, %v7151_v35 }
 0x265   : > { %3831 = vperm.xlu1 %6829, %v3477_v1   ;;  %3576 = vperm.xlu0 %6828, %v3426_v10   ;;  %v10041_v1 = vld [vmem:[#allocation33_spill] sm:$0xff] }
 0x266   : > { %v2995_v61 = vpop.f32.mrb[160].mxu1  ;;  %v3148_v50 = vpop.f32.mrb[132].mxu0 }
 0x267   : > { %v8686_v18 = vadd.f32 %v2995_v61, %v8358_v15  ;;  %v8689_v20 = vadd.f32 %v3148_v50, %v8083_v42  ;;  %v2997_v32 = vpop.f32.mrb[161].mxu1  ;;  %v3150_v9 = vpop.f32.mrb[133].mxu0  ;;  %v10040_v15 = vld [vmem:[#allocation2_spill] sm:$0xff]  ;;  %v10043_v61 = vld [vmem:[#allocation4_spill] sm:$0xff] }
 0x268   : > { %v2998_v29 = vpop.f32.mrb[162].mxu1  ;;  %v3151_v62 = vpop.f32.mrb[134].mxu0  ;;  %v7156_v32 = vld [vmem:[%s9969_s1 + $0x4e8] ss:$16 sps:$4 sm:$0xff]  }
 0x269   : > { %10038 = vst [vmem:[#allocation54_spill] sm:$0xff] %v8686_v18  ;;  %v8698_v57 = vadd.f32 %v2998_v29, %v8371_v13  ;;  %v8701_v51 = vadd.f32 %v3151_v62, %v10040_v15  ;;  %3841 = vperm.xlu1 %6829, %v3479_v14   ;;  %3826 = vperm.xlu0 %6828, %v3476_v55   ;;  %v3000_v42 = vpop.f32.mrb[163].mxu1  ;;  %v3153_v28 = vpop.f32.mrb[135].mxu0  ;;  %v7157_v29 = vld [vmem:[%s9969_s1 + $0x50c] ss:$16 sps:$4 sm:$0xff]   ;;  %v10046_v15 = vld [vmem:[#allocation6_spill] sm:$0xff] }
 0x26a   : > { %v10044_v62 = vld [vmem:[#allocation35_spill] sm:$0xff] }
 0x26b   : > { %10039 = vst [vmem:[#allocation55_spill] sm:$0xff] %v8698_v57  ;;  %3363 = vmatmul.mubr.bf16.gmra.mrb[240].mxu0 %v7153_v17  ;;  %v3450_v57 = vld [vmem:[%s9971_s3 + $0x138] sm:$0xff] }
 0x26c   : > { %6275 = vmatprep.mubr.msk.bf16.mxu0 %vm2504_vm3, %v7154_v24 }
 0x26d   : > { %3741 = vperm.xlu1 %6829, %v3459_v30   ;;  %3836 = vperm.xlu0 %6828, %v3478_v23   ;;  %v3481_v23 = vld [vmem:[%s9971_s3 + $0x230] sm:$0xff] }
 0x26e   : > { %v3003_v13 = vpop.f32.mrb[164].mxu1  ;;  %v3156_v35 = vpop.f32.mrb[136].mxu0 }
 0x26f   : > { %v8717_v10 = vadd.f32 %v10041_v1, %v3003_v13  ;;  %v8720_v50 = vadd.f32 %v3156_v35, %v10043_v61  ;;  %v3005_v14 = vpop.f32.mrb[165].mxu1  ;;  %v3158_v55 = vpop.f32.mrb[137].mxu0  ;;  %v3460_v13 = vld [vmem:[%s9971_s3 + $0x188] sm:$0xff] }
 0x270   : > { %v3006_v9 = vpop.f32.mrb[166].mxu1  ;;  %v3159_v17 = vpop.f32.mrb[138].mxu0  ;;  %v10047_v61 = vld [vmem:[#allocation39_spill] sm:$0xff] }
 0x271   : > { %10042 = vst [vmem:[#allocation2_spill] sm:$0xff] %v8717_v10  ;;  %v8729_v24 = vadd.f32 %v10044_v62, %v3006_v9  ;;  %v8732_v42 = vadd.f32 %v3159_v17, %v10046_v15  ;;  %3661 = vperm.xlu1 %6829, %v3443_v45   ;;  %3846 = vperm.xlu0 %6828, %v3480_v44   ;;  %v3008_v28 = vpop.f32.mrb[167].mxu1  ;;  %v3161_v30 = vpop.f32.mrb[139].mxu0  ;;  %v3461_v45 = vld [vmem:[%s9971_s3 + $0x190] sm:$0xff]  ;;  %v3444_v44 = vld [vmem:[%s9971_s3 + $0x108] sm:$0xff]  ;;  %v10064_v10 = vld [vmem:[#allocation14_spill] sm:$0xff] }
 0x272   : > { %v10049_v55 = vld [vmem:[#allocation3_spill] sm:$0xff]  ;;  %v10050_v30 = vld [vmem:[#allocation42_spill] sm:$0xff] }
 0x273   : > { %10045 = vst [vmem:[#allocation33_spill] sm:$0xff] %v8729_v24  ;;  %3371 = vmatmul.mubr.bf16.gmra.mrb[244].mxu0 %v7156_v32  ;;  %v7160_v28 = vld [vmem:[%s9969_s1 + $0x52c] ss:$16 sps:$4 sm:$0xff]  }
 0x274   : > { %6276 = vmatprep.mubr.msk.bf16.mxu0 %vm2504_vm3, %v7157_v29  ;;  %v7159_v29 = vld [vmem:[%s9969_s1 + $0x508] ss:$16 sps:$4 sm:$0xff]  }
 0x275   : > { %3851 = vperm.xlu1 %6829, %v3481_v23   ;;  %3746 = vperm.xlu0 %6828, %v3460_v13   ;;  %v10052_v13 = vld [vmem:[#allocation5_spill] sm:$0xff] }
 0x276   : > { %v3011_v35 = vpop.f32.mrb[168].mxu1  ;;  %v3164_v1 = vpop.f32.mrb[140].mxu0 }
 0x277   : > { %v8748_v14 = vadd.f32 %v3011_v35, %v10047_v61  ;;  %v8751_v9 = vadd.f32 %v3164_v1, %v10049_v55  ;;  %v3013_v32 = vpop.f32.mrb[169].mxu1  ;;  %v3166_v17 = vpop.f32.mrb[141].mxu0  ;;  %v3445_v55 = vld [vmem:[%s9971_s3 + $0x110] sm:$0xff] }
 0x278   : > { %v3014_v62 = vpop.f32.mrb[170].mxu1  ;;  %v3167_v15 = vpop.f32.mrb[142].mxu0  ;;  %v3482_v32 = vld [vmem:[%s9971_s3 + $0x238] sm:$0xff] }
 0x279   : > { %10048 = vst [vmem:[#allocation4_spill] sm:$0xff] %v8748_v14  ;;  %v8760_v23 = vadd.f32 %v3014_v62, %v10050_v30  ;;  %v8763_v35 = vadd.f32 %v3167_v15, %v10052_v13  ;;  %3751 = vperm.xlu1 %6829, %v3461_v45   ;;  %3666 = vperm.xlu0 %6828, %v3444_v44   ;;  %v3016_v1 = vpop.f32.mrb[171].mxu1  ;;  %v3169_v61 = vpop.f32.mrb[143].mxu0  ;;  %v3483_v45 = vld [vmem:[%s9971_s3 + $0x240] sm:$0xff]  ;;  %v3462_v44 = vld [vmem:[%s9971_s3 + $0x198] sm:$0xff]  ;;  %v10055_v13 = vld [vmem:[#allocation7_spill] sm:$0xff] }
 0x27a   : > { %v10053_v15 = vld [vmem:[#allocation37_spill] sm:$0xff]  ;;  %v10056_v14 = vld [vmem:[#allocation40_spill] sm:$0xff] }
 0x27b   : > { %10051 = vst [vmem:[#allocation35_spill] sm:$0xff] %v8760_v23  ;;  %3379 = vmatmul.mubr.bf16.gmra.mrb[248].mxu0 %v7159_v29  ;;  %v7162_v61 = vld [vmem:[%s9969_s1 + $0x528] ss:$16 sps:$4 sm:$0xff]   ;;  %v7165_v23 = vld [vmem:[%s9969_s1 + $0x54c] ss:$16 sps:$4 sm:$0xff]  }
 0x27c   : > { %6277 = vmatprep.mubr.msk.bf16.mxu0 %vm2504_vm3, %v7160_v28 }
 0x27d   : > { %3671 = vperm.xlu1 %6829, %v3445_v55   ;;  %3856 = vperm.xlu0 %6828, %v3482_v32  }
 0x27e   : > { %v3019_v17 = vpop.f32.mrb[172].mxu1  ;;  %v3172_v62 = vpop.f32.mrb[144].mxu0 }
 0x27f   : > { %v8779_v30 = vadd.f32 %v10053_v15, %v3019_v17  ;;  %v8782_v1 = vadd.f32 %v3172_v62, %v10055_v13  ;;  %v3021_v29 = vpop.f32.mrb[173].mxu1  ;;  %v3174_v28 = vpop.f32.mrb[145].mxu0  ;;  %v10058_v17 = vld [vmem:[#allocation8_spill] sm:$0xff] }
 0x280   : > { %v3022_v55 = vpop.f32.mrb[174].mxu1  ;;  %v3175_v32 = vpop.f32.mrb[146].mxu0  ;;  %v3463_v29 = vld [vmem:[%s9971_s3 + $0x1a0] sm:$0xff]  ;;  %v3446_v28 = vld [vmem:[%s9971_s3 + $0x118] sm:$0xff] }
 0x281   : > { %10054 = vst [vmem:[#allocation6_spill] sm:$0xff] %v8779_v30  ;;  %v8791_v24 = vadd.f32 %v10056_v14, %v3022_v55  ;;  %v8794_v15 = vadd.f32 %v3175_v32, %v10058_v17  ;;  %3861 = vperm.xlu1 %6829, %v3483_v45   ;;  %3756 = vperm.xlu0 %6828, %v3462_v44   ;;  %v3177_v62 = vpop.f32.mrb[147].mxu0  ;;  %v3024_v13 = vpop.f32.mrb[175].mxu1  ;;  %v3447_v45 = vld [vmem:[%s9971_s3 + $0x120] sm:$0xff]  ;;  %v3484_v44 = vld [vmem:[%s9971_s3 + $0x248] sm:$0xff]  ;;  %v10059_v55 = vld [vmem:[#allocation9_spill] sm:$0xff] }
 0x282   : > { %v7168_v62 = vld [vmem:[%s9969_s1 + $0x56c] ss:$16 sps:$4 sm:$0x3f]   ;;  %v10060_v13 = vld [vmem:[#allocation10_spill] sm:$0xff]  ;;  %v3449_v30 = vld [vmem:[%s9971_s3 + $0x130] sm:$0xff] }
 0x283   : > { %10057 = vst [vmem:[#allocation39_spill] sm:$0xff] %v8791_v24  ;;  %3387 = vmatmul.mubr.bf16.gmra.mrb[252].mxu0 %v7162_v61  ;;  %v7163_v61 = vld [vmem:[%s9969_s1 + $0x548] ss:$16 sps:$4 sm:$0xff]  }
 0x284   : > { %6278 = vmatprep.mubr.msk.bf16.mxu0 %vm2504_vm3, %v7165_v23 }
 0x285   : > { %3761 = vperm.xlu1 %6829, %v3463_v29   ;;  %3676 = vperm.xlu0 %6828, %v3446_v28  }
 0x286   : > { %v3180_v14 = vpop.f32.mrb[148].mxu0 }
 0x287   : > { %v8810_v32 = vadd.f32 %v3180_v14, %v10059_v55  ;;  %v3182_v17 = vpop.f32.mrb[149].mxu0  ;;  %v3485_v14 = vld [vmem:[%s9971_s3 + $0x250] sm:$0xff]  ;;  %v3464_v55 = vld [vmem:[%s9971_s3 + $0x1a8] sm:$0xff] }
 0x288   : > { %v3183_v23 = vpop.f32.mrb[150].mxu0 }
 0x289   : > { %v8819_v29 = vadd.f32 %v3183_v23, %v10060_v13  ;;  %3681 = vperm.xlu1 %6829, %v3447_v45   ;;  %3866 = vperm.xlu0 %6828, %v3484_v44   ;;  %v3185_v28 = vpop.f32.mrb[151].mxu0  ;;  %v3465_v45 = vld [vmem:[%s9971_s3 + $0x1b0] sm:$0xff]  ;;  %v3448_v44 = vld [vmem:[%s9971_s3 + $0x128] sm:$0xff] }
 0x28a   : > { %v10061_v13 = vld [vmem:[#allocation11_spill] sm:$0xff] }
 0x28b   : > { %3395 = vmatmul.mubr.bf16.gmra.mrb[0].mxu0 %v7163_v61  ;;  %v4328_v17 = vpop.permute.xlu0 %4327 }
 0x28c   : > { %6753 = vmatpush3.bf16.msra.mxu1 %v4328_v17  ;;  %6279 = vmatprep.mubr.msk.bf16.mxu0 %vm2504_vm3, %v7168_v62  ;;  %v7166_v62 = vld [vmem:[%s9969_s1 + $0x568] ss:$16 sps:$4 sm:$0x3f]  }
 0x28d   : > { %3871 = vperm.xlu1 %6829, %v3485_v14   ;;  %3766 = vperm.xlu0 %6828, %v3464_v55   ;;  %v10062_v55 = vld [vmem:[#allocation12_spill] sm:$0xff] }
 0x28e   : > { %v3188_v23 = vpop.f32.mrb[152].mxu0  ;;  %6754 = vmatprep.subr.bf16.mxu1 %v10027_v56 }
 0x28f   : > { %v8836_v28 = vadd.f32 %v3188_v23, %v10061_v13  ;;  %v3190_v61 = vpop.f32.mrb[153].mxu0  ;;  %v3486_v23 = vld [vmem:[%s9971_s3 + $0x258] sm:$0xff] }
 0x290   : > { %v3191_v14 = vpop.f32.mrb[154].mxu0 }
 0x291   : > { %v8842_v17 = vadd.f32 %v3191_v14, %v10062_v55  ;;  %3771 = vperm.xlu1 %6829, %v3465_v45   ;;  %3686 = vperm.xlu0 %6828, %v3448_v44   ;;  %v3193_v24 = vpop.f32.mrb[155].mxu0  ;;  %v3487_v45 = vld [vmem:[%s9971_s3 + $0x260] sm:$0xff]  ;;  %v10063_v44 = vld [vmem:[#allocation13_spill] sm:$0xff] }
 0x292   : > { %v3466_v24 = vld [vmem:[%s9971_s3 + $0x1b8] sm:$0xff] }
 0x293   : > { %3403 = vmatmul.mubr.bf16.gmra.mrb[4].mxu0 %v7166_v62  ;;  %v4330_v13 = vpop.permute.xlu1 %4329 }
 0x294   : > { %6755 = vmatpush3.bf16.msra.mxu1 %v4330_v13 }
 0x295   : > { %3691 = vperm.xlu1 %6829, %v3449_v30   ;;  %3876 = vperm.xlu0 %6828, %v3486_v23   ;;  %v3467_v23 = vld [vmem:[%s9971_s3 + $0x1c0] sm:$0xff] }
 0x296   : > { %v3196_v61 = vpop.f32.mrb[156].mxu0  ;;  %6756 = vmatprep.subr.bf16.mxu1 %v10027_v56 }
 0x297   : > { %v8858_v14 = vadd.f32 %v3196_v61, %v10063_v44  ;;  %v3198_v55 = vpop.f32.mrb[157].mxu0 }
 0x298   : > { %v3199_v62 = vpop.f32.mrb[158].mxu0 }
 0x299   : > { %v8861_v13 = vadd.f32 %v3199_v62, %v10064_v10  ;;  %3881 = vperm.xlu1 %6829, %v3487_v45   ;;  %3776 = vperm.xlu0 %6828, %v3466_v24   ;;  %v3201_v30 = vpop.f32.mrb[159].mxu0  ;;  %v3451_v10 = vld [vmem:[%s9971_s3 + $0x140] sm:$0xff]  ;;  %v3488_v45 = vld [vmem:[%s9971_s3 + $0x268] sm:$0xff] }
 0x29a   : > { %v10065_v24 = vld [vmem:[#allocation15_spill] sm:$0xff]  ;;  %v10066_v30 = vld [vmem:[#allocation16_spill] sm:$0xff] }
 0x29b   : > { %v4332_v18 = vpop.permute.xlu0 %4331 }
 0x29c   : > { %6757 = vmatpush3.bf16.msra.mxu1 %v4332_v18 }
 0x29d   : > { %3781 = vperm.xlu1 %6829, %v3467_v23   ;;  %3696 = vperm.xlu0 %6828, %v3450_v57   ;;  %v3489_v23 = vld [vmem:[%s9971_s3 + $0x270] sm:$0xff] }
 0x29e   : > { %v3204_v61 = vpop.f32.mrb[160].mxu0  ;;  %6758 = vmatprep.subr.bf16.mxu1 %v10027_v56 }
 0x29f   : > { %v8877_v44 = vadd.f32 %v3204_v61, %v10065_v24  ;;  %v3206_v55 = vpop.f32.mrb[161].mxu0  ;;  %v3469_v24 = vld [vmem:[%s9971_s3 + $0x1d0] sm:$0xff] }
 0x2a0   : > { %v3207_v62 = vpop.f32.mrb[162].mxu0 }
 0x2a1   : > { %v8880_v18 = vadd.f32 %v3207_v62, %v10066_v30  ;;  %3701 = vperm.xlu1 %6829, %v3451_v10   ;;  %3886 = vperm.xlu0 %6828, %v3488_v45   ;;  %v3209_v57 = vpop.f32.mrb[163].mxu0  ;;  %v3452_v10 = vld [vmem:[%s9971_s3 + $0x148] sm:$0xff]  ;;  %v10067_v45 = vld [vmem:[#allocation17_spill] sm:$0xff] }
 0x2a2   : > { %v10068_v57 = vld [vmem:[#allocation18_spill] sm:$0xff] }
 0x2a3   : > { %v4334_v26 = vpop.permute.xlu1 %4333 }
 0x2a4   : > { %6759 = vmatpush3.bf16.msra.mxu1 %v4334_v26 }
 0x2a5   : > { %3891 = vperm.xlu1 %6829, %v3489_v23   ;;  %3786 = vperm.xlu0 %6828, %v3468_v12   ;;  %v3453_v23 = vld [vmem:[%s9971_s3 + $0x150] sm:$0xff] }
 0x2a6   : > { %v3212_v61 = vpop.f32.mrb[164].mxu0  ;;  %6760 = vmatprep.subr.bf16.mxu1 %v10027_v56 }
 0x2a7   : > { %v8896_v55 = vadd.f32 %v3212_v61, %v10067_v45  ;;  %v3214_v62 = vpop.f32.mrb[165].mxu0  ;;  %v7169_v61 = vld [vmem:[%s9973_s5] sm:$0xff]   ;;  %v3470_v45 = vld [vmem:[%s9971_s3 + $0x1d8] sm:$0xff] }
 0x2a8   : > { %v3215_v30 = vpop.f32.mrb[166].mxu0  ;;  %v10069_v62 = vld [vmem:[#allocation19_spill] sm:$0xff] }
 0x2a9   : > { %v8899_v26 = vadd.f32 %v3215_v30, %v10068_v57  ;;  %3791 = vperm.xlu1 %6829, %v3469_v24   ;;  %3706 = vperm.xlu0 %6828, %v3452_v10   ;;  %v3217_v12 = vpop.f32.mrb[167].mxu0  ;;  %v3491_v10 = vld [vmem:[%s9971_s3 + $0x280] sm:$0xff] }
 0x2ab   : > { %v4336_v53 = vpop.permute.xlu0 %4335 }
 0x2ac   : > { %6761 = vmatpush3.bf16.msra.mxu1 %v4336_v53  ;;  %v10071_v53 = vld [vmem:[#allocation20_spill] sm:$0xff] }
 0x2ad   : > { %3711 = vperm.xlu1 %6829, %v3453_v23   ;;  %3896 = vperm.xlu0 %6828, %v3490_v8  }
 0x2ae   : > { %v3220_v24 = vpop.f32.mrb[168].mxu0 }
 0x2af   : > { %v8917_v30 = vadd.f32 %v3220_v24, %v10069_v62  ;;  %v3222_v57 = vpop.f32.mrb[169].mxu0  ;;  %6763 = vmatmul.mubr.msk.bf16.vlgmr.msra.gmra.mrb[176].mxu1 %vm4342_vm5, %v7169_v61  ;;  %v3454_v24 = vld [vmem:[%s9971_s3 + $0x158] sm:$0xff]  ;;  %v7170_v61 = vld [vmem:[%s9973_s5 + $0x8] sm:$0xff]  }
 0x2b0   : > { %v3223_v12 = vpop.f32.mrb[170].mxu0  ;;  %6766 = vmatprep.mubr.msk.bf16.mxu1 %vm7317_vm4, %v10027_v56 }
 0x2b1   : > { %10070 = vst [vmem:[#allocation3_spill] sm:$0xff] %v8917_v30  ;;  %v8923_v8 = vadd.f32 %v3223_v12, %v10071_v53  ;;  %3901 = vperm.xlu1 %6829, %v3491_v10   ;;  %3796 = vperm.xlu0 %6828, %v3470_v45   ;;  %v3225_v23 = vpop.f32.mrb[171].mxu0  ;;  %v3455_v10 = vld [vmem:[%s9971_s3 + $0x160] sm:$0xff]  ;;  %v3492_v45 = vld [vmem:[%s9971_s3 + $0x288] sm:$0xff]  ;;  %v10073_v12 = vld [vmem:[#allocation21_spill] sm:$0xff] }
 0x2b3   : > { %10072 = vst [vmem:[#allocation42_spill] sm:$0xff] %v8923_v8  ;;  %v3493_v8 = vld [vmem:[%s9971_s3 + $0x290] sm:$0xff] }
 0x2b4   : > { %v3582_v62 = vpop.permute.xlu1 %3581 }
 0x2b5   : > { %3801 = vperm.xlu1 %6829, %v3471_v43   ;;  %3716 = vperm.xlu0 %6828, %v3454_v24   ;;  %v10075_v43 = vld [vmem:[#allocation22_spill] sm:$0xff] }
 0x2b6   : > { %v3228_v57 = vpop.f32.mrb[172].mxu0 }
 0x2b7   : > { %v8941_v53 = vadd.f32 %v3228_v57, %v10073_v12  ;;  %v3230_v23 = vpop.f32.mrb[173].mxu0  ;;  %6767 = vmatmul.mubr.msk.bf16.gmra.mrb[180].mxu1 %vm4342_vm5, %v7170_v61  ;;  %v3472_v57 = vld [vmem:[%s9971_s3 + $0x1e8] sm:$0xff]  ;;  %v3955_v61 = vadd.f32 %v3582_v62, %v8596_v4  ;;  %v7171_v12 = vld [vmem:[%s9973_s5 + $0x10] sm:$0xff]  }
 0x2b8   : > { %v3231_v5 = vpop.f32.mrb[174].mxu0  ;;  %v3592_v22 = vpop.permute.xlu1 %3591  ;;  %6770 = vmatprep.mubr.msk.bf16.mxu1 %vm7317_vm4, %v10027_v56 }
 0x2b9   : > { %10074 = vst [vmem:[#allocation5_spill] sm:$0xff] %v8941_v53  ;;  %v8947_v24 = vadd.f32 %v3231_v5, %v10075_v43  ;;  %3721 = vperm.xlu1 %6829, %v3455_v10   ;;  %3906 = vperm.xlu0 %6828, %v3492_v45   ;;  %v3233_v58 = vpop.f32.mrb[175].mxu0  ;;  %v3473_v45 = vld [vmem:[%s9971_s3 + $0x1f0] sm:$0xff]  ;;  %v3456_v43 = vld [vmem:[%s9971_s3 + $0x168] sm:$0xff]  ;;  %v4043_v4 = vmax.f32 %v3955_v61, 0.0 }
 0x2bb   : > { %10076 = vst [vmem:[#allocation37_spill] sm:$0xff] %v8947_v24  ;;  %v10077_v24 = vld [vmem:[#allocation23_spill] sm:$0xff] }
 0x2bc   : > { %v3602_v23 = vpop.permute.xlu1 %3601  ;;  %v3587_v5 = vpop.permute.xlu0 %3586 }
 0x2bd   : > { %v3956_v10 = vadd.f32 %v3587_v5, %v8608_v6  ;;  %3911 = vperm.xlu1 %6829, %v3493_v8   ;;  %3806 = vperm.xlu0 %6828, %v3472_v57   ;;  %v3957_v6 = vadd.f32 %v3592_v22, %v8627_v36  ;;  %v10078_v5 = vld [vmem:[#allocation24_spill] sm:$0xff]  ;;  %v3494_v22 = vld [vmem:[%s9971_s3 + $0x298] sm:$0xff] }
 0x2be   : > { %v3236_v58 = vpop.f32.mrb[176].mxu0  ;;  %v7172_v36 = vld [vmem:[%s9973_s5 + $0x18] sm:$0xff]  }
 0x2bf   : > { %v4044_v62 = vmax.f32 %v3956_v10, 0.0  ;;  %v8967_v53 = vadd.f32 %v3236_v58, %v10077_v24  ;;  %v3238_v60 = vpop.f32.mrb[177].mxu0  ;;  %6771 = vmatmul.mubr.msk.bf16.gmra.mrb[184].mxu1 %vm4342_vm5, %v7171_v12  ;;  %v4045_v12 = vmax.f32 %v3957_v6, 0.0  ;;  %v3959_v58 = vadd.f32 %v3602_v23, %v8658_v52 }
 0x2c0   : > { %v3239_v8 = vpop.f32.mrb[178].mxu0  ;;  %v3612_v57 = vpop.permute.xlu1 %3611  ;;  %6774 = vmatprep.mubr.msk.bf16.mxu1 %vm7317_vm4, %v10027_v56  ;;  %v3457_v60 = vld [vmem:[%s9971_s3 + $0x170] sm:$0xff] }
 0x2c1   : > { %v8974_v30 = vadd.f32 %v3239_v8, %v10078_v5  ;;  %v3597_v21 = vpop.permute.xlu0 %3596  ;;  %3811 = vperm.xlu1 %6829, %v3473_v45   ;;  %3726 = vperm.xlu0 %6828, %v3456_v43   ;;  %v4123_v61 = vpack.c.bf16 %v4044_v62, %v4043_v4  ;;  %v3241_v10 = vpop.f32.mrb[179].mxu0  ;;  %v3495_v8 = vld [vmem:[%s9971_s3 + $0x2a0] sm:$0xff]  ;;  %v10079_v5 = vld [vmem:[#allocation25_spill] sm:$0xff]  ;;  %v4047_v52 = vmax.f32 %v3959_v58, 0.0  ;;  %v3961_v23 = vadd.f32 %v3612_v57, %v8689_v20  ;;  %v3497_v20 = vld [vmem:[%s9971_s3 + $0x2b0] sm:$0xff] }
 0x2c2   : > { %v3958_v24 = vadd.f32 %v3597_v21, %v8639_v46  ;;  %v3458_v57 = vld [vmem:[%s9971_s3 + $0x178] sm:$0xff] }
 0x2c3   : > { %6474 = vmatprep.subr.bf16.mxu1 %v4123_v61 }
 0x2c4   : > { %v4046_v45 = vmax.f32 %v3958_v24, 0.0  ;;  %v3622_v43 = vpop.permute.xlu1 %3621  ;;  %6475 = vmatpush3.bf16.msra.mxu1 %v8415_v48  ;;  %v3474_v48 = vld [vmem:[%s9971_s3 + $0x1f8] sm:$0xff] }
 0x2c5   : > { %v3607_v21 = vpop.permute.xlu0 %3606  ;;  %3731 = vperm.xlu1 %6829, %v3457_v60   ;;  %3916 = vperm.xlu0 %6828, %v3494_v22   ;;  %v10080_v60 = vld [vmem:[#allocation26_spill] sm:$0xff] }
 0x2c6   : > { %v3960_v46 = vadd.f32 %v3607_v21, %v8670_v59  ;;  %v3244_v4 = vpop.f32.mrb[180].mxu0  ;;  %v4124_v62 = vpack.c.bf16 %v4046_v45, %v4045_v12  ;;  %v7173_v21 = vld [vmem:[%s9973_s5 + $0x20] sm:$0xff]  }
 0x2c7   : > { %v8993_v61 = vadd.f32 %v3244_v4, %v10079_v5  ;;  %v3246_v6 = vpop.f32.mrb[181].mxu0  ;;  %6775 = vmatmul.mubr.msk.bf16.gmra.mrb[188].mxu1 %vm4342_vm5, %v7172_v36 }
 0x2c8   : > { %v4048_v59 = vmax.f32 %v3960_v46, 0.0  ;;  %6476 = vmatprep.subr.bf16.mxu1 %v4124_v62  ;;  %v3247_v10 = vpop.f32.mrb[182].mxu0  ;;  %v3632_v24 = vpop.permute.xlu1 %3631  ;;  %6778 = vmatprep.mubr.msk.bf16.mxu1 %vm7317_vm4, %v10027_v56  ;;  %v3963_v46 = vadd.f32 %v3622_v43, %v8720_v50 }
 0x2c9   : > { %v9003_v22 = vadd.f32 %v3247_v10, %v10080_v60  ;;  %6477 = vmatpush3.bf16.msra.mxu1 %v8434_v47  ;;  %v3617_v36 = vpop.permute.xlu0 %3616  ;;  %3921 = vperm.xlu1 %6829, %v3495_v8   ;;  %v3249_v12 = vpop.f32.mrb[183].mxu0  ;;  %v4049_v47 = vmax.f32 %v3961_v23, 0.0 }
 0x2ca   : > { %v3962_v45 = vadd.f32 %v3617_v36, %v8701_v51  ;;  %3816 = vperm.xlu0 %6828, %v3474_v48   ;;  %v4125_v58 = vpack.c.bf16 %v4048_v59, %v4047_v52  ;;  %v5337_v48 = vld [vmem:[%s9974_s6] sm:$0xff]  ;;  %v10081_v52 = vld [vmem:[#allocation27_spill] sm:$0xff]  ;;  %v4051_v43 = vmax.f32 %v3963_v46, 0.0  ;;  %v10082_v36 = vld [vmem:[#allocation28_spill] sm:$0xff] }
 0x2cc   : > { %v4050_v4 = vmax.f32 %v3962_v45, 0.0  ;;  %6478 = vmatprep.subr.bf16.mxu1 %v4125_v58  ;;  %v3552_v51 = vpop.permute.xlu1 %3551 }
 0x2cd   : > { %6479 = vmatpush3.bf16.msra.mxu1 %v8453_v25  ;;  %v3627_v62 = vpop.permute.xlu0 %3626  ;;  %3931 = vperm.xlu1 %6829, %v3497_v20   ;;  %v3496_v25 = vld [vmem:[%s9971_s3 + $0x2a8] sm:$0xff] }
 0x2ce   : > { %v3964_v8 = vadd.f32 %v3627_v62, %v8732_v42  ;;  %3736 = vperm.xlu0 %6828, %v3458_v57   ;;  %v3252_v5 = vpop.f32.mrb[184].mxu0  ;;  %v4126_v6 = vpack.c.bf16 %v4050_v4, %v4049_v47  ;;  %v3965_v42 = vadd.f32 %v3632_v24, %v8751_v9  ;;  %v5339_v9 = vld [vmem:[%s9974_s6 + $0x10] sm:$0xff]  ;;  %v3498_v24 = vld [vmem:[%s9971_s3 + $0x2b8] sm:$0xf]  ;;  %v3949_v47 = vadd.f32 %v3552_v51, %v8499_v34  ;;  %v7222_v4 = vld [vmem:[%s9972_s4 + $0xc] ss:$24 sps:$4 sm:$0xff]  }
 0x2cf   : > { %v9023_v23 = vadd.f32 %v3252_v5, %v10081_v52  ;;  %v3254_v50 = vpop.f32.mrb[185].mxu0  ;;  %6779 = vmatmul.mubr.msk.bf16.gmra.mrb[192].mxu1 %vm4342_vm5, %v7173_v21  ;;  %v7174_v21 = vld [vmem:[%s9973_s5 + $0x28] sm:$0xff]   ;;  %v5341_v34 = vld [vmem:[%s9974_s6 + $0x20] sm:$0xff]  ;;  %5097 = vmatprep.mubr.bf16.mxu0 %v7222_v4  ;;  %v10083_v51 = vld [vmem:[#allocation29_spill] sm:$0xff] }
 0x2d0   : > { %v4052_v59 = vmax.f32 %v3964_v8, 0.0  ;;  %6480 = vmatprep.subr.bf16.mxu1 %v4126_v6  ;;  %v3255_v10 = vpop.f32.mrb[186].mxu0  ;;  %v3642_v60 = vpop.permute.xlu1 %3641  ;;  %6782 = vmatprep.mubr.msk.bf16.mxu1 %vm7317_vm4, %v10027_v56  ;;  %v4037_v50 = vmax.f32 %v3949_v47, 0.0 }
 0x2d1   : > { %v9033_v12 = vadd.f32 %v3255_v10, %v10082_v36  ;;  %6481 = vmatpush3.bf16.msra.mxu1 %v8474_v39  ;;  %v3637_v45 = vpop.permute.xlu0 %3636  ;;  %5364 = vperm.xlu1 %6829, %v5337_v48   ;;  %v3257_v58 = vpop.f32.mrb[187].mxu0  ;;  %v4053_v39 = vmax.f32 %v3965_v42, 0.0 }
 0x2d2   : > { %v3966_v20 = vadd.f32 %v3637_v45, %v8763_v35  ;;  %3926 = vperm.xlu0 %6828, %v3496_v25   ;;  %v4127_v57 = vpack.c.bf16 %v4052_v59, %v4051_v43  ;;  %v10084_v59 = vld [vmem:[#allocation30_spill] sm:$0xff] }
 0x2d4   : > { %v4054_v46 = vmax.f32 %v3966_v20, 0.0  ;;  %6482 = vmatprep.subr.bf16.mxu1 %v4127_v57  ;;  %v3562_v35 = vpop.permute.xlu1 %3561  ;;  %v7175_v57 = vld [vmem:[%s9973_s5 + $0x30] sm:$0xff]  }
 0x2d5   : > { %6483 = vmatpush3.bf16.msra.mxu1 %v8501_v2  ;;  %v3557_v62 = vpop.permute.xlu0 %3556  ;;  %5374 = vperm.xlu1 %6829, %v5339_v9   ;;  %v5338_v2 = vld [vmem:[%s9974_s6 + $0x8] sm:$0xff] }
 0x2d6   : > { %v3950_v8 = vadd.f32 %v3557_v62, %v8513_v37  ;;  %3936 = vperm.xlu0 %6828, %v3498_v24   ;;  %v3260_v5 = vpop.f32.mrb[188].mxu0  ;;  %v4128_v6 = vpack.c.bf16 %v4054_v46, %v4053_v39  ;;  %v3967_v37 = vadd.f32 %v3642_v60, %v8782_v1  ;;  %v5343_v1 = vld [vmem:[%s9974_s6 + $0x30] sm:$0xff]  ;;  %v5340_v60 = vld [vmem:[%s9974_s6 + $0x18] sm:$0xff]  ;;  %v3951_v24 = vadd.f32 %v3562_v35, %v8534_v11  ;;  %v5345_v62 = vld [vmem:[%s9974_s6 + $0x40] sm:$0xff] }
 0x2d7   : > { %v9056_v48 = vadd.f32 %v3260_v5, %v10083_v51  ;;  %v3262_v52 = vpop.f32.mrb[189].mxu0  ;;  %6783 = vmatmul.mubr.msk.bf16.gmra.mrb[196].mxu1 %vm4342_vm5, %v7174_v21  ;;  %v5342_v11 = vld [vmem:[%s9974_s6 + $0x28] sm:$0xff] }
 0x2d8   : > { %v4038_v25 = vmax.f32 %v3950_v8, 0.0  ;;  %6484 = vmatprep.subr.bf16.mxu1 %v4128_v6  ;;  %v3263_v43 = vpop.f32.mrb[190].mxu0  ;;  %v3652_v42 = vpop.permute.xlu1 %3651  ;;  %6786 = vmatprep.mubr.msk.bf16.mxu1 %vm7317_vm4, %v10027_v56  ;;  %v4055_v9 = vmax.f32 %v3967_v37, 0.0  ;;  %v10085_v8 = vld [vmem:[#allocation31_spill] sm:$0xff]  ;;  %v4039_v35 = vmax.f32 %v3951_v24, 0.0  ;;  %v5349_v24 = vld [vmem:[%s9974_s6 + $0x60] sm:$0xff] }
 0x2d9   : > { %v9066_v10 = vadd.f32 %v3263_v43, %v10084_v59  ;;  %v3647_v36 = vpop.permute.xlu0 %3646  ;;  %5384 = vperm.xlu1 %6829, %v5341_v34   ;;  %v3265_v45 = vpop.f32.mrb[191].mxu0 }
 0x2da   : > { %v4120_v58 = vpack.c.bf16 %v4038_v25, %v4037_v50  ;;  %v3968_v20 = vadd.f32 %v3647_v36, %v8794_v15  ;;  %5369 = vperm.xlu0 %6828, %v5338_v2   ;;  %v10086_v2 = vld [vmem:[#allocation32_spill] sm:$0xff]  ;;  %v7176_v36 = vld [vmem:[%s9973_s5 + $0x38] sm:$0xff]  }
 0x2dc   : > { %v4056_v21 = vmax.f32 %v3968_v20, 0.0  ;;  %6485 = vmatpush3.bf16.msra.mxu1 %v4120_v58  ;;  %v3572_v39 = vpop.permute.xlu1 %3571 }
 0x2dd   : > { %v3567_v15 = vpop.permute.xlu0 %3566  ;;  %5394 = vperm.xlu1 %6829, %v5343_v1   ;;  %v3953_v58 = vadd.f32 %v3572_v39, %v8565_v0  ;;  %v5346_v0 = vld [vmem:[%s9974_s6 + $0x48] sm:$0xff] }
 0x2de   : > { %v3952_v47 = vadd.f32 %v3567_v15, %v8546_v31  ;;  %5379 = vperm.xlu0 %6828, %v5340_v60   ;;  %v3268_v46 = vpop.f32.mrb[192].mxu0  ;;  %v4129_v4 = vpack.c.bf16 %v4056_v21, %v4055_v9  ;;  %v3969_v31 = vadd.f32 %v3652_v42, %v8810_v32  ;;  %v5347_v32 = vld [vmem:[%s9974_s6 + $0x50] sm:$0xff]  ;;  %v5344_v42 = vld [vmem:[%s9974_s6 + $0x38] sm:$0xff]  ;;  %v10087_v21 = vld [vmem:[#allocation34_spill] sm:$0xff] }
 0x2df   : > { %v9084_v5 = vadd.f32 %v3268_v46, %v10085_v8  ;;  %v3270_v6 = vpop.f32.mrb[193].mxu0  ;;  %6787 = vmatmul.mubr.msk.bf16.gmra.mrb[200].mxu1 %vm4342_vm5, %v7175_v57  ;;  %v4041_v39 = vmax.f32 %v3953_v58, 0.0 }
 0x2e0   : > { %v4040_v34 = vmax.f32 %v3952_v47, 0.0  ;;  %6486 = vmatprep.subr.bf16.mxu1 %v4129_v4  ;;  %v3271_v51 = vpop.f32.mrb[194].mxu0  ;;  %v9091_v52 = vpop.permute.xlu1 %3821  ;;  %6790 = vmatprep.mubr.msk.bf16.mxu1 %vm7317_vm4, %v10027_v56  ;;  %v4057_v45 = vmax.f32 %v3969_v31, 0.0  ;;  %v5351_v31 = vld [vmem:[%s9974_s6 + $0x70] sm:$0xff] }
 0x2e1   : > { %v9096_v50 = vadd.f32 %v3271_v51, %v10086_v2  ;;  %v3657_v37 = vpop.permute.xlu0 %3656  ;;  %5404 = vperm.xlu1 %6829, %v5345_v62   ;;  %v3273_v25 = vpop.f32.mrb[195].mxu0  ;;  %v10088_v62 = vld [vmem:[#allocation36_spill] sm:$0xff]  ;;  %v7177_v51 = vld [vmem:[%s9973_s5 + $0x40] sm:$0xff]  }
 0x2e2   : > { %v4121_v43 = vpack.c.bf16 %v4040_v34, %v4039_v35  ;;  %v3970_v59 = vadd.f32 %v3657_v37, %v8819_v29  ;;  %5389 = vperm.xlu0 %6828, %v5342_v11   ;;  %v5348_v34 = vld [vmem:[%s9974_s6 + $0x58] sm:$0xff]  ;;  %v10089_v25 = vmov 0  }
 0x2e4   : > { %v4058_v20 = vmax.f32 %v3970_v59, 0.0  ;;  %6487 = vmatpush3.bf16.msra.mxu1 %v4121_v43  ;;  %v9109_v1 = vpop.permute.xlu1 %3831  ;;  %v5353_v59 = vld [vmem:[%s9974_s6 + $0x80] sm:$0xff] }
 0x2e5   : > { %v3577_v29 = vpop.permute.xlu0 %3576  ;;  %5414 = vperm.xlu1 %6829, %v5347_v32   ;;  %v10090_v32 = vld [vmem:[#allocation38_spill] sm:$0xff] }
 0x2e6   : > { %v3954_v60 = vadd.f32 %v3577_v29, %v8577_v7  ;;  %5399 = vperm.xlu0 %6828, %v5344_v42   ;;  %v3276_v57 = vpop.f32.mrb[196].mxu0  ;;  %v4130_v9 = vpack.c.bf16 %v4058_v20, %v4057_v45  ;;  %v5350_v45 = vld [vmem:[%s9974_s6 + $0x68] sm:$0xff]  ;;  %v10091_v29 = vld [vmem:[#allocation41_spill] sm:$0xff] }
 0x2e7   : > { %v9116_v15 = vadd.f32 %v3276_v57, %v10087_v21  ;;  %v3278_v47 = vpop.f32.mrb[197].mxu0  ;;  %6791 = vmatmul.mubr.msk.bf16.gmra.mrb[204].mxu1 %vm4342_vm5, %v7176_v36  ;;  %v5352_v21 = vld [vmem:[%s9974_s6 + $0x78] sm:$0xff] }
 0x2e8   : > { %v4042_v46 = vmax.f32 %v3954_v60, 0.0  ;;  %6488 = vmatprep.subr.bf16.mxu1 %v4130_v9  ;;  %v3279_v7 = vpop.f32.mrb[198].mxu0  ;;  %v9122_v4 = vpop.permute.xlu1 %3841  ;;  %6794 = vmatprep.mubr.msk.bf16.mxu1 %vm7317_vm4, %v10027_v56  ;;  %v7178_v47 = vld [vmem:[%s9973_s5 + $0x48] sm:$0xff]  }
 0x2e9   : > { %v9127_v8 = vadd.f32 %v3279_v7, %v10088_v62  ;;  %v9129_v6 = vpop.permute.xlu0 %3826  ;;  %5424 = vperm.xlu1 %6829, %v5349_v24   ;;  %v3281_v11 = vpop.f32.mrb[199].mxu0  ;;  %v5355_v24 = vld [vmem:[%s9974_s6 + $0x90] sm:$0xff] }
 0x2ea   : > { %v4122_v35 = vpack.c.bf16 %v4042_v46, %v4041_v39  ;;  %5409 = vperm.xlu0 %6828, %v5346_v0   ;;  %v10092_v11 = vld [vmem:[#allocation43_spill] sm:$0xff] }
 0x2ec   : > { %6489 = vmatpush3.bf16.msra.mxu1 %v4122_v35  ;;  %v3742_v2 = vpop.permute.xlu1 %3741 }
 0x2ed   : > { %v9140_v37 = vpop.permute.xlu0 %3836  ;;  %5434 = vperm.xlu1 %6829, %v5351_v31   ;;  %5201 = vmatprep.subr.bf16.mxu1 %v10089_v25  ;;  %v3987_v0 = vadd.f32 %v3742_v2, %v9023_v23 }
 0x2ee   : > { %5419 = vperm.xlu0 %6828, %v5348_v34   ;;  %v3284_v43 = vpop.f32.mrb[200].mxu0  ;;  %v5354_v34 = vld [vmem:[%s9974_s6 + $0x88] sm:$0xff] }
 0x2ef   : > { %v9147_v42 = vadd.f32 %v3284_v43, %v10090_v32  ;;  %v3286_v36 = vpop.f32.mrb[201].mxu0  ;;  %6795 = vmatmul.mubr.msk.bf16.gmra.mrb[208].mxu1 %vm4342_vm5, %v7177_v51  ;;  %v4075_v51 = vmax.f32 %v3987_v0, 0.0 }
 0x2f0   : > { %v3287_v58 = vpop.f32.mrb[202].mxu0  ;;  %v3662_v20 = vpop.permute.xlu1 %3661  ;;  %6798 = vmatprep.mubr.msk.bf16.mxu1 %vm7317_vm4, %v10027_v56 }
 0x2f1   : > { %v9156_v60 = vadd.f32 %v3287_v58, %v10091_v29  ;;  %v9158_v57 = vpop.permute.xlu0 %3846  ;;  %5444 = vperm.xlu1 %6829, %v5353_v59   ;;  %v3289_v9 = vpop.f32.mrb[203].mxu0  ;;  %v3971_v23 = vadd.f32 %v3662_v20, %v8836_v28  ;;  %v5356_v29 = vld [vmem:[%s9974_s6 + $0x98] sm:$0xff]  ;;  %v7179_v28 = vld [vmem:[%s9973_s5 + $0x50] sm:$0xff]  }
 0x2f2   : > { %5429 = vperm.xlu0 %6828, %v5350_v45  }
 0x2f3   : > { %v4059_v20 = vmax.f32 %v3971_v23, 0.0 }
 0x2f4   : > { %v9170_v39 = vpop.permute.xlu1 %3851 }
 0x2f5   : > { %v3747_v46 = vpop.permute.xlu0 %3746  ;;  %5454 = vperm.xlu1 %6829, %v5355_v24  }
 0x2f6   : > { %v3988_v7 = vadd.f32 %v3747_v46, %v9033_v12  ;;  %5439 = vperm.xlu0 %6828, %v5352_v21   ;;  %v3292_v62 = vpop.f32.mrb[204].mxu0 }
 0x2f7   : > { %v9174_v35 = vadd.f32 %v3292_v62, %v10092_v11  ;;  %v3294_v31 = vpop.f32.mrb[205].mxu0  ;;  %6799 = vmatmul.mubr.msk.bf16.gmra.mrb[212].mxu1 %vm4342_vm5, %v7178_v47 }
 0x2f8   : > { %v4076_v2 = vmax.f32 %v3988_v7, 0.0  ;;  %v3295_v43 = vpop.f32.mrb[206].mxu0  ;;  %v3752_v59 = vpop.permute.xlu1 %3751  ;;  %6802 = vmatprep.mubr.msk.bf16.mxu1 %vm7317_vm4, %v10027_v56 }
 0x2f9   : > { %v9184_v12 = vadd.f32 %v3295_v43, %v8407_v38  ;;  %v3667_v32 = vpop.permute.xlu0 %3666  ;;  %v3297_v36 = vpop.f32.mrb[207].mxu0  ;;  %v3989_v46 = vadd.f32 %v3752_v59, %v9056_v48 }
 0x2fa   : > { %v4139_v45 = vpack.c.bf16 %v4076_v2, %v4075_v51  ;;  %v3972_v58 = vadd.f32 %v3667_v32, %v8842_v17  ;;  %5449 = vperm.xlu0 %6828, %v5354_v34   ;;  %v7180_v51 = vld [vmem:[%s9973_s5 + $0x58] sm:$0xff]  }
 0x2fb   : > { %v4077_v23 = vmax.f32 %v3989_v46, 0.0 }
 0x2fc   : > { %v4060_v9 = vmax.f32 %v3972_v58, 0.0  ;;  %6568 = vmatprep.subr.bf16.mxu0 %v4139_v45  ;;  %v3672_v24 = vpop.permute.xlu1 %3671 }
 0x2fd   : > { %v9193_v38 = vpop.permute.xlu0 %3856  ;;  %v3973_v48 = vadd.f32 %v3672_v24, %v8858_v14 }
 0x2fe   : > { %v4131_v21 = vpack.c.bf16 %v4060_v9, %v4059_v20  ;;  %5459 = vperm.xlu0 %6828, %v5356_v29   ;;  %v3300_v47 = vpop.f32.mrb[208].mxu0 }
 0x2ff   : > { %v9196_v17 = vadd.f32 %v3300_v47, %v8412_v49  ;;  %v3302_v0 = vpop.f32.mrb[209].mxu0  ;;  %6803 = vmatmul.mubr.msk.bf16.gmra.mrb[216].mxu1 %vm4342_vm5, %v7179_v28 }
 0x300   : > { %6569 = vmatpush3.bf16.msra.mxu0 %v4131_v21  ;;  %v3303_v7 = vpop.f32.mrb[210].mxu0  ;;  %v9200_v62 = vpop.permute.xlu1 %3861  ;;  %6806 = vmatprep.mubr.msk.bf16.mxu1 %vm7317_vm4, %v10027_v56 }
 0x301   : > { %v9205_v11 = vadd.f32 %v3303_v7, %v8424_v3  ;;  %v3757_v31 = vpop.permute.xlu0 %3756  ;;  %v3305_v34 = vpop.f32.mrb[211].mxu0 }
 0x302   : > { %v3990_v49 = vadd.f32 %v3757_v31, %v9066_v10  ;;  %v4061_v10 = vmax.f32 %v3973_v48, 0.0 }
 0x304   : > { %v4078_v2 = vmax.f32 %v3990_v49, 0.0  ;;  %v3762_v43 = vpop.permute.xlu1 %3761 }
 0x305   : > { %v3677_v59 = vpop.permute.xlu0 %3676  ;;  %v3991_v21 = vadd.f32 %v3762_v43, %v9084_v5 }
 0x306   : > { %v4140_v32 = vpack.c.bf16 %v4078_v2, %v4077_v23  ;;  %v3974_v36 = vadd.f32 %v3677_v59, %v8861_v13  ;;  %v3308_v45 = vpop.f32.mrb[212].mxu0 }
 0x307   : > { %v9214_v3 = vadd.f32 %v3308_v45, %v8431_v19  ;;  %v3310_v58 = vpop.f32.mrb[213].mxu0  ;;  %6807 = vmatmul.mubr.msk.bf16.gmra.mrb[220].mxu1 %vm4342_vm5, %v7180_v51  ;;  %v7181_v19 = vld [vmem:[%s9973_s5 + $0x60] ss:$0 sps:$4 sm:$0xff]   ;;  %v4079_v34 = vmax.f32 %v3991_v21, 0.0 }
 0x308   : > { %v4062_v29 = vmax.f32 %v3974_v36, 0.0  ;;  %6570 = vmatprep.subr.bf16.mxu0 %v4140_v32  ;;  %v3311_v28 = vpop.f32.mrb[214].mxu0  ;;  %v3682_v20 = vpop.permute.xlu1 %3681  ;;  %6810 = vmatprep.mubr.msk.bf16.mxu1 %vm7317_vm4, %v10027_v56  ;;  %v7184_v56 = vld [vmem:[%s9972_s4 + $0x4] ss:$24 sps:$4 sm:$0xff]   ;;  %v7182_v36 = vld [vmem:[%s9972_s4] ss:$24 sps:$4 sm:$0xff]  }
 0x309   : > { %v9220_v14 = vadd.f32 %v3311_v28, %v8443_v54  ;;  %v9222_v9 = vpop.permute.xlu0 %3866  ;;  %v3313_v13 = vpop.f32.mrb[215].mxu0  ;;  %v3975_v49 = vadd.f32 %v3682_v20, %v8877_v44 }
 0x30a   : > { %v4132_v24 = vpack.c.bf16 %v4062_v29, %v4061_v10 }
 0x30b   : > { %v4063_v44 = vmax.f32 %v3975_v49, 0.0 }
 0x30c   : > { %6571 = vmatpush3.bf16.msra.mxu0 %v4132_v24  ;;  %v9228_v47 = vpop.permute.xlu1 %3871 }
 0x30d   : > { %v3767_v0 = vpop.permute.xlu0 %3766 }
 0x30e   : > { %v3992_v54 = vadd.f32 %v3767_v0, %v9096_v50  ;;  %v3316_v46 = vpop.f32.mrb[216].mxu0 }
 0x30f   : > { %v3317_v7 = vadd.f32 %v3316_v46, %v8450_v27  ;;  %v3318_v31 = vpop.f32.mrb[217].mxu0  ;;  %6811 = vmatmul.mubr.msk.bf16.gmra.mrb[224].mxu1 %vm4342_vm5, %v7181_v19 }
 0x310   : > { %v4080_v5 = vmax.f32 %v3992_v54, 0.0  ;;  %v3319_v51 = vpop.f32.mrb[218].mxu0  ;;  %v3772_v23 = vpop.permute.xlu1 %3771  ;;  %4961 = vmatprep.mubr.bf16.mxu1 %v7184_v56 }
 0x311   : > { %v4003_v48 = vadd.f32 %v9091_v52, %v3317_v7  ;;  %v3320_v2 = vadd.f32 %v3319_v51, %v8462_v40  ;;  %v3687_v43 = vpop.permute.xlu0 %3686  ;;  %v3321_v59 = vpop.f32.mrb[219].mxu0  ;;  %v7185_v52 = vld [vmem:[%s9972_s4 + $0x34] ss:$24 sps:$4 sm:$0xff]   ;;  %v3993_v24 = vadd.f32 %v3772_v23, %v9116_v15  ;;  %v7187_v15 = vld [vmem:[%s9972_s4 + $0x30] ss:$24 sps:$4 sm:$0xff]  }
 0x312   : > { %v4141_v50 = vpack.c.bf16 %v4080_v5, %v4079_v34  ;;  %v3976_v32 = vadd.f32 %v3687_v43, %v8880_v18 }
 0x313   : > { %v4004_v27 = vadd.f32 %v9129_v6, %v3320_v2  ;;  %v4091_v40 = vmax.f32 %v4003_v48, 0.0  ;;  %v4081_v31 = vmax.f32 %v3993_v24, 0.0 }
 0x314   : > { %v4064_v45 = vmax.f32 %v3976_v32, 0.0  ;;  %6572 = vmatprep.subr.bf16.mxu0 %v4141_v50  ;;  %v3692_v58 = vpop.permute.xlu1 %3691 }
 0x315   : > { %v4092_v10 = vmax.f32 %v4004_v27, 0.0  ;;  %v9247_v29 = vpop.permute.xlu0 %3876  ;;  %v3977_v34 = vadd.f32 %v3692_v58, %v8896_v55 }
 0x316   : > { %v4133_v28 = vpack.c.bf16 %v4064_v45, %v4063_v44  ;;  %v3324_v18 = vpop.f32.mrb[220].mxu0 }
 0x317   : > { %v4147_v20 = vpack.c.bf16 %v4092_v10, %v4091_v40  ;;  %v3325_v6 = vadd.f32 %v3324_v18, %v8471_v41  ;;  %v3326_v13 = vpop.f32.mrb[221].mxu0  ;;  %4962 = vmatmul.mubr.bf16.vlgmr.msra.gmra.mrb[228].mxu1 %v7182_v36  ;;  %v4065_v50 = vmax.f32 %v3977_v34, 0.0 }
 0x318   : > { %6573 = vmatpush3.bf16.msra.mxu0 %v4133_v28  ;;  %v3327_v19 = vpop.f32.mrb[222].mxu0  ;;  %v9251_v21 = vpop.permute.xlu1 %3881  ;;  %4969 = vmatprep.mubr.bf16.mxu1 %v7185_v52  ;;  %v7190_v52 = vld [vmem:[%s9972_s4 + $0x60] ss:$24 sps:$4 sm:$0xff]   ;;  %v10093_v13 = vld [vmem:[#allocation44_spill] sm:$0xff] }
 0x319   : > { %v4005_v56 = vadd.f32 %v9109_v1, %v3325_v6  ;;  %v3328_v0 = vadd.f32 %v3327_v19, %v8483_v63  ;;  %v3777_v54 = vpop.permute.xlu0 %3776  ;;  %5202 = vmatpush1.bf16.msra.mxu1 %v4147_v20  ;;  %v3329_v46 = vpop.f32.mrb[223].mxu0  ;;  %v7188_v63 = vld [vmem:[%s9972_s4 + $0x64] ss:$24 sps:$4 sm:$0xff]  }
 0x31a   : > { %v3994_v7 = vadd.f32 %v3777_v54, %v9127_v8  ;;  %5203 = vmatprep.subr.bf16.mxu1 %v10089_v25 }
 0x31b   : > { %v4006_v41 = vadd.f32 %v9140_v37, %v3328_v0  ;;  %v4093_v5 = vmax.f32 %v4005_v56, 0.0 }
 0x31c   : > { %v4082_v49 = vmax.f32 %v3994_v7, 0.0  ;;  %v3782_v1 = vpop.permute.xlu1 %3781 }
 0x31d   : > { %v4094_v51 = vmax.f32 %v4006_v41, 0.0  ;;  %v3697_v8 = vpop.permute.xlu0 %3696  ;;  %v3995_v40 = vadd.f32 %v3782_v1, %v9147_v42  ;;  %v10094_v42 = vld [vmem:[#allocation3_spill] sm:$0xff]  ;;  %v10096_v1 = vld [vmem:[#allocation42_spill] sm:$0xff] }
 0x31e   : > { %v4142_v23 = vpack.c.bf16 %v4082_v49, %v4081_v31  ;;  %v3978_v48 = vadd.f32 %v3697_v8, %v8899_v26  ;;  %v3332_v37 = vpop.f32.mrb[224].mxu0 }
 0x31f   : > { %v4148_v2 = vpack.c.bf16 %v4094_v51, %v4093_v5  ;;  %v3333_v43 = vadd.f32 %v3332_v37, %v8496_v16  ;;  %v3334_v59 = vpop.f32.mrb[225].mxu0  ;;  %4970 = vmatmul.mubr.bf16.gmra.mrb[232].mxu1 %v7187_v15  ;;  %v4083_v56 = vmax.f32 %v3995_v40, 0.0  ;;  %v10095_v15 = vld [vmem:[#allocation45_spill] sm:$0xff]  ;;  %v7193_v51 = vld [vmem:[%s9972_s4 + $0x90] ss:$24 sps:$4 sm:$0xff]  }
 0x320   : > { %v4066_v55 = vmax.f32 %v3978_v48, 0.0  ;;  %6574 = vmatprep.subr.bf16.mxu0 %v4142_v23  ;;  %v3335_v32 = vpop.f32.mrb[226].mxu0  ;;  %v3702_v27 = vpop.permute.xlu1 %3701  ;;  %4977 = vmatprep.mubr.bf16.mxu1 %v7188_v63  ;;  %v7194_v48 = vld [vmem:[%s9972_s4 + $0xc4] ss:$24 sps:$4 sm:$0xff]  }
 0x321   : > { %v4007_v36 = vadd.f32 %v9122_v4, %v3333_v43  ;;  %v3336_v44 = vadd.f32 %v3335_v32, %v8510_v33  ;;  %v9269_v45 = vpop.permute.xlu0 %3886  ;;  %5204 = vmatpush1.bf16.msra.mxu1 %v4148_v2  ;;  %v3337_v26 = vpop.f32.mrb[227].mxu0  ;;  %v7191_v33 = vld [vmem:[%s9972_s4 + $0x94] ss:$24 sps:$4 sm:$0xff]   ;;  %v3979_v0 = vadd.f32 %v3702_v27, %v10094_v42  ;;  %v10100_v42 = vld [vmem:[#allocation37_spill] sm:$0xff] }
 0x322   : > { %v4134_v58 = vpack.c.bf16 %v4066_v55, %v4065_v50  ;;  %5205 = vmatprep.subr.bf16.mxu1 %v10089_v25 }
 0x323   : > { %v4008_v16 = vadd.f32 %v9158_v57, %v3336_v44  ;;  %v4095_v4 = vmax.f32 %v4007_v36, 0.0  ;;  %v4067_v8 = vmax.f32 %v3979_v0, 0.0 }
 0x324   : > { %6575 = vmatpush3.bf16.msra.mxu0 %v4134_v58  ;;  %v9277_v10 = vpop.permute.xlu1 %3891 }
 0x325   : > { %v4096_v28 = vmax.f32 %v4008_v16, 0.0  ;;  %v3787_v18 = vpop.permute.xlu0 %3786  ;;  %v10098_v16 = vld [vmem:[#allocation47_spill] sm:$0xff] }
 0x326   : > { %v3996_v20 = vadd.f32 %v3787_v18, %v9156_v60  ;;  %v3340_v6 = vpop.f32.mrb[228].mxu0 }
 0x327   : > { %v4149_v57 = vpack.c.bf16 %v4096_v28, %v4095_v4  ;;  %v3341_v24 = vadd.f32 %v3340_v6, %v10093_v13  ;;  %v3342_v19 = vpop.f32.mrb[229].mxu0  ;;  %4978 = vmatmul.mubr.bf16.gmra.mrb[236].mxu1 %v7190_v52  ;;  %v7197_v13 = vld [vmem:[%s9972_s4 + $0xf4] ss:$24 sps:$4 sm:$0xff]  }
 0x328   : > { %v4084_v54 = vmax.f32 %v3996_v20, 0.0  ;;  %v3343_v46 = vpop.f32.mrb[230].mxu0  ;;  %v3792_v7 = vpop.permute.xlu1 %3791  ;;  %4985 = vmatprep.mubr.bf16.mxu1 %v7191_v33  ;;  %v10099_v20 = vld [vmem:[#allocation5_spill] sm:$0xff] }
 0x329   : > { %v4009_v41 = vadd.f32 %v9170_v39, %v3341_v24  ;;  %v3344_v31 = vadd.f32 %v3343_v46, %v10095_v15  ;;  %v3707_v34 = vpop.permute.xlu0 %3706  ;;  %5206 = vmatpush1.bf16.msra.mxu1 %v4149_v57  ;;  %v3345_v60 = vpop.f32.mrb[231].mxu0  ;;  %v3997_v36 = vadd.f32 %v3792_v7, %v9174_v35  ;;  %v7196_v35 = vld [vmem:[%s9972_s4 + $0xc0] ss:$24 sps:$4 sm:$0xff]   ;;  %v10101_v46 = vld [vmem:[#allocation48_spill] sm:$0xff] }
 0x32a   : > { %v4143_v49 = vpack.c.bf16 %v4084_v54, %v4083_v56  ;;  %v3980_v63 = vadd.f32 %v3707_v34, %v10096_v1  ;;  %5207 = vmatprep.subr.bf16.mxu1 %v10089_v25  ;;  %v10102_v1 = vld [vmem:[#allocation49_spill] sm:$0xff] }
 0x32b   : > { %v4010_v5 = vadd.f32 %v9193_v38, %v3344_v31  ;;  %v4097_v37 = vmax.f32 %v4009_v41, 0.0  ;;  %v10097_v38 = vld [vmem:[#allocation46_spill] sm:$0xff]  ;;  %v4085_v18 = vmax.f32 %v3997_v36, 0.0 }
 0x32c   : > { %v4068_v23 = vmax.f32 %v3980_v63, 0.0  ;;  %6576 = vmatprep.subr.bf16.mxu0 %v4143_v49  ;;  %v3712_v39 = vpop.permute.xlu1 %3711 }
 0x32d   : > { %v4098_v2 = vmax.f32 %v4010_v5, 0.0  ;;  %v9296_v43 = vpop.permute.xlu0 %3896  ;;  %v3981_v6 = vadd.f32 %v3712_v39, %v10099_v20  ;;  %v7199_v39 = vld [vmem:[%s9972_s4 + $0xf0] ss:$24 sps:$4 sm:$0xff]  }
 0x32e   : > { %v4135_v59 = vpack.c.bf16 %v4068_v23, %v4067_v8  ;;  %v3348_v50 = vpop.f32.mrb[232].mxu0 }
 0x32f   : > { %v4150_v55 = vpack.c.bf16 %v4098_v2, %v4097_v37  ;;  %v3349_v32 = vadd.f32 %v3348_v50, %v10097_v38  ;;  %v3350_v27 = vpop.f32.mrb[233].mxu0  ;;  %4986 = vmatmul.mubr.bf16.gmra.mrb[240].mxu1 %v7193_v51  ;;  %v4069_v15 = vmax.f32 %v3981_v6, 0.0 }
 0x330   : > { %6577 = vmatpush3.bf16.msra.mxu0 %v4135_v59  ;;  %v3351_v44 = vpop.f32.mrb[234].mxu0  ;;  %v9300_v26 = vpop.permute.xlu1 %3901  ;;  %4993 = vmatprep.mubr.bf16.mxu1 %v7194_v48 }
 0x331   : > { %v4011_v58 = vadd.f32 %v9200_v62, %v3349_v32  ;;  %v3352_v52 = vadd.f32 %v3351_v44, %v10098_v16  ;;  %v3797_v40 = vpop.permute.xlu0 %3796  ;;  %5208 = vmatpush1.bf16.msra.mxu1 %v4150_v55  ;;  %v3353_v33 = vpop.f32.mrb[235].mxu0  ;;  %v10103_v32 = vld [vmem:[#allocation50_spill] sm:$0xff] }
 0x332   : > { %v3998_v4 = vadd.f32 %v3797_v40, %v9184_v12  ;;  %5209 = vmatprep.subr.bf16.mxu1 %v10089_v25  ;;  %v10104_v40 = vld [vmem:[#allocation51_spill] sm:$0xff] }
 0x333   : > { %v4012_v28 = vadd.f32 %v9222_v9, %v3352_v52  ;;  %v4099_v24 = vmax.f32 %v4011_v58, 0.0 }
 0x334   : > { %v4086_v57 = vmax.f32 %v3998_v4, 0.0  ;;  %v3802_v62 = vpop.permute.xlu1 %3801 }
 0x335   : > { %v4100_v19 = vmax.f32 %v4012_v28, 0.0  ;;  %v3717_v12 = vpop.permute.xlu0 %3716  ;;  %v3999_v48 = vadd.f32 %v3802_v62, %v9196_v17 }
 0x336   : > { %v4144_v56 = vpack.c.bf16 %v4086_v57, %v4085_v18  ;;  %v3982_v0 = vadd.f32 %v3717_v12, %v10100_v42  ;;  %v3356_v9 = vpop.f32.mrb[236].mxu0 }
 0x337   : > { %v4151_v54 = vpack.c.bf16 %v4100_v19, %v4099_v24  ;;  %v3357_v7 = vadd.f32 %v3356_v9, %v10101_v46  ;;  %v3358_v41 = vpop.f32.mrb[237].mxu0  ;;  %4994 = vmatmul.mubr.bf16.gmra.mrb[244].mxu1 %v7196_v35  ;;  %v4087_v44 = vmax.f32 %v3999_v48, 0.0 }
 0x338   : > { %v4070_v31 = vmax.f32 %v3982_v0, 0.0  ;;  %6578 = vmatprep.subr.bf16.mxu0 %v4144_v56  ;;  %v3359_v34 = vpop.f32.mrb[238].mxu0  ;;  %v3722_v60 = vpop.permute.xlu1 %3721  ;;  %5001 = vmatprep.mubr.bf16.mxu1 %v7197_v13  ;;  %v10105_v56 = vld [vmem:[#allocation52_spill] sm:$0xff] }
 0x339   : > { %v4013_v49 = vadd.f32 %v9228_v47, %v3357_v7  ;;  %v3360_v63 = vadd.f32 %v3359_v34, %v10102_v1  ;;  %v9318_v5 = vpop.permute.xlu0 %3906  ;;  %5210 = vmatpush1.bf16.msra.mxu1 %v4151_v54  ;;  %v3361_v51 = vpop.f32.mrb[239].mxu0  ;;  %v7200_v47 = vld [vmem:[%s9972_s4 + $0x124] ss:$24 sps:$4 sm:$0xff]   ;;  %v3983_v17 = vadd.f32 %v3722_v60, %v8967_v53  ;;  %v7202_v53 = vld [vmem:[%s9972_s4 + $0x120] ss:$24 sps:$4 sm:$0xff]  }
 0x33a   : > { %v4136_v8 = vpack.c.bf16 %v4070_v31, %v4069_v15  ;;  %5211 = vmatprep.subr.bf16.mxu1 %v10089_v25  ;;  %v10106_v7 = vld [vmem:[#allocation53_spill] sm:$0xff] }
 0x33b   : > { %v4014_v23 = vadd.f32 %v9247_v29, %v3360_v63  ;;  %v4101_v2 = vmax.f32 %v4013_v49, 0.0  ;;  %v4071_v6 = vmax.f32 %v3983_v17, 0.0  ;;  %v7220_v17 = vld [vmem:[%s9972_s4 + $0x8] ss:$24 sps:$4 sm:$0xff]  }
 0x33c   : > { %6579 = vmatpush3.bf16.msra.mxu0 %v4136_v8  ;;  %v9326_v37 = vpop.permute.xlu1 %3911 }
 0x33d   : > { %v4102_v59 = vmax.f32 %v4014_v23, 0.0  ;;  %v3807_v50 = vpop.permute.xlu0 %3806 }
 0x33e   : > { %v4000_v55 = vadd.f32 %v3807_v50, %v9205_v11  ;;  %v3364_v38 = vpop.f32.mrb[240].mxu0 }
 0x33f   : > { %v4152_v29 = vpack.c.bf16 %v4102_v59, %v4101_v2  ;;  %v3365_v27 = vadd.f32 %v3364_v38, %v10103_v32  ;;  %v3366_v36 = vpop.f32.mrb[241].mxu0  ;;  %5002 = vmatmul.mubr.bf16.gmra.mrb[248].mxu1 %v7199_v39 }
 0x340   : > { %v4088_v58 = vmax.f32 %v4000_v55, 0.0  ;;  %v3367_v16 = vpop.f32.mrb[242].mxu0  ;;  %5009 = vmatprep.mubr.bf16.mxu1 %v7200_v47  ;;  %v3812_v35 = vpop.permute.xlu1 %3811  ;;  %v10107_v47 = vld [vmem:[#allocation54_spill] sm:$0xff] }
 0x341   : > { %v4015_v52 = vadd.f32 %v9251_v21, %v3365_v27  ;;  %v3368_v33 = vadd.f32 %v3367_v16, %v10104_v40  ;;  %v3727_v4 = vpop.permute.xlu0 %3726  ;;  %5212 = vmatpush1.bf16.msra.mxu1 %v4152_v29  ;;  %v3369_v28 = vpop.f32.mrb[243].mxu0  ;;  %v7205_v21 = vld [vmem:[%s9972_s4 + $0x154] ss:$24 sps:$4 sm:$0xff]   ;;  %v4001_v0 = vadd.f32 %v3812_v35, %v9214_v3  ;;  %v7203_v3 = vld [vmem:[%s9972_s4 + $0x150] ss:$24 sps:$4 sm:$0xff]  }
 0x342   : > { %v4145_v11 = vpack.c.bf16 %v4088_v58, %v4087_v44  ;;  %v3984_v18 = vadd.f32 %v3727_v4, %v8974_v30  ;;  %5213 = vmatprep.subr.bf16.mxu1 %v10089_v25  ;;  %v10108_v29 = vld [vmem:[#allocation55_spill] sm:$0xff]  ;;  %v7206_v44 = vld [vmem:[%s9972_s4 + $0x180] ss:$24 sps:$4 sm:$0xff]   ;;  %v7228_v58 = vld [vmem:[%s9972_s4 + $0x3c] ss:$24 sps:$4 sm:$0xff]  }
 0x343   : > { %v4016_v20 = vadd.f32 %v9269_v45, %v3368_v33  ;;  %v4103_v62 = vmax.f32 %v4015_v52, 0.0  ;;  %v4089_v49 = vmax.f32 %v4001_v0, 0.0  ;;  %v10109_v33 = vld [vmem:[#allocation2_spill] sm:$0xff] }
 0x344   : > { %v4072_v57 = vmax.f32 %v3984_v18, 0.0  ;;  %6580 = vmatprep.subr.bf16.mxu0 %v4145_v11  ;;  %v3732_v9 = vpop.permute.xlu1 %3731  ;;  %v10110_v18 = vld [vmem:[#allocation33_spill] sm:$0xff] }
 0x345   : > { %v4104_v13 = vmax.f32 %v4016_v20, 0.0  ;;  %v9345_v24 = vpop.permute.xlu0 %3916  ;;  %v3985_v1 = vadd.f32 %v3732_v9, %v8993_v61 }
 0x346   : > { %v4137_v30 = vpack.c.bf16 %v4072_v57, %v4071_v6  ;;  %v3372_v19 = vpop.f32.mrb[244].mxu0  ;;  %v7209_v57 = vld [vmem:[%s9972_s4 + $0x1b0] ss:$24 sps:$4 sm:$0xff]  }
 0x347   : > { %v4153_v12 = vpack.c.bf16 %v4104_v13, %v4103_v62  ;;  %v3373_v45 = vadd.f32 %v3372_v19, %v10105_v56  ;;  %v3374_v42 = vpop.f32.mrb[245].mxu0  ;;  %5010 = vmatmul.mubr.bf16.gmra.mrb[252].mxu1 %v7202_v53  ;;  %v4073_v50 = vmax.f32 %v3985_v1, 0.0  ;;  %v7234_v62 = vld [vmem:[%s9972_s4 + $0x6c] ss:$24 sps:$4 sm:$0xff]  }
 0x348   : > { %6581 = vmatpush3.bf16.msra.mxu0 %v4137_v30  ;;  %v3375_v54 = vpop.f32.mrb[246].mxu0  ;;  %5017 = vmatprep.mubr.bf16.mxu1 %v7205_v21  ;;  %v7226_v21 = vld [vmem:[%s9972_s4 + $0x38] ss:$24 sps:$4 sm:$0xff]   ;;  %v3922_v42 = vpop.permute.xlu1 %3921 }
 0x349   : > { %v4017_v46 = vadd.f32 %v9277_v10, %v3373_v45  ;;  %v3376_v41 = vadd.f32 %v3375_v54, %v10106_v7  ;;  %v3817_v15 = vpop.permute.xlu0 %3816  ;;  %5214 = vmatpush1.bf16.msra.mxu1 %v4153_v12  ;;  %v3377_v31 = vpop.f32.mrb[247].mxu0  ;;  %v7208_v10 = vld [vmem:[%s9972_s4 + $0x184] ss:$24 sps:$4 sm:$0xff]   ;;  %v10111_v12 = vld [vmem:[#allocation4_spill] sm:$0xff]  ;;  %v10112_v54 = vld [vmem:[#allocation35_spill] sm:$0xff] }
 0x34a   : > { %v4002_v34 = vadd.f32 %v3817_v15, %v9220_v14  ;;  %5215 = vmatprep.subr.bf16.mxu1 %v10089_v25  ;;  %v7212_v31 = vld [vmem:[%s9972_s4 + $0x1e0] ss:$24 sps:$4 sm:$0xff]  }
 0x34b   : > { %v4018_v60 = vadd.f32 %v9296_v43, %v3376_v41  ;;  %v4105_v51 = vmax.f32 %v4017_v46, 0.0 }
 0x34c   : > { %v4090_v63 = vmax.f32 %v4002_v34, 0.0  ;;  %v7232_v34 = vld [vmem:[%s9972_s4 + $0x68] ss:$24 sps:$4 sm:$0xff]  }
 0x34d   : > { %v4106_v8 = vmax.f32 %v4018_v60, 0.0  ;;  %v3737_v23 = vpop.permute.xlu0 %3736  ;;  %v7217_v60 = vld [vmem:[%s9972_s4 + $0x214] ss:$24 sps:$4 sm:$0xff]  }
 0x34e   : > { %v4146_v14 = vpack.c.bf16 %v4090_v63, %v4089_v49  ;;  %v3986_v39 = vadd.f32 %v3737_v23, %v9003_v22  ;;  %v3380_v48 = vpop.f32.mrb[248].mxu0 }
 0x34f   : > { %v4154_v43 = vpack.c.bf16 %v4106_v8, %v4105_v51  ;;  %v3381_v2 = vadd.f32 %v3380_v48, %v10107_v47  ;;  %v3382_v59 = vpop.f32.mrb[249].mxu0  ;;  %5018 = vmatmul.mubr.bf16.gmra.mrb[0].mxu1 %v7203_v3  ;;  %v7240_v3 = vld [vmem:[%s9972_s4 + $0x9c] ss:$24 sps:$4 sm:$0xff]   ;;  %v10113_v51 = vld [vmem:[#allocation6_spill] sm:$0xff] }
 0x350   : > { %v4074_v55 = vmax.f32 %v3986_v39, 0.0  ;;  %6582 = vmatprep.subr.bf16.mxu0 %v4146_v14  ;;  %v3383_v61 = vpop.f32.mrb[250].mxu0  ;;  %5025 = vmatprep.mubr.bf16.mxu1 %v7208_v10  ;;  %v3932_v14 = vpop.permute.xlu1 %3931 }
 0x351   : > { %v4019_v38 = vadd.f32 %v9300_v26, %v3381_v2  ;;  %v3384_v32 = vadd.f32 %v3383_v61, %v10108_v29  ;;  %5216 = vmatpush1.bf16.msra.mxu1 %v4154_v43  ;;  %v3385_v27 = vpop.f32.mrb[251].mxu0  ;;  %v7211_v26 = vld [vmem:[%s9972_s4 + $0x1b4] ss:$24 sps:$4 sm:$0xff]   ;;  %v3927_v41 = vpop.permute.xlu0 %3926  ;;  %v4231_v2 = vld [vmem:[%s9972_s4 + $0x240] sm:$0xff]  ;;  %v7215_v61 = vld [vmem:[%s9972_s4 + $0x210] ss:$24 sps:$4 sm:$0xff]  }
 0x352   : > { %v4138_v36 = vpack.c.bf16 %v4074_v55, %v4073_v50  ;;  %5217 = vmatprep.subr.bf16.mxu1 %v10089_v25  ;;  %v10114_v43 = vld [vmem:[#allocation39_spill] sm:$0xff]  ;;  %v6379_v29 = vcombine.high %v4231_v2, %v4231_v2 }
 0x353   : > { %v4020_v22 = vadd.f32 %v9318_v5, %v3384_v32  ;;  %v4107_v16 = vmax.f32 %v4019_v38, 0.0  ;;  %v7238_v38 = vld [vmem:[%s9972_s4 + $0x98] ss:$24 sps:$4 sm:$0xff]   ;;  %v7246_v32 = vld [vmem:[%s9972_s4 + $0xcc] ss:$24 sps:$4 sm:$0xff]  }
 0x354   : > { %6583 = vmatpush3.bf16.msra.mxu0 %v4138_v36 }
 0x355   : > { %v4108_v52 = vmax.f32 %v4020_v22, 0.0  ;;  %5618 = vmatprep.subr.bf16.mxu0 %v10089_v25  ;;  %v3937_v50 = vpop.permute.xlu0 %3936 }
 0x356   : > { %v3388_v5 = vpop.f32.mrb[252].mxu0 }
 0x357   : > { %v4155_v40 = vpack.c.bf16 %v4108_v52, %v4107_v16  ;;  %v3389_v4 = vadd.f32 %v3388_v5, %v10109_v33  ;;  %v3390_v28 = vpop.f32.mrb[253].mxu0  ;;  %5026 = vmatmul.mubr.bf16.gmra.mrb[4].mxu1 %v7206_v44  ;;  %5098 = vmatmul.mubr.bf16.vlgmr.msra.gmra.mrb[8].mxu0 %v7220_v17  ;;  %v6378_v17 = vcombine.low %v4231_v2, %v4231_v2  ;;  %v7252_v16 = vld [vmem:[%s9972_s4 + $0xfc] ss:$24 sps:$4 sm:$0xff]   ;;  %v7223_v52 = vld [vmem:[%s9972_s4 + $0x10] ss:$24 sps:$4 sm:$0xff]  }
 0x358   : > { %v3391_v11 = vpop.f32.mrb[254].mxu0  ;;  %5033 = vmatprep.mubr.bf16.mxu1 %v7211_v26  ;;  %5105 = vmatprep.mubr.bf16.mxu0 %v7228_v58  ;;  %v7244_v26 = vld [vmem:[%s9972_s4 + $0xc8] ss:$24 sps:$4 sm:$0xff]   ;;  %v7225_v58 = vld [vmem:[%s9972_s4 + $0x14] ss:$24 sps:$4 sm:$0xff]  }
 0x359   : > { %v4021_v35 = vadd.f32 %v9326_v37, %v3389_v4  ;;  %v3392_v20 = vadd.f32 %v3391_v11, %v10110_v18  ;;  %5218 = vmatpush1.bf16.msra.mxu1 %v4155_v40  ;;  %v3393_v53 = vpop.f32.mrb[255].mxu0  ;;  %v7214_v37 = vld [vmem:[%s9972_s4 + $0x1e4] ss:$24 sps:$4 sm:$0xff]   ;;  %v7250_v5 = vld [vmem:[%s9972_s4 + $0xf8] ss:$24 sps:$4 sm:$0xff]  }
 0x35a   : > { %5219 = vmatprep.subr.bf16.mxu1 %v10089_v25  ;;  %v7231_v40 = vld [vmem:[%s9972_s4 + $0x44] ss:$24 sps:$4 sm:$0xff]   ;;  %v7229_v28 = vld [vmem:[%s9972_s4 + $0x40] ss:$24 sps:$4 sm:$0xff]   ;;  %v7237_v18 = vld [vmem:[%s9972_s4 + $0x74] ss:$24 sps:$4 sm:$0xff]  }
 0x35b   : > { %v4022_v6 = vadd.f32 %v9345_v24, %v3392_v20  ;;  %v4109_v13 = vmax.f32 %v4021_v35, 0.0  ;;  %v7258_v33 = vld [vmem:[%s9972_s4 + $0x12c] ss:$24 sps:$4 sm:$0xff]   ;;  %v7256_v11 = vld [vmem:[%s9972_s4 + $0x128] ss:$24 sps:$4 sm:$0xff]  }
 0x35c   : > { %v7264_v20 = vld [vmem:[%s9972_s4 + $0x15c] ss:$24 sps:$4 sm:$0xff]  }
 0x35d   : > { %v4110_v30 = vmax.f32 %v4022_v6, 0.0 }
 0x35e   : > { %v3396_v19 = vpop.f32.mrb[0].mxu0 }
 0x35f   : > { %v4156_v24 = vpack.c.bf16 %v4110_v30, %v4109_v13  ;;  %v3397_v56 = vadd.f32 %v3396_v19, %v10111_v12  ;;  %v3398_v45 = vpop.f32.mrb[1].mxu0  ;;  %5034 = vmatmul.mubr.bf16.gmra.mrb[8].mxu1 %v7209_v57  ;;  %5106 = vmatmul.mubr.bf16.gmra.mrb[12].mxu0 %v7226_v21  ;;  %v7235_v21 = vld [vmem:[%s9972_s4 + $0x70] ss:$24 sps:$4 sm:$0xff]   ;;  %v7243_v13 = vld [vmem:[%s9972_s4 + $0xa4] ss:$24 sps:$4 sm:$0xff]  }
 0x360   : > { %v3399_v0 = vpop.f32.mrb[2].mxu0  ;;  %5041 = vmatprep.mubr.bf16.mxu1 %v7214_v37  ;;  %5113 = vmatprep.mubr.bf16.mxu0 %v7234_v62  ;;  %v7262_v37 = vld [vmem:[%s9972_s4 + $0x158] ss:$24 sps:$4 sm:$0xff]   ;;  %v7270_v30 = vld [vmem:[%s9972_s4 + $0x18c] ss:$24 sps:$4 sm:$0xff]  }
 0x361   : > { %v4023_v9 = vadd.f32 %v3922_v42, %v3397_v56  ;;  %v3400_v46 = vadd.f32 %v3399_v0, %v10112_v54  ;;  %5220 = vmatpush1.bf16.msra.mxu1 %v4156_v24  ;;  %v3401_v7 = vpop.f32.mrb[3].mxu0  ;;  %v7241_v56 = vld [vmem:[%s9972_s4 + $0xa0] ss:$24 sps:$4 sm:$0xff]   ;;  %v7249_v0 = vld [vmem:[%s9972_s4 + $0xd4] ss:$24 sps:$4 sm:$0xff]  }
 0x362   : > { %5221 = vmatprep.subr.bf16.mxu1 %v10089_v25  ;;  %v7268_v45 = vld [vmem:[%s9972_s4 + $0x188] ss:$24 sps:$4 sm:$0xff]  }
 0x363   : > { %v4024_v15 = vadd.f32 %v3927_v41, %v3400_v46  ;;  %v4111_v49 = vmax.f32 %v4023_v9, 0.0  ;;  %v7276_v9 = vld [vmem:[%s9972_s4 + $0x1bc] ss:$24 sps:$4 sm:$0xff]   ;;  %v7247_v41 = vld [vmem:[%s9972_s4 + $0xd0] ss:$24 sps:$4 sm:$0xff]  }
 0x365   : > { %v4112_v1 = vmax.f32 %v4024_v15, 0.0  ;;  %v7274_v15 = vld [vmem:[%s9972_s4 + $0x1b8] ss:$24 sps:$4 sm:$0xff]  }
 0x366   : > { %v3404_v63 = vpop.f32.mrb[4].mxu0 }
 0x367   : > { %v4157_v10 = vpack.c.bf16 %v4112_v1, %v4111_v49  ;;  %v3405_v8 = vadd.f32 %v3404_v63, %v10113_v51  ;;  %v3406_v23 = vpop.f32.mrb[5].mxu0  ;;  %5042 = vmatmul.mubr.bf16.gmra.mrb[12].mxu1 %v7212_v31  ;;  %5114 = vmatmul.mubr.bf16.gmra.mrb[16].mxu0 %v7232_v34  ;;  %v7255_v34 = vld [vmem:[%s9972_s4 + $0x104] ss:$24 sps:$4 sm:$0xff]   ;;  %v7253_v63 = vld [vmem:[%s9972_s4 + $0x100] ss:$24 sps:$4 sm:$0xff]  }
 0x368   : > { %v3407_v39 = vpop.f32.mrb[6].mxu0  ;;  %5049 = vmatprep.mubr.bf16.mxu1 %v7217_v60  ;;  %5121 = vmatprep.mubr.bf16.mxu0 %v7240_v3  ;;  %v7282_v3 = vld [vmem:[%s9972_s4 + $0x1ec] ss:$24 sps:$4 sm:$0xff]   ;;  %v7280_v51 = vld [vmem:[%s9972_s4 + $0x1e8] ss:$24 sps:$4 sm:$0xff]  }
 0x369   : > { %v4025_v48 = vadd.f32 %v3932_v14, %v3405_v8  ;;  %v3408_v47 = vadd.f32 %v3407_v39, %v10114_v43  ;;  %5222 = vmatpush1.bf16.msra.mxu1 %v4157_v10  ;;  %v3409_v59 = vpop.f32.mrb[7].mxu0  ;;  %v7261_v8 = vld [vmem:[%s9972_s4 + $0x134] ss:$24 sps:$4 sm:$0xff]  }
 0x36a   : > { %5223 = vmatprep.subr.bf16.mxu1 %v10089_v25  ;;  %v7288_v14 = vld [vmem:[%s9972_s4 + $0x21c] ss:$24 sps:$4 sm:$0xff]   ;;  %v7286_v59 = vld [vmem:[%s9972_s4 + $0x218] ss:$24 sps:$4 sm:$0xff]  }
 0x36b   : > { %v4026_v55 = vadd.f32 %v3937_v50, %v3408_v47  ;;  %v4113_v27 = vmax.f32 %v4025_v48, 0.0  ;;  %v4232_v48 = vld [vmem:[%s9972_s4 + $0x248] sm:$0xff]  ;;  %v7267_v50 = vld [vmem:[%s9972_s4 + $0x164] ss:$24 sps:$4 sm:$0xff]  }
 0x36c   : > { %v7259_v47 = vld [vmem:[%s9972_s4 + $0x130] ss:$24 sps:$4 sm:$0xff]  }
 0x36d   : > { %v4114_v36 = vmax.f32 %v4026_v55, 0.0 }
 0x36f   : > { %v4158_v22 = vpack.c.bf16 %v4114_v36, %v4113_v27  ;;  %5050 = vmatmul.mubr.bf16.gmra.mrb[16].mxu1 %v7215_v61  ;;  %5122 = vmatmul.mubr.bf16.gmra.mrb[20].mxu0 %v7238_v38  ;;  %v6381_v61 = vcombine.high %v4232_v48, %v4232_v48  ;;  %v6380_v36 = vcombine.low %v4232_v48, %v4232_v48 }
 0x370   : > { %5057 = vmatprep.mubr.bf16.mxu1 %v6379_v29  ;;  %5129 = vmatprep.mubr.bf16.mxu0 %v7246_v32  ;;  %v7265_v32 = vld [vmem:[%s9972_s4 + $0x160] ss:$24 sps:$4 sm:$0xff]  }
 0x371   : > { %v4927_v44 = vsel %vm1099_vm1, %v4158_v22, 0  ;;  %v7273_v22 = vld [vmem:[%s9972_s4 + $0x194] ss:$24 sps:$4 sm:$0xff]   ;;  %vm5879_vm1 = vcmask 2048  }
 0x372   : > { %5224 = vmatpush1.bf16.msra.mxu1 %v4927_v44 }
 0x377   : > { %5058 = vmatmul.mubr.bf16.gmra.mrb[20].mxu1 %v6378_v17  ;;  %5130 = vmatmul.mubr.bf16.gmra.mrb[24].mxu0 %v7244_v26 }
 0x378   : > { %6384 = vmatprep.mubr.msk.bf16.mxu1 %vm4886_vm6, %v7225_v58  ;;  %5137 = vmatprep.mubr.bf16.mxu0 %v7252_v16  ;;  %v7271_v58 = vld [vmem:[%s9972_s4 + $0x190] ss:$24 sps:$4 sm:$0xff]  }
 0x37f   : > { %5234 = vmatmul.mubr.bf16.vlgmr.msra.gmra.mrb[24].mxu1 %v7223_v52  ;;  %5138 = vmatmul.mubr.bf16.gmra.mrb[28].mxu0 %v7250_v5  ;;  %v7279_v52 = vld [vmem:[%s9972_s4 + $0x1c4] ss:$24 sps:$4 sm:$0xff]  }
 0x380   : > { %6385 = vmatprep.mubr.msk.bf16.mxu1 %vm4886_vm6, %v7231_v40  ;;  %5145 = vmatprep.mubr.bf16.mxu0 %v7258_v33 }
 0x382   : > { %v9451_v4 = vpop.f32.mrb[176].mxu1 }
 0x383   : > { %v6764_v35 = vpop.f32.mrb[177].mxu1 }
 0x384   : > { %v9465_v53 = vpop.f32.mrb[178].mxu1 }
 0x385   : > { %v6765_v6 = vpop.f32.mrb[179].mxu1 }
 0x387   : > { %5242 = vmatmul.mubr.bf16.gmra.mrb[28].mxu1 %v7229_v28  ;;  %5146 = vmatmul.mubr.bf16.gmra.mrb[32].mxu0 %v7256_v11  ;;  %v7277_v28 = vld [vmem:[%s9972_s4 + $0x1c0] ss:$24 sps:$4 sm:$0xff]  }
 0x388   : > { %6386 = vmatprep.mubr.msk.bf16.mxu1 %vm4886_vm6, %v7237_v18  ;;  %5153 = vmatprep.mubr.bf16.mxu0 %v7264_v20  ;;  %v7285_v18 = vld [vmem:[%s9972_s4 + $0x1f4] ss:$24 sps:$4 sm:$0xff]  }
 0x38a   : > { %v9468_v57 = vpop.f32.mrb[180].mxu1 }
 0x38b   : > { %v6768_v62 = vpop.f32.mrb[181].mxu1 }
 0x38c   : > { %v9482_v19 = vpop.f32.mrb[182].mxu1 }
 0x38d   : > { %v6769_v24 = vpop.f32.mrb[183].mxu1 }
 0x38e   : > { %v4233_v24 = vld [vmem:[%s9972_s4 + $0x250] sm:$0xff] }
 0x38f   : > { %5250 = vmatmul.mubr.bf16.gmra.mrb[32].mxu1 %v7235_v21  ;;  %5154 = vmatmul.mubr.bf16.gmra.mrb[36].mxu0 %v7262_v37  ;;  %v7283_v37 = vld [vmem:[%s9972_s4 + $0x1f0] ss:$24 sps:$4 sm:$0xff]  }
 0x390   : > { %6387 = vmatprep.mubr.msk.bf16.mxu1 %vm4886_vm6, %v7243_v13  ;;  %5161 = vmatprep.mubr.bf16.mxu0 %v7270_v30  ;;  %v7291_v13 = vld [vmem:[%s9972_s4 + $0x224] ss:$24 sps:$4 sm:$0xff]  }
 0x392   : > { %v9485_v12 = vpop.f32.mrb[184].mxu1 }
 0x393   : > { %v6772_v42 = vpop.f32.mrb[185].mxu1 }
 0x394   : > { %v9499_v54 = vpop.f32.mrb[186].mxu1  ;;  %v7289_v42 = vld [vmem:[%s9972_s4 + $0x220] ss:$24 sps:$4 sm:$0xff]  }
 0x395   : > { %v6773_v46 = vpop.f32.mrb[187].mxu1 }
 0x397   : > { %5258 = vmatmul.mubr.bf16.gmra.mrb[36].mxu1 %v7241_v56  ;;  %5162 = vmatmul.mubr.bf16.gmra.mrb[40].mxu0 %v7268_v45 }
 0x398   : > { %6388 = vmatprep.mubr.msk.bf16.mxu1 %vm4886_vm6, %v7249_v0  ;;  %5169 = vmatprep.mubr.bf16.mxu0 %v7276_v9  ;;  %v6383_v9 = vcombine.high %v4233_v24, %v4233_v24 }
 0x39a   : > { %v9502_v7 = vpop.f32.mrb[188].mxu1 }
 0x39b   : > { %v6776_v31 = vpop.f32.mrb[189].mxu1 }
 0x39c   : > { %v9513_v60 = vpop.f32.mrb[190].mxu1  ;;  %v6382_v31 = vcombine.low %v4233_v24, %v4233_v24 }
 0x39d   : > { %v6777_v49 = vpop.f32.mrb[191].mxu1 }
 0x39f   : > { %5266 = vmatmul.mubr.bf16.gmra.mrb[40].mxu1 %v7247_v41  ;;  %5170 = vmatmul.mubr.bf16.gmra.mrb[44].mxu0 %v7274_v15 }
 0x3a0   : > { %6389 = vmatprep.mubr.msk.bf16.mxu1 %vm4886_vm6, %v7255_v34  ;;  %5177 = vmatprep.mubr.bf16.mxu0 %v7282_v3 }
 0x3a2   : > { %v9519_v1 = vpop.f32.mrb[192].mxu1 }
 0x3a3   : > { %v6780_v10 = vpop.f32.mrb[193].mxu1 }
 0x3a4   : > { %v9530_v23 = vpop.f32.mrb[194].mxu1 }
 0x3a5   : > { %v6781_v39 = vpop.f32.mrb[195].mxu1 }
 0x3a7   : > { %5274 = vmatmul.mubr.bf16.gmra.mrb[44].mxu1 %v7253_v63  ;;  %5178 = vmatmul.mubr.bf16.gmra.mrb[48].mxu0 %v7280_v51 }
 0x3a8   : > { %6390 = vmatprep.mubr.msk.bf16.mxu1 %vm4886_vm6, %v7261_v8  ;;  %5185 = vmatprep.mubr.bf16.mxu0 %v7288_v14 }
 0x3aa   : > { %v9539_v43 = vpop.f32.mrb[196].mxu1 }
 0x3ab   : > { %v6784_v2 = vpop.f32.mrb[197].mxu1 }
 0x3ac   : > { %v9550_v55 = vpop.f32.mrb[198].mxu1 }
 0x3ad   : > { %v6785_v38 = vpop.f32.mrb[199].mxu1 }
 0x3af   : > { %5282 = vmatmul.mubr.bf16.gmra.mrb[48].mxu1 %v7259_v47  ;;  %5186 = vmatmul.mubr.bf16.gmra.mrb[52].mxu0 %v7286_v59 }
 0x3b0   : > { %6391 = vmatprep.mubr.msk.bf16.mxu1 %vm4886_vm6, %v7267_v50  ;;  %5193 = vmatprep.mubr.bf16.mxu0 %v6381_v61 }
 0x3b2   : > { %v9553_v29 = vpop.f32.mrb[200].mxu1 }
 0x3b3   : > { %v6788_v27 = vpop.f32.mrb[201].mxu1 }
 0x3b4   : > { %v9561_v44 = vpop.f32.mrb[202].mxu1 }
 0x3b5   : > { %v6789_v17 = vpop.f32.mrb[203].mxu1 }
 0x3b7   : > { %5290 = vmatmul.mubr.bf16.gmra.mrb[52].mxu1 %v7265_v32  ;;  %5194 = vmatmul.mubr.bf16.gmra.mrb[56].mxu0 %v6380_v36 }
 0x3b8   : > { %6392 = vmatprep.mubr.msk.bf16.mxu1 %vm4886_vm6, %v7273_v22 }
 0x3ba   : > { %v9564_v26 = vpop.f32.mrb[204].mxu1 }
 0x3bb   : > { %v6792_v16 = vpop.f32.mrb[205].mxu1 }
 0x3bc   : > { %v9572_v5 = vpop.f32.mrb[206].mxu1 }
 0x3bd   : > { %v6793_v40 = vpop.f32.mrb[207].mxu1 }
 0x3bf   : > { %5298 = vmatmul.mubr.bf16.gmra.mrb[56].mxu1 %v7271_v58 }
 0x3c0   : > { %6393 = vmatprep.mubr.msk.bf16.mxu1 %vm4886_vm6, %v7279_v52 }
 0x3c2   : > { %v9575_v33 = vpop.f32.mrb[208].mxu1 }
 0x3c3   : > { %v6796_v11 = vpop.f32.mrb[209].mxu1 }
 0x3c4   : > { %v9580_v35 = vpop.f32.mrb[210].mxu1 }
 0x3c5   : > { %v6797_v20 = vpop.f32.mrb[211].mxu1 }
 0x3c7   : > { %5306 = vmatmul.mubr.bf16.gmra.mrb[60].mxu1 %v7277_v28 }
 0x3c8   : > { %6394 = vmatprep.mubr.msk.bf16.mxu1 %vm4886_vm6, %v7285_v18 }
 0x3ca   : > { %v9586_v6 = vpop.f32.mrb[212].mxu1 }
 0x3cb   : > { %v6800_v21 = vpop.f32.mrb[213].mxu1 }
 0x3cc   : > { %v9591_v62 = vpop.f32.mrb[214].mxu1 }
 0x3cd   : > { %v6801_v30 = vpop.f32.mrb[215].mxu1 }
 0x3cf   : > { %5314 = vmatmul.mubr.bf16.gmra.mrb[64].mxu1 %v7283_v37 }
 0x3d0   : > { %6395 = vmatprep.mubr.msk.bf16.mxu1 %vm4886_vm6, %v7291_v13 }
 0x3d2   : > { %v9600_v56 = vpop.f32.mrb[216].mxu1 }
 0x3d3   : > { %v6804_v45 = vpop.f32.mrb[217].mxu1 }
 0x3d4   : > { %v9605_v0 = vpop.f32.mrb[218].mxu1 }
 0x3d5   : > { %v6805_v46 = vpop.f32.mrb[219].mxu1 }
 0x3d7   : > { %5322 = vmatmul.mubr.bf16.gmra.mrb[68].mxu1 %v7289_v42 }
 0x3d8   : > { %6396 = vmatprep.mubr.msk.bf16.mxu1 %vm4886_vm6, %v6383_v9 }
 0x3da   : > { %v9608_v41 = vpop.f32.mrb[220].mxu1 }
 0x3db   : > { %v6808_v15 = vpop.f32.mrb[221].mxu1 }
 0x3dc   : > { %v9610_v34 = vpop.f32.mrb[222].mxu1 }
 0x3dd   : > { %v6809_v3 = vpop.f32.mrb[223].mxu1 }
 0x3df   : > { %5330 = vmatmul.mubr.bf16.gmra.mrb[72].mxu1 %v6382_v31 }
 0x3e2   : > { %v9612_v49 = vpop.f32.mrb[224].mxu1 }
 0x3e3   : > { %v6812_v63 = vpop.f32.mrb[225].mxu1 }
 0x3e4   : > { %v4515_v10 = vpop.f32.mrb[226].mxu1 }
 0x3e5   : > { %v6813_v51 = vpop.f32.mrb[227].mxu1 }
 0x3ea   : > { %v6490_v8 = vpop.f32.mrb[228].mxu1 }
 0x3eb   : > { %v6491_v14 = vpop.f32.mrb[229].mxu1 }
 0x3ec   : > { %v6492_v39 = vadd.f32 %v6491_v14, %v6490_v8  ;;  %v6493_v48 = vpop.f32.mrb[230].mxu1 }
 0x3ed   : > { %v6494_v47 = vpop.f32.mrb[231].mxu1 }
 0x3ee   : > { %v9615_v2 = vadd.f32 %v6492_v39, %v9451_v4  ;;  %v6495_v59 = vadd.f32 %v6494_v47, %v6493_v48 }
 0x3f0   : > { %v9618_v50 = vadd.f32 %v6495_v59, %v9465_v53 }
 0x3f2   : > { %v6496_v61 = vpop.f32.mrb[232].mxu1 }
 0x3f3   : > { %v6497_v38 = vpop.f32.mrb[233].mxu1 }
 0x3f4   : > { %v6498_v32 = vadd.f32 %v6497_v38, %v6496_v61  ;;  %v6499_v27 = vpop.f32.mrb[234].mxu1 }
 0x3f5   : > { %v6500_v36 = vpop.f32.mrb[235].mxu1 }
 0x3f6   : > { %v9621_v22 = vadd.f32 %v6498_v32, %v9468_v57  ;;  %v6501_v17 = vadd.f32 %v6500_v36, %v6499_v27 }
 0x3f8   : > { %v9624_v58 = vadd.f32 %v6501_v17, %v9482_v19 }
 0x3fa   : > { %v6502_v16 = vpop.f32.mrb[236].mxu1 }
 0x3fb   : > { %v6503_v52 = vpop.f32.mrb[237].mxu1 }
 0x3fc   : > { %v6504_v4 = vadd.f32 %v6503_v52, %v6502_v16  ;;  %v6505_v40 = vpop.f32.mrb[238].mxu1 }
 0x3fd   : > { %v6506_v28 = vpop.f32.mrb[239].mxu1 }
 0x3fe   : > { %v9627_v53 = vadd.f32 %v6504_v4, %v9485_v12  ;;  %v6507_v11 = vadd.f32 %v6506_v28, %v6505_v40 }
 0x400   : > { %v9630_v18 = vadd.f32 %v6507_v11, %v9499_v54 }
 0x402   : > { %v6508_v20 = vpop.f32.mrb[240].mxu1 }
 0x403   : > { %v6509_v21 = vpop.f32.mrb[241].mxu1 }
 0x404   : > { %v6510_v57 = vadd.f32 %v6509_v21, %v6508_v20  ;;  %v6511_v37 = vpop.f32.mrb[242].mxu1 }
 0x405   : > { %v6512_v13 = vpop.f32.mrb[243].mxu1 }
 0x406   : > { %v9633_v19 = vadd.f32 %v6510_v57, %v9502_v7  ;;  %v6513_v30 = vadd.f32 %v6512_v13, %v6511_v37 }
 0x408   : > { %v9636_v24 = vadd.f32 %v6513_v30, %v9513_v60 }
 0x40a   : > { %v6514_v45 = vpop.f32.mrb[244].mxu1 }
 0x40b   : > { %v6515_v42 = vpop.f32.mrb[245].mxu1 }
 0x40c   : > { %v6516_v12 = vadd.f32 %v6515_v42, %v6514_v45  ;;  %v6517_v9 = vpop.f32.mrb[246].mxu1 }
 0x40d   : > { %v6518_v46 = vpop.f32.mrb[247].mxu1 }
 0x40e   : > { %v9639_v54 = vadd.f32 %v6516_v12, %v9519_v1  ;;  %v6519_v15 = vadd.f32 %v6518_v46, %v6517_v9 }
 0x410   : > { %v9642_v31 = vadd.f32 %v6519_v15, %v9530_v23 }
 0x412   : > { %v6520_v3 = vpop.f32.mrb[248].mxu1 }
 0x413   : > { %v6521_v63 = vpop.f32.mrb[249].mxu1 }
 0x414   : > { %v6522_v7 = vadd.f32 %v6521_v63, %v6520_v3  ;;  %v6523_v10 = vpop.f32.mrb[250].mxu1 }
 0x415   : > { %v6524_v51 = vpop.f32.mrb[251].mxu1 }
 0x416   : > { %v9645_v60 = vadd.f32 %v6522_v7, %v9539_v43  ;;  %v6525_v8 = vadd.f32 %v6524_v51, %v6523_v10 }
 0x418   : > { %v9648_v14 = vadd.f32 %v6525_v8, %v9550_v55 }
 0x41a   : > { %v6526_v39 = vpop.f32.mrb[252].mxu1 }
 0x41b   : > { %v6527_v48 = vpop.f32.mrb[253].mxu1 }
 0x41c   : > { %v6528_v1 = vadd.f32 %v6527_v48, %v6526_v39  ;;  %v6529_v47 = vpop.f32.mrb[254].mxu1 }
 0x41d   : > { %v6530_v59 = vpop.f32.mrb[255].mxu1 }
 0x41e   : > { %v9651_v23 = vadd.f32 %v6528_v1, %v9553_v29  ;;  %v6531_v61 = vadd.f32 %v6530_v59, %v6529_v47 }
 0x420   : > { %v9654_v38 = vadd.f32 %v6531_v61, %v9561_v44 }
 0x422   : > { %v6532_v32 = vpop.f32.mrb[0].mxu1 }
 0x423   : > { %v6533_v27 = vpop.f32.mrb[1].mxu1 }
 0x424   : > { %v6534_v43 = vadd.f32 %v6533_v27, %v6532_v32  ;;  %v6535_v36 = vpop.f32.mrb[2].mxu1 }
 0x425   : > { %v6536_v17 = vpop.f32.mrb[3].mxu1 }
 0x426   : > { %v9657_v55 = vadd.f32 %v6534_v43, %v9564_v26  ;;  %v6537_v16 = vadd.f32 %v6536_v17, %v6535_v36 }
 0x428   : > { %v9660_v52 = vadd.f32 %v6537_v16, %v9572_v5 }
 0x42a   : > { %v6538_v4 = vpop.f32.mrb[4].mxu1  ;;  %v6584_v40 = vpop.f32.mrb[8].mxu0 }
 0x42b   : > { %v6539_v29 = vpop.f32.mrb[5].mxu1  ;;  %v6585_v28 = vpop.f32.mrb[9].mxu0 }
 0x42c   : > { %v6540_v11 = vadd.f32 %v6539_v29, %v6538_v4  ;;  %v6541_v20 = vpop.f32.mrb[6].mxu1  ;;  %v6586_v44 = vadd.f32 %v6585_v28, %v6584_v40  ;;  %v6587_v21 = vpop.f32.mrb[10].mxu0 }
 0x42d   : > { %v6542_v57 = vpop.f32.mrb[7].mxu1  ;;  %v6588_v37 = vpop.f32.mrb[11].mxu0 }
 0x42e   : > { %v9663_v13 = vadd.f32 %v6540_v11, %v9575_v33  ;;  %v6543_v30 = vadd.f32 %v6542_v57, %v6541_v20  ;;  %v6589_v26 = vadd.f32 %v6588_v37, %v6587_v21  ;;  %v9666_v45 = vadd.f32 %v6586_v44, %v9615_v2 }
 0x430   : > { %v9669_v5 = vadd.f32 %v6543_v30, %v9580_v35  ;;  %v9672_v42 = vadd.f32 %v6589_v26, %v9618_v50 }
 0x432   : > { %v6544_v12 = vpop.f32.mrb[8].mxu1  ;;  %v6590_v9 = vpop.f32.mrb[12].mxu0 }
 0x433   : > { %v6545_v46 = vpop.f32.mrb[9].mxu1  ;;  %v6591_v15 = vpop.f32.mrb[13].mxu0 }
 0x434   : > { %v6546_v3 = vadd.f32 %v6545_v46, %v6544_v12  ;;  %v6547_v63 = vpop.f32.mrb[10].mxu1  ;;  %v6592_v7 = vadd.f32 %v6591_v15, %v6590_v9  ;;  %v6593_v33 = vpop.f32.mrb[14].mxu0 }
 0x435   : > { %v6548_v10 = vpop.f32.mrb[11].mxu1  ;;  %v6594_v51 = vpop.f32.mrb[15].mxu0 }
 0x436   : > { %v9675_v8 = vadd.f32 %v6546_v3, %v9586_v6  ;;  %v6549_v2 = vadd.f32 %v6548_v10, %v6547_v63  ;;  %v6595_v39 = vadd.f32 %v6594_v51, %v6593_v33  ;;  %v9678_v35 = vadd.f32 %v6592_v7, %v9621_v22 }
 0x438   : > { %v9681_v50 = vadd.f32 %v6549_v2, %v9591_v62  ;;  %v9684_v48 = vadd.f32 %v6595_v39, %v9624_v58 }
 0x43a   : > { %v6550_v1 = vpop.f32.mrb[12].mxu1  ;;  %v6596_v47 = vpop.f32.mrb[16].mxu0 }
 0x43b   : > { %v6551_v59 = vpop.f32.mrb[13].mxu1  ;;  %v6597_v61 = vpop.f32.mrb[17].mxu0 }
 0x43c   : > { %v6552_v32 = vadd.f32 %v6551_v59, %v6550_v1  ;;  %v6553_v27 = vpop.f32.mrb[14].mxu1  ;;  %v6598_v43 = vadd.f32 %v6597_v61, %v6596_v47  ;;  %v6599_v6 = vpop.f32.mrb[18].mxu0 }
 0x43d   : > { %v6554_v36 = vpop.f32.mrb[15].mxu1  ;;  %v6600_v17 = vpop.f32.mrb[19].mxu0 }
 0x43e   : > { %v9687_v16 = vadd.f32 %v6552_v32, %v9600_v56  ;;  %v6555_v22 = vadd.f32 %v6554_v36, %v6553_v27  ;;  %v6601_v4 = vadd.f32 %v6600_v17, %v6599_v6  ;;  %v9690_v62 = vadd.f32 %v6598_v43, %v9627_v53  ;;  %v5365_v1 = vpop.permute.xlu1 %5364 }
 0x440   : > { %v9693_v58 = vadd.f32 %v6555_v22, %v9605_v0  ;;  %v9696_v40 = vadd.f32 %v6601_v4, %v9630_v18 }
 0x442   : > { %v6556_v29 = vpop.f32.mrb[16].mxu1  ;;  %v6602_v28 = vpop.f32.mrb[20].mxu0 }
 0x443   : > { %v6557_v11 = vpop.f32.mrb[17].mxu1  ;;  %v6603_v20 = vpop.f32.mrb[21].mxu0 }
 0x444   : > { %v6558_v44 = vadd.f32 %v6557_v11, %v6556_v29  ;;  %v6559_v21 = vpop.f32.mrb[18].mxu1  ;;  %v6604_v57 = vadd.f32 %v6603_v20, %v6602_v28  ;;  %v6605_v56 = vpop.f32.mrb[22].mxu0 }
 0x445   : > { %v6560_v37 = vpop.f32.mrb[19].mxu1  ;;  %v6606_v30 = vpop.f32.mrb[23].mxu0 }
 0x446   : > { %v9699_v26 = vadd.f32 %v6558_v44, %v9608_v41  ;;  %v6561_v53 = vadd.f32 %v6560_v37, %v6559_v21  ;;  %v6607_v12 = vadd.f32 %v6606_v30, %v6605_v56  ;;  %v9702_v0 = vadd.f32 %v6604_v57, %v9633_v19 }
 0x448   : > { %v9705_v18 = vadd.f32 %v6561_v53, %v9610_v34  ;;  %v9708_v9 = vadd.f32 %v6607_v12, %v9636_v24 }
 0x44a   : > { %v6562_v46 = vpop.f32.mrb[20].mxu1  ;;  %v6608_v15 = vpop.f32.mrb[24].mxu0 }
 0x44b   : > { %v6563_v3 = vpop.f32.mrb[21].mxu1  ;;  %v6609_v63 = vpop.f32.mrb[25].mxu0 }
 0x44c   : > { %v6564_v7 = vadd.f32 %v6563_v3, %v6562_v46  ;;  %v6565_v33 = vpop.f32.mrb[22].mxu1  ;;  %v6610_v10 = vadd.f32 %v6609_v63, %v6608_v15  ;;  %v6611_v41 = vpop.f32.mrb[26].mxu0 }
 0x44d   : > { %v6566_v51 = vpop.f32.mrb[23].mxu1  ;;  %v6612_v2 = vpop.f32.mrb[27].mxu0 }
 0x44e   : > { %v9711_v39 = vadd.f32 %v6564_v7, %v9612_v49  ;;  %v6613_v19 = vadd.f32 %v6612_v2, %v6611_v41  ;;  %v9714_v34 = vadd.f32 %v6610_v10, %v9639_v54  ;;  %v5370_v54 = vpop.permute.xlu0 %5369 }
 0x450   : > { %v9717_v24 = vadd.f32 %v6613_v19, %v9642_v31 }
 0x452   : > { %v5235_v47 = vpop.f32.mrb[24].mxu1  ;;  %v6614_v59 = vpop.f32.mrb[28].mxu0 }
 0x453   : > { %v5236_v61 = vadd.f32 %v5235_v47, %v9666_v45  ;;  %v5237_v32 = vpop.f32.mrb[25].mxu1  ;;  %v6615_v27 = vpop.f32.mrb[29].mxu0 }
 0x454   : > { %v5238_v43 = vpop.f32.mrb[26].mxu1  ;;  %v6616_v6 = vadd.f32 %v6615_v27, %v6614_v59  ;;  %v6617_v36 = vpop.f32.mrb[30].mxu0 }
 0x455   : > { %v5487_v17 = vadd.f32 %v5365_v1, %v5236_v61  ;;  %v5239_v49 = vadd.f32 %v5238_v43, %v9672_v42  ;;  %v5240_v22 = vpop.f32.mrb[27].mxu1  ;;  %v6618_v4 = vpop.f32.mrb[31].mxu0 }
 0x456   : > { %v6619_v29 = vadd.f32 %v6618_v4, %v6617_v36  ;;  %v9722_v31 = vadd.f32 %v6616_v6, %v9645_v60  ;;  %v5375_v45 = vpop.permute.xlu1 %5374  ;;  %v5380_v63 = vpop.permute.xlu0 %5379 }
 0x457   : > { %v5488_v28 = vadd.f32 %v5370_v54, %v5239_v49  ;;  %v5512_v20 = vmax.f32 %v5487_v17, 0.0 }
 0x458   : > { %v9725_v11 = vadd.f32 %v6619_v29, %v9648_v14 }
 0x459   : > { %v5513_v44 = vmax.f32 %v5488_v28, 0.0 }
 0x45a   : > { %v5243_v21 = vpop.f32.mrb[28].mxu1  ;;  %v6620_v57 = vpop.f32.mrb[32].mxu0 }
 0x45b   : > { %v9727_v56 = vpack.c.bf16 %v5513_v44, %v5512_v20  ;;  %v5244_v42 = vadd.f32 %v5243_v21, %v9678_v35  ;;  %v5245_v37 = vpop.f32.mrb[29].mxu1  ;;  %v6621_v30 = vpop.f32.mrb[33].mxu0 }
 0x45c   : > { %v5246_v53 = vpop.f32.mrb[30].mxu1  ;;  %v6622_v12 = vadd.f32 %v6621_v30, %v6620_v57  ;;  %v6623_v46 = vpop.f32.mrb[34].mxu0 }
 0x45d   : > { %v5489_v60 = vadd.f32 %v5375_v45, %v5244_v42  ;;  %v5247_v15 = vadd.f32 %v5246_v53, %v9684_v48  ;;  %5581 = vrot.lane.b32.xlu1 %v9727_v56, %s7315_s29  ;;  %v5248_v14 = vpop.f32.mrb[31].mxu1  ;;  %v6624_v3 = vpop.f32.mrb[35].mxu0 }
 0x45e   : > { %v6625_v7 = vadd.f32 %v6624_v3, %v6623_v46  ;;  %v9734_v33 = vadd.f32 %v6622_v12, %v9651_v23  ;;  %v5385_v41 = vpop.permute.xlu1 %5384  ;;  %v5390_v17 = vpop.permute.xlu0 %5389 }
 0x45f   : > { %v5490_v10 = vadd.f32 %v5380_v63, %v5247_v15  ;;  %v5514_v51 = vmax.f32 %v5489_v60, 0.0 }
 0x460   : > { %v9737_v35 = vadd.f32 %v6625_v7, %v9654_v38 }
 0x461   : > { %v5515_v2 = vmax.f32 %v5490_v10, 0.0 }
 0x462   : > { %v5251_v19 = vpop.f32.mrb[32].mxu1  ;;  %v6626_v1 = vpop.f32.mrb[36].mxu0 }
 0x463   : > { %v9739_v48 = vpack.c.bf16 %v5515_v2, %v5514_v51  ;;  %v5252_v47 = vadd.f32 %v5251_v19, %v9690_v62  ;;  %v5253_v59 = vpop.f32.mrb[33].mxu1  ;;  %v6627_v61 = vpop.f32.mrb[37].mxu0 }
 0x464   : > { %v5254_v32 = vpop.f32.mrb[34].mxu1  ;;  %v6628_v27 = vadd.f32 %v6627_v61, %v6626_v1  ;;  %v6629_v43 = vpop.f32.mrb[38].mxu0 }
 0x465   : > { %v5491_v23 = vadd.f32 %v5385_v41, %v5252_v47  ;;  %v5255_v6 = vadd.f32 %v5254_v32, %v9696_v40  ;;  %5583 = vrot.lane.b32.xlu0 %v9739_v48, %s7315_s29  ;;  %v5256_v38 = vpop.f32.mrb[35].mxu1  ;;  %v6630_v36 = vpop.f32.mrb[39].mxu0 }
 0x466   : > { %v6631_v49 = vadd.f32 %v6630_v36, %v6629_v43  ;;  %v9746_v22 = vadd.f32 %v6628_v27, %v9657_v55  ;;  %v5395_v54 = vpop.permute.xlu1 %5394  ;;  %v5400_v46 = vpop.permute.xlu0 %5399 }
 0x467   : > { %v5492_v4 = vadd.f32 %v5390_v17, %v5255_v6  ;;  %v5516_v29 = vmax.f32 %v5491_v23, 0.0 }
 0x468   : > { %v9749_v62 = vadd.f32 %v6631_v49, %v9660_v52 }
 0x469   : > { %v5517_v28 = vmax.f32 %v5492_v4, 0.0 }
 0x46a   : > { %v5259_v45 = vpop.f32.mrb[36].mxu1  ;;  %v6632_v20 = vpop.f32.mrb[40].mxu0 }
 0x46b   : > { %v9751_v40 = vpack.c.bf16 %v5517_v28, %v5516_v29  ;;  %v5260_v44 = vadd.f32 %v5259_v45, %v9702_v0  ;;  %v5261_v21 = vpop.f32.mrb[37].mxu1  ;;  %v6633_v57 = vpop.f32.mrb[41].mxu0 }
 0x46c   : > { %v5262_v42 = vpop.f32.mrb[38].mxu1  ;;  %v6634_v37 = vadd.f32 %v6633_v57, %v6632_v20  ;;  %v6635_v30 = vpop.f32.mrb[42].mxu0 }
 0x46d   : > { %v5493_v55 = vadd.f32 %v5395_v54, %v5260_v44  ;;  %v5263_v53 = vadd.f32 %v5262_v42, %v9708_v9  ;;  %5585 = vrot.lane.b32.xlu1 %v9751_v40, %s7315_s29  ;;  %v5264_v52 = vpop.f32.mrb[39].mxu1  ;;  %v6636_v12 = vpop.f32.mrb[43].mxu0 }
 0x46e   : > { %v6637_v60 = vadd.f32 %v6636_v12, %v6635_v30  ;;  %v9758_v15 = vadd.f32 %v6634_v37, %v9663_v13  ;;  %v5405_v3 = vpop.permute.xlu1 %5404  ;;  %v5410_v27 = vpop.permute.xlu0 %5409 }
 0x46f   : > { %v5494_v14 = vadd.f32 %v5400_v46, %v5263_v53  ;;  %v5518_v63 = vmax.f32 %v5493_v55, 0.0 }
 0x470   : > { %v9761_v0 = vadd.f32 %v6637_v60, %v9669_v5 }
 0x471   : > { %v5519_v7 = vmax.f32 %v5494_v14, 0.0 }
 0x472   : > { %v5267_v10 = vpop.f32.mrb[40].mxu1  ;;  %v6638_v41 = vpop.f32.mrb[44].mxu0 }
 0x473   : > { %v9763_v9 = vpack.c.bf16 %v5519_v7, %v5518_v63  ;;  %v5268_v51 = vadd.f32 %v5267_v10, %v9714_v34  ;;  %v5269_v2 = vpop.f32.mrb[41].mxu1  ;;  %v6639_v19 = vpop.f32.mrb[45].mxu0 }
 0x474   : > { %v5270_v1 = vpop.f32.mrb[42].mxu1  ;;  %v6640_v47 = vadd.f32 %v6639_v19, %v6638_v41  ;;  %v6641_v59 = vpop.f32.mrb[46].mxu0 }
 0x475   : > { %v5495_v13 = vadd.f32 %v5405_v3, %v5268_v51  ;;  %v5271_v61 = vadd.f32 %v5270_v1, %v9717_v24  ;;  %5587 = vrot.lane.b32.xlu0 %v9763_v9, %s7315_s29  ;;  %v5272_v5 = vpop.f32.mrb[43].mxu1  ;;  %v6642_v32 = vpop.f32.mrb[47].mxu0 }
 0x476   : > { %v6643_v43 = vadd.f32 %v6642_v32, %v6641_v59  ;;  %v9770_v23 = vadd.f32 %v6640_v47, %v9675_v8  ;;  %v5415_v38 = vpop.permute.xlu1 %5414  ;;  %v5420_v42 = vpop.permute.xlu0 %5419 }
 0x477   : > { %v5496_v6 = vadd.f32 %v5410_v27, %v5271_v61  ;;  %v5520_v36 = vmax.f32 %v5495_v13, 0.0 }
 0x478   : > { %v9773_v34 = vadd.f32 %v6643_v43, %v9681_v50 }
 0x479   : > { %v5521_v17 = vmax.f32 %v5496_v6, 0.0 }
 0x47a   : > { %v5275_v49 = vpop.f32.mrb[44].mxu1  ;;  %v6644_v4 = vpop.f32.mrb[48].mxu0 }
 0x47b   : > { %v9775_v24 = vpack.c.bf16 %v5521_v17, %v5520_v36  ;;  %v5276_v54 = vadd.f32 %v5275_v49, %v9722_v31  ;;  %v5277_v29 = vpop.f32.mrb[45].mxu1  ;;  %v6645_v28 = vpop.f32.mrb[49].mxu0 }
 0x47c   : > { %v5278_v45 = vpop.f32.mrb[46].mxu1  ;;  %v6646_v20 = vadd.f32 %v6645_v28, %v6644_v4  ;;  %v6647_v44 = vpop.f32.mrb[50].mxu0 }
 0x47d   : > { %v5497_v8 = vadd.f32 %v5415_v38, %v5276_v54  ;;  %v5279_v21 = vadd.f32 %v5278_v45, %v9725_v11  ;;  %5589 = vrot.lane.b32.xlu1 %v9775_v24, %s7315_s29  ;;  %v5280_v50 = vpop.f32.mrb[47].mxu1  ;;  %v6648_v57 = vpop.f32.mrb[51].mxu0 }
 0x47e   : > { %v6649_v37 = vadd.f32 %v6648_v57, %v6647_v44  ;;  %v9782_v30 = vadd.f32 %v6646_v20, %v9687_v16  ;;  %v5425_v53 = vpop.permute.xlu1 %5424  ;;  %v5430_v19 = vpop.permute.xlu0 %5429 }
 0x47f   : > { %v5498_v55 = vadd.f32 %v5420_v42, %v5279_v21  ;;  %v5522_v52 = vmax.f32 %v5497_v8, 0.0 }
 0x480   : > { %v9785_v31 = vadd.f32 %v6649_v37, %v9693_v58 }
 0x481   : > { %v5523_v12 = vmax.f32 %v5498_v55, 0.0 }
 0x482   : > { %v5283_v46 = vpop.f32.mrb[48].mxu1  ;;  %v6650_v60 = vpop.f32.mrb[52].mxu0 }
 0x483   : > { %v9787_v11 = vpack.c.bf16 %v5523_v12, %v5522_v52  ;;  %v5284_v14 = vadd.f32 %v5283_v46, %v9734_v33  ;;  %v5285_v3 = vpop.f32.mrb[49].mxu1  ;;  %v6651_v63 = vpop.f32.mrb[53].mxu0  ;;  %v7298_v52 = vld [vmem:[%s9976_s8 + $0x4] ss:$8 sps:$4 sm:$0xff]  }
 0x484   : > { %v5286_v7 = vpop.f32.mrb[50].mxu1  ;;  %v6652_v10 = vadd.f32 %v6651_v63, %v6650_v60  ;;  %v6653_v41 = vpop.f32.mrb[54].mxu0  ;;  %6401 = vmatprep.mubr.msk.bf16.mxu0 %vm5611_vm7, %v7298_v52 }
 0x485   : > { %v5499_v16 = vadd.f32 %v5425_v53, %v5284_v14  ;;  %v5287_v51 = vadd.f32 %v5286_v7, %v9737_v35  ;;  %5591 = vrot.lane.b32.xlu0 %v9787_v11, %s7315_s29  ;;  %v5288_v58 = vpop.f32.mrb[51].mxu1  ;;  %v6654_v2 = vpop.f32.mrb[55].mxu0 }
 0x486   : > { %v6655_v1 = vadd.f32 %v6654_v2, %v6653_v41  ;;  %v9794_v47 = vadd.f32 %v6652_v10, %v9699_v26  ;;  %v5435_v13 = vpop.permute.xlu1 %5434  ;;  %v5440_v29 = vpop.permute.xlu0 %5439 }
 0x487   : > { %v5500_v59 = vadd.f32 %v5430_v19, %v5287_v51  ;;  %v5524_v61 = vmax.f32 %v5499_v16, 0.0  ;;  %v5357_v51 = vld [vmem:[%s9974_s6 + $0xa0] sm:$0xff] }
 0x488   : > { %v9797_v33 = vadd.f32 %v6655_v1, %v9705_v18 }
 0x489   : > { %v5525_v5 = vmax.f32 %v5500_v59, 0.0 }
 0x48a   : > { %v5291_v32 = vpop.f32.mrb[52].mxu1  ;;  %v6656_v27 = vpop.f32.mrb[56].mxu0 }
 0x48b   : > { %v9799_v35 = vpack.c.bf16 %v5525_v5, %v5524_v61  ;;  %v5292_v43 = vadd.f32 %v5291_v32, %v9746_v22  ;;  %v5293_v6 = vpop.f32.mrb[53].mxu1  ;;  %v6657_v38 = vpop.f32.mrb[57].mxu0 }
 0x48c   : > { %v5294_v36 = vpop.f32.mrb[54].mxu1  ;;  %v6658_v17 = vadd.f32 %v6657_v38, %v6656_v27  ;;  %v6659_v49 = vpop.f32.mrb[58].mxu0  ;;  %v5361_v27 = vld [vmem:[%s9974_s6 + $0xc0] sm:$0xff] }
 0x48d   : > { %v5501_v26 = vadd.f32 %v5435_v13, %v5292_v43  ;;  %v5295_v4 = vadd.f32 %v5294_v36, %v9749_v62  ;;  %5593 = vrot.lane.b32.xlu1 %v9799_v35, %s7315_s29  ;;  %v5296_v18 = vpop.f32.mrb[55].mxu1  ;;  %v6660_v54 = vpop.f32.mrb[59].mxu0  ;;  %v5358_v43 = vld [vmem:[%s9974_s6 + $0xa8] sm:$0xff] }
 0x48e   : > { %v9806_v28 = vadd.f32 %v6658_v17, %v9711_v39  ;;  %v5445_v57 = vpop.permute.xlu1 %5444  ;;  %v5450_v39 = vpop.permute.xlu0 %5449  ;;  %v5742_v18 = vld [vmem:[%s9977_s9 + $0x10] sm:$0xf] }
 0x48f   : > { %v5502_v45 = vadd.f32 %v5440_v29, %v5295_v4  ;;  %v5526_v20 = vmax.f32 %v5501_v26, 0.0  ;;  %v5740_v4 = vld [vmem:[%s9977_s9] sm:$0xff] }
 0x491   : > { %v5527_v22 = vmax.f32 %v5502_v45, 0.0 }
 0x492   : > { %v5299_v44 = vpop.f32.mrb[56].mxu1  ;;  %v5455_v3 = vpop.permute.xlu1 %5454 }
 0x493   : > { %v9808_v8 = vpack.c.bf16 %v5527_v22, %v5526_v20  ;;  %v5300_v21 = vadd.f32 %v5299_v44, %v9758_v15  ;;  %v5301_v50 = vpop.f32.mrb[57].mxu1  ;;  %v5460_v16 = vpop.permute.xlu0 %5459 }
 0x494   : > { %v5302_v62 = vpop.f32.mrb[58].mxu1 }
 0x495   : > { %v5503_v42 = vadd.f32 %v5445_v57, %v5300_v21  ;;  %v5303_v37 = vadd.f32 %v5302_v62, %v9761_v0  ;;  %5595 = vrot.lane.b32.xlu0 %v9808_v8, %s7315_s29  ;;  %v5304_v55 = vpop.f32.mrb[59].mxu1 }
 0x497   : > { %v5504_v53 = vadd.f32 %v5450_v39, %v5303_v37  ;;  %v5528_v12 = vmax.f32 %v5503_v42, 0.0  ;;  %v5555_v37 = vld [vmem:[%s9976_s8 + $0x10] sm:$0x33]  ;;  %v7296_v39 = vld [vmem:[%s9976_s8] ss:$8 sps:$4 sm:$0xff]  }
 0x498   : > { %v6399_v52 = vcombine.low %v5555_v37, %v5555_v37 }
 0x499   : > { %v5529_v46 = vmax.f32 %v5504_v53, 0.0  ;;  %v6400_v53 = vcombine.high %v5555_v37, %v5555_v37 }
 0x49a   : > { %v5307_v15 = vpop.f32.mrb[60].mxu1 }
 0x49b   : > { %v9818_v60 = vpack.c.bf16 %v5529_v46, %v5528_v12  ;;  %v5308_v0 = vadd.f32 %v5307_v15, %v9770_v23  ;;  %v5309_v14 = vpop.f32.mrb[61].mxu1  ;;  %v5359_v23 = vld [vmem:[%s9974_s6 + $0xb0] sm:$0xff]  ;;  %v7303_v12 = vld [vmem:[%s9975_s7 + $0x4] ss:$8 sps:$4 sm:$0xff]  }
 0x49c   : > { %v5310_v63 = vpop.f32.mrb[62].mxu1 }
 0x49d   : > { %v5505_v7 = vadd.f32 %v5455_v3, %v5308_v0  ;;  %v5311_v10 = vadd.f32 %v5310_v63, %v9773_v34  ;;  %5597 = vrot.lane.b32.xlu1 %v9818_v60, %s7315_s29  ;;  %v5312_v41 = vpop.f32.mrb[63].mxu1 }
 0x49f   : > { %v5506_v58 = vadd.f32 %v5460_v16, %v5311_v10  ;;  %v5530_v2 = vmax.f32 %v5505_v7, 0.0 }
 0x4a1   : > { %v5531_v19 = vmax.f32 %v5506_v58, 0.0  ;;  %5464 = vperm.xlu1 %6829, %v5357_v51   ;;  %v7301_v58 = vld [vmem:[%s9975_s7] ss:$8 sps:$4 sm:$0xff]  }
 0x4a2   : > { %v5315_v1 = vpop.f32.mrb[64].mxu1 }
 0x4a3   : > { %v9830_v59 = vpack.c.bf16 %v5531_v19, %v5530_v2  ;;  %v9833_v34 = vadd.f32 %v5315_v1, %v9782_v30  ;;  %v5317_v13 = vpop.f32.mrb[65].mxu1  ;;  %v5741_v30 = vld [vmem:[%s9977_s9 + $0x8] sm:$0xff] }
 0x4a4   : > { %v5318_v61 = vpop.f32.mrb[66].mxu1 }
 0x4a5   : > { %5474 = vperm.xlu1 %6829, %v5359_v23   ;;  %5599 = vrot.lane.b32.xlu0 %v9830_v59, %s7315_s29  ;;  %v9838_v5 = vadd.f32 %v5318_v61, %v9785_v31  ;;  %v5320_v32 = vpop.f32.mrb[67].mxu1  ;;  %v5360_v31 = vld [vmem:[%s9974_s6 + $0xb8] sm:$0xff] }
 0x4a9   : > { %5484 = vperm.xlu1 %6829, %v5361_v27   ;;  %5469 = vperm.xlu0 %6828, %v5358_v43  }
 0x4aa   : > { %v5323_v6 = vpop.f32.mrb[68].mxu1 }
 0x4ab   : > { %v9853_v38 = vadd.f32 %v5323_v6, %v9794_v47  ;;  %v5325_v36 = vpop.f32.mrb[69].mxu1 }
 0x4ac   : > { %v5326_v17 = vpop.f32.mrb[70].mxu1 }
 0x4ad   : > { %5750 = vperm.xlu1 %6829, %v5741_v30   ;;  %5479 = vperm.xlu0 %6828, %v5360_v31   ;;  %v9856_v49 = vadd.f32 %v5326_v17, %v9797_v33  ;;  %v5328_v26 = vpop.f32.mrb[71].mxu1 }
 0x4ae   : > { %v5764_v26 = vld [vmem:[%s9978_s10] sm:$0xff] }
 0x4b1   : > { %5745 = vperm.xlu0 %6828, %v5740_v4  }
 0x4b2   : > { %v5331_v54 = vpop.f32.mrb[72].mxu1 }
 0x4b3   : > { %v9865_v47 = vadd.f32 %v5331_v54, %v9806_v28  ;;  %v5333_v29 = vpop.f32.mrb[73].mxu1  ;;  %v5770_v54 = vld [vmem:[%s9978_s10 + $0x30] sm:$0xff] }
 0x4b4   : > { %v5334_v45 = vpop.f32.mrb[74].mxu1 }
 0x4b5   : > { %5755 = vperm.xlu0 %6828, %v5742_v18   ;;  %v5335_v20 = vpop.f32.mrb[75].mxu1 }
 0x4b6   : > { %v5768_v20 = vld [vmem:[%s9978_s10 + $0x20] sm:$0xff] }
 0x4cf   : > { %v5582_v33 = vpop.permute.xlu1 %5581 }
 0x4d0   : > { %5619 = vmatpush1.bf16.msra.mxu0 %v5582_v33 }
 0x4d1   : > { %5620 = vmatprep.subr.bf16.mxu0 %v10089_v25 }
 0x4d7   : > { %v5584_v22 = vpop.permute.xlu0 %5583 }
 0x4d8   : > { %5621 = vmatpush1.bf16.msra.mxu0 %v5584_v22 }
 0x4d9   : > { %5622 = vmatprep.subr.bf16.mxu0 %v10089_v25 }
 0x4df   : > { %v5586_v44 = vpop.permute.xlu1 %5585 }
 0x4e0   : > { %5623 = vmatpush1.bf16.msra.mxu0 %v5586_v44 }
 0x4e1   : > { %5624 = vmatprep.subr.bf16.mxu0 %v10089_v25 }
 0x4e7   : > { %v5588_v21 = vpop.permute.xlu0 %5587 }
 0x4e8   : > { %5625 = vmatpush1.bf16.msra.mxu0 %v5588_v21 }
 0x4e9   : > { %5626 = vmatprep.subr.bf16.mxu0 %v10089_v25 }
 0x4ef   : > { %v5590_v28 = vpop.permute.xlu1 %5589 }
 0x4f0   : > { %5627 = vmatpush1.bf16.msra.mxu0 %v5590_v28 }
 0x4f1   : > { %5628 = vmatprep.subr.bf16.mxu0 %v10089_v25 }
 0x4f7   : > { %v5592_v50 = vpop.permute.xlu0 %5591 }
 0x4f8   : > { %5629 = vmatpush1.bf16.msra.mxu0 %v5592_v50 }
 0x4f9   : > { %5630 = vmatprep.subr.bf16.mxu0 %v10089_v25 }
 0x4ff   : > { %v5594_v57 = vpop.permute.xlu1 %5593 }
 0x500   : > { %5631 = vmatpush1.bf16.msra.mxu0 %v5594_v57 }
 0x501   : > { %5632 = vmatprep.subr.bf16.mxu0 %v10089_v25 }
 0x507   : > { %v5596_v62 = vpop.permute.xlu0 %5595 }
 0x508   : > { %5633 = vmatpush1.bf16.msra.mxu0 %v5596_v62 }
 0x509   : > { %5634 = vmatprep.subr.bf16.mxu0 %v10089_v25 }
 0x50f   : > { %v5598_v42 = vpop.permute.xlu1 %5597 }
 0x510   : > { %5635 = vmatpush1.bf16.msra.mxu0 %v5598_v42  ;;  %v5765_v42 = vld [vmem:[%s9978_s10 + $0x8] sm:$0xff] }
 0x511   : > { %5636 = vmatprep.subr.bf16.mxu0 %v10089_v25 }
 0x517   : > { %v5600_v55 = vpop.permute.xlu0 %5599 }
 0x518   : > { %5637 = vmatpush1.bf16.msra.mxu0 %v5600_v55 }
 0x519   : > { %5692 = vmatprep.subr.bf16.mxu0 %v10089_v25 }
 0x51b   : > { %5651 = vmatmul.mubr.bf16.vlgmr.msra.gmra.mrb[60].mxu0 %v7296_v39 }
 0x51c   : > { %5693 = vmatpush1.bf16.msra.mxu0 %v9727_v56  ;;  %6402 = vmatprep.mubr.msk.bf16.mxu0 %vm5611_vm7, %v6400_v53  ;;  %v5769_v53 = vld [vmem:[%s9978_s10 + $0x28] sm:$0xf] }
 0x51d   : > { %5694 = vmatprep.subr.bf16.mxu0 %v10089_v25 }
 0x520   : > { %5695 = vmatpush1.bf16.msra.mxu0 %v9739_v48  ;;  %v5465_v46 = vpop.permute.xlu1 %5464 }
 0x521   : > { %5696 = vmatprep.subr.bf16.mxu0 %v10089_v25  ;;  %v5507_v56 = vadd.f32 %v5465_v46, %v9833_v34 }
 0x523   : > { %5659 = vmatmul.mubr.bf16.gmra.mrb[64].mxu0 %v6399_v52  ;;  %v5532_v14 = vmax.f32 %v5507_v56, 0.0 }
 0x524   : > { %5697 = vmatpush1.bf16.msra.mxu0 %v9751_v40  ;;  %6407 = vmatprep.mubr.msk.bf16.mxu0 %vm5681_vm8, %v7303_v12  ;;  %v5475_v15 = vpop.permute.xlu1 %5474 }
 0x525   : > { %5698 = vmatprep.subr.bf16.mxu0 %v10089_v25  ;;  %v5509_v3 = vadd.f32 %v5475_v15, %v9853_v38  ;;  %v5771_v15 = vld [vmem:[%s9978_s10 + $0x38] sm:$0xff] }
 0x527   : > { %v5534_v41 = vmax.f32 %v5509_v3, 0.0 }
 0x528   : > { %5699 = vmatpush1.bf16.msra.mxu0 %v9763_v9  ;;  %v5470_v48 = vpop.permute.xlu0 %5469 }
 0x529   : > { %v5508_v0 = vadd.f32 %v5470_v48, %v9838_v5  ;;  %5700 = vmatprep.subr.bf16.mxu0 %v10089_v25  ;;  %v5766_v48 = vld [vmem:[%s9978_s10 + $0x10] sm:$0xf] }
 0x52b   : > { %v5533_v63 = vmax.f32 %v5508_v0, 0.0 }
 0x52c   : > { %5701 = vmatpush1.bf16.msra.mxu0 %v9775_v24  ;;  %v5480_v40 = vpop.permute.xlu0 %5479  ;;  %v5485_v24 = vpop.permute.xlu1 %5484 }
 0x52d   : > { %v5547_v7 = vpack.c.bf16 %v5533_v63, %v5532_v14  ;;  %v5510_v10 = vadd.f32 %v5480_v40, %v9856_v49  ;;  %5702 = vmatprep.subr.bf16.mxu0 %v10089_v25  ;;  %v5511_v51 = vadd.f32 %v5485_v24, %v9865_v47  ;;  %v5767_v49 = vld [vmem:[%s9978_s10 + $0x18] sm:$0xff]  ;;  %v5820_v24 = vlaneseq }
 0x52f   : > { %v5535_v16 = vmax.f32 %v5510_v10, 0.0 }
 0x530   : > { %5703 = vmatpush1.bf16.msra.mxu0 %v9787_v11  ;;  %v5536_v11 = vmax.f32 %v5511_v51, 0.0  ;;  %v5746_v30 = vpop.permute.xlu0 %5745  ;;  %v5751_v17 = vpop.permute.xlu1 %5750 }
 0x531   : > { %v5548_v9 = vpack.c.bf16 %v5535_v16, %v5534_v41  ;;  %5704 = vmatprep.subr.bf16.mxu0 %v10089_v25 }
 0x534   : > { %5705 = vmatpush1.bf16.msra.mxu0 %v9799_v35  ;;  %v5549_v35 = vpack.c.bf16 %v5536_v11, %v5536_v11  ;;  %v5756_v57 = vpop.permute.xlu0 %5755 }
 0x535   : > { %5706 = vmatprep.subr.bf16.mxu0 %v10089_v25 }
 0x538   : > { %5707 = vmatpush1.bf16.msra.mxu0 %v9808_v8  ;;  %v5552_v8 = vld [vmem:[%s9975_s7 + $0x10] sm:$0x33] }
 0x539   : > { %5708 = vmatprep.subr.bf16.mxu0 %v10089_v25  ;;  %v6406_v2 = vcombine.high %v5552_v8, %v5552_v8  ;;  %v6405_v19 = vcombine.low %v5552_v8, %v5552_v8 }
 0x53c   : > { %5709 = vmatpush1.bf16.msra.mxu0 %v9818_v60  ;;  %v5690_v60 = vsel %vm5688_vm9, %v5549_v35, 0  ;;  %v5821_v35 = vand.u32 127, %v5820_v24 }
 0x53d   : > { %5710 = vmatprep.subr.bf16.mxu0 %v10089_v25 }
 0x540   : > { %5711 = vmatpush1.bf16.msra.mxu0 %v9830_v59 }
 0x541   : > { %5712 = vmatprep.subr.bf16.mxu0 %v10089_v25 }
 0x544   : > { %5713 = vmatpush1.bf16.msra.mxu0 %v5547_v7  ;;  %v5772_v7 = vld [vmem:[%s9978_s10 + $0x40] sm:$0xf] }
 0x545   : > { %5714 = vmatprep.subr.bf16.mxu0 %v10089_v25 }
 0x548   : > { %5715 = vmatpush1.bf16.msra.mxu0 %v5548_v9 }
 0x549   : > { %5716 = vmatprep.subr.bf16.mxu0 %v10089_v25 }
 0x54c   : > { %5717 = vmatpush1.bf16.msra.mxu0 %v5690_v60 }
 0x54f   : > { %5725 = vmatmul.mubr.bf16.vlgmr.msra.gmra.mrb[68].mxu0 %v7301_v58  ;;  %v5823_v58 = vshrl.u32 %v5820_v24, 7 }
 0x550   : > { %6408 = vmatprep.mubr.msk.bf16.mxu0 %vm5681_vm8, %v6406_v2  ;;  %v5826_v2 = vadd.s32 4294967288, %v5821_v35 }
 0x557   : > { %5733 = vmatmul.mubr.bf16.gmra.mrb[72].mxu0 %v6405_v19  ;;  %v5833_v19 = vadd.s32 4294967280, %v5821_v35 }
 0x5ee   : > { %v5652_v23 = vpop.f32.mrb[60].mxu0 }
 0x5ef   : > { %v5654_v1 = vpop.f32.mrb[61].mxu0 }
 0x5f0   : > { %v5655_v59 = vpop.f32.mrb[62].mxu0 }
 0x5f1   : > { %v5657_v25 = vpop.f32.mrb[63].mxu0 }
 0x5f2   : > { %v5829_v25 = vsub.s32 %v5826_v2, %v5823_v58 }
 0x5f6   : > { %v5660_v34 = vpop.f32.mrb[64].mxu0 }
 0x5f7   : > { %v5662_v13 = vpop.f32.mrb[65].mxu0 }
 0x5f8   : > { %v5663_v61 = vpop.f32.mrb[66].mxu0 }
 0x5f9   : > { %v5664_v5 = vpop.f32.mrb[67].mxu0 }
 0x622   : > { %v5726_v32 = vpop.f32.mrb[68].mxu0 }
 0x623   : > { %v5727_v27 = vadd.f32 %v5726_v32, %v5652_v23  ;;  %v5728_v43 = vpop.f32.mrb[69].mxu0 }
 0x624   : > { %v5729_v31 = vpop.f32.mrb[70].mxu0 }
 0x625   : > { %v5758_v6 = vadd.f32 %v5746_v30, %v5727_v27  ;;  %v5730_v38 = vadd.f32 %v5729_v31, %v5655_v59  ;;  %v5731_v36 = vpop.f32.mrb[71].mxu0  ;;  %v5824_v59 = vsub.s32 %v5821_v35, %v5823_v58 }
 0x627   : > { %v5761_v4 = vmax.f32 %v5758_v6, 0.0  ;;  %v5759_v18 = vadd.f32 %v5751_v17, %v5730_v38 }
 0x629   : > { %v5762_v47 = vmax.f32 %v5759_v18, 0.0  ;;  %v5776_v29 = vmul.f32 %v5767_v49, %v5761_v4  ;;  %v5773_v45 = vmul.f32 %v5764_v26, %v5761_v4  ;;  %v5779_v28 = vmul.f32 %v5770_v54, %v5761_v4 }
 0x62a   : > { %v5734_v33 = vpop.f32.mrb[72].mxu0 }
 0x62b   : > { %v5735_v22 = vadd.f32 %v5734_v33, %v5660_v34  ;;  %v5793_v44 = vsel %vm5782_vm10, %v5776_v29, 0.0  ;;  %v5783_v21 = vsel %vm5782_vm10, %v5773_v45, 0.0  ;;  %v5736_v50 = vpop.f32.mrb[73].mxu0  ;;  %v5777_v62 = vmul.f32 %v5768_v20, %v5762_v47  ;;  %v5877_v33 = vld [vmem:[%s9979_s11] sm:$0x7] }
 0x62c   : > { %5794 = vadd.xlane.f32.xlu0 %v5793_v44  ;;  %5784 = vadd.xlane.f32.xlu1 %v5783_v21  ;;  %v5737_v37 = vpop.f32.mrb[74].mxu0  ;;  %v5802_v12 = vsel %vm5782_vm10, %v5779_v28, 0.0  ;;  %v5774_v56 = vmul.f32 %v5765_v42, %v5762_v47  ;;  %v5780_v63 = vmul.f32 %v5771_v15, %v5762_v47  ;;  %v5836_v34 = vsub.s32 %v5833_v19, %v5823_v58 }
 0x62d   : > { %v5760_v55 = vadd.f32 %v5756_v57, %v5735_v22  ;;  %v5738_v39 = vpop.f32.mrb[75].mxu0  ;;  %v5796_v46 = vsel %vm5782_vm10, %v5777_v62, 0.0 }
 0x62e   : > { %v5786_v14 = vsel %vm5782_vm10, %v5774_v56, 0.0  ;;  %v5805_v10 = vsel %vm5782_vm10, %v5780_v63, 0.0 }
 0x62f   : > { %v5763_v52 = vmax.f32 %v5760_v55, 0.0 }
 0x630   : > { %5803 = vadd.xlane.f32.xlu0 %v5802_v12  ;;  %5797 = vadd.xlane.f32.xlu1 %v5796_v46 }
 0x631   : > { %v5778_v0 = vmul.f32 %v5769_v53, %v5763_v52  ;;  %v5775_v40 = vmul.f32 %v5766_v48, %v5763_v52  ;;  %v5781_v16 = vmul.f32 %v5772_v7, %v5763_v52 }
 0x633   : > { %v5799_v3 = vsel %vm5789_vm11, %v5778_v0, 0.0  ;;  %v5790_v41 = vsel %vm5789_vm11, %v5775_v40, 0.0  ;;  %v5808_v9 = vsel %vm5789_vm11, %v5781_v16, 0.0 }
 0x634   : > { %5787 = vadd.xlane.f32.xlu0 %v5786_v14  ;;  %5800 = vadd.xlane.f32.xlu1 %v5799_v3 }
 0x638   : > { %5806 = vadd.xlane.f32.xlu1 %v5805_v10  ;;  %5791 = vadd.xlane.f32.xlu0 %v5790_v41 }
 0x63c   : > { %5809 = vadd.xlane.f32.xlu0 %v5808_v9 }
 0x6b9   : > { %v5785_v51 = vpop.xlane.xlu1 %5784  ;;  %v5795_v11 = vpop.xlane.xlu0 %5794 }
 0x6ba   : > { %v5825_v32 = vrot.slane %v5785_v51, %v5824_v59  ;;  %v5843_v6 = vrot.slane %v5795_v11, %v5824_v59 }
 0x6bd   : > { %v5798_v8 = vpop.xlane.xlu1 %5797  ;;  %v5804_v60 = vpop.xlane.xlu0 %5803 }
 0x6be   : > { %v5847_v27 = vrot.slane %v5798_v8, %v5829_v25  ;;  %v5857_v36 = vrot.slane %v5804_v60, %v5824_v59 }
 0x6c0   : > { %v5848_v26 = vsel %vm5831_vm12, %v5847_v27, %v5843_v6 }
 0x6c1   : > { %v5801_v23 = vpop.xlane.xlu1 %5800  ;;  %v5788_v1 = vpop.xlane.xlu0 %5787 }
 0x6c2   : > { %v5830_v13 = vrot.slane %v5788_v1, %v5829_v25  ;;  %v5852_v30 = vrot.slane %v5801_v23, %v5836_v34 }
 0x6c4   : > { %v5832_v38 = vsel %vm5831_vm12, %v5830_v13, %v5825_v32  ;;  %v5853_v18 = vsel %vm5838_vm13, %v5852_v30, %v5848_v26 }
 0x6c5   : > { %v5807_v61 = vpop.xlane.xlu1 %5806  ;;  %v5792_v5 = vpop.xlane.xlu0 %5791 }
 0x6c6   : > { %v5837_v43 = vrot.slane %v5792_v5, %v5836_v34  ;;  %v5861_v31 = vrot.slane %v5807_v61, %v5829_v25 }
 0x6c8   : > { %v5839_v17 = vsel %vm5838_vm13, %v5837_v43, %v5832_v38  ;;  %v5862_v54 = vsel %vm5831_vm12, %v5861_v31, %v5857_v36 }
 0x6c9   : > { %v5810_v49 = vpop.xlane.xlu0 %5809  ;;  %v5869_v29 = vsel %vm5868_vm14, %v5853_v18, %v5839_v17 }
 0x6ca   : > { %v5866_v4 = vrot.slane %v5810_v49, %v5836_v34 }
 0x6cc   : > { %v5867_v47 = vsel %vm5838_vm13, %v5866_v4, %v5862_v54 }
 0x6cd   : > { %v5871_v45 = vsel %vm5870_vm15, %v5867_v47, %v5869_v29 }
 0x6ce   : > { %v5874_v20 = vsel %vm5873_vm0, %v5871_v45, 0.0 }
 0x6cf   : > { %5875 = vadd.xlane.f32.xlu1 %v5874_v20 }
 0x75c   : > { %v5876_v22 = vpop.xlane.xlu1 %5875 }
 0x75d   : > { %v5878_v44 = vadd.f32 %v5877_v33, %v5876_v22 }
 0x75f   : > { %5880 = vst.msk [vmem:[%s411_s27] sm:$0x7] %vm5879_vm1, %v5878_v44 }
 0x760 PF: > { %s22_s21 = sadd.s32 1, %s7312_s21  }
 0x761   : > { %p19_p4 = scmp.ge.s32.totalorder %s22_s21, 4  }
 0x763   :  { %21 = sbr.rel (!%p19_p4) target bundleno = 1 (0x1), region = 98 }

</bundles_post_ra>
